<compile_context>
chip_gen: v6e
topology: v6e:2x2x1
jax: 0.10.0
libtpu: 0.0.40
codegen_flags: <defaults>
</compile_context>

<pallas_src>
import jax
import jax.numpy as jnp
from jax.experimental import pallas as pl
from jax.experimental.pallas import tpu as pltpu


def _ru(x, m):
    return ((x + m - 1) // m) * m


# ----------------------------- Fused Pallas kernel ----------------------------- #

def _bahdanau_decode_kernel(tlen_ref,                                    # SMEM (1,) int32
                            x_ref, h0_ref, mem_ref, mua_ref,             # inputs
                            wa_ref, va_ref,
                            wrz_ref, brz_ref, winn_ref, binn_ref, whn_ref, bhn_ref,
                            wout_ref, bout_ref,
                            out_ref, attw_ref, ctx_ref, hout_ref):       # outputs
    s = pl.program_id(0)

    # Hidden-state carry: hout_ref has a constant index_map -> stays VMEM-resident
    # across the sequential ("arbitrary") decode grid axis (accumulator pattern).
    @pl.when(s == 0)
    def _():
        hout_ref[...] = h0_ref[...]

    h = hout_ref[...]                      # (Bp, Hp)  f32 decoder state
    x = x_ref[...]                         # (Bp, Ip)  f32 current decode input
    t_len = tlen_ref[0]                    # actual memory length (dynamic scalar)
    cdt = wa_ref.dtype                     # MXU operand dtype (bf16 by default)
    Hp = h.shape[-1]

    # ---------------- Bahdanau additive attention ----------------
    # scores[b,t] = va . tanh(Wa h[b] + Ua m[b,t] + ba) ; (Ua m + ba) precomputed.
    hWa = jnp.dot(h.astype(cdt), wa_ref[...],
                  preferred_element_type=jnp.float32)                    # (Bp, Hp) f32
    e = jnp.tanh(mua_ref[...] + hWa[:, None, :])                         # (Bp, Tp, Hp) f32
    scores = jnp.sum(e * va_ref[...][None, :, :], axis=-1)               # (Bp, Tp) lane-dense

    # Masked, lane-dense softmax over the memory/time axis (lanes).
    t_pos = jax.lax.broadcasted_iota(jnp.int32, scores.shape, 1)
    scores = jnp.where(t_pos < t_len, scores, -1e30)
    m = jnp.max(scores, axis=-1, keepdims=True)                          # (Bp, 1)
    p = jnp.exp(scores - m)
    denom = jnp.sum(p, axis=-1, keepdims=True)
    w = p * pl.reciprocal(denom, approx=True)                            # (Bp, Tp)

    # Context on the MXU (batched contraction over t): (Bp,1,Tp) @ (Bp,Tp,Hp).
    ctx = jnp.einsum('bqt,bth->bqh',
                     w[:, None, :].astype(mem_ref.dtype), mem_ref[...],
                     preferred_element_type=jnp.float32)[:, 0, :]        # (Bp, Hp) f32

    # ---------------- GRU cell on cat(input, context) ----------------
    # r/z pre-activations merged into ONE matmul of cat(x, ctx, h); n-gate separate.
    ginh = jnp.concatenate([x, ctx, h], axis=-1).astype(cdt)             # (Bp, Ip+2Hp)
    rz = jax.nn.sigmoid(jnp.dot(ginh, wrz_ref[...],
                                preferred_element_type=jnp.float32) + brz_ref[...])
    r = rz[:, :Hp]
    z = rz[:, Hp:]
    gin = ginh[:, :ginh.shape[-1] - Hp]                                  # (Bp, Ip+Hp) = cat(x, ctx)
    gi_n = jnp.dot(gin, winn_ref[...],
                   preferred_element_type=jnp.float32) + binn_ref[...]
    gh_n = jnp.dot(h.astype(cdt), whn_ref[...],
                   preferred_element_type=jnp.float32) + bhn_ref[...]
    n = jnp.tanh(gi_n + r * gh_n)
    h_new = (1.0 - z) * n + z * h                                        # (Bp, Hp) f32

    # ---------------- Output: tanh(Linear(cat(h', ctx))), dropout = identity (eval) ----
    hc = jnp.concatenate([h_new, ctx], axis=-1).astype(cdt)              # (Bp, 2Hp)
    out = jnp.tanh(jnp.dot(hc, wout_ref[...],
                           preferred_element_type=jnp.float32) + bout_ref[...])

    out_ref[...] = out
    attw_ref[...] = w                      # lane-dense (Bp, Tp) store
    ctx_ref[...] = ctx
    hout_ref[...] = h_new                  # carry to next decode step


# ------------------------------ jitted sequence wrapper ------------------------------ #

@jax.jit
def _decode_steps(t_len, xs, h_pad, mem_bf16, mua_pad, params):
    (wa_t, va, w_rz, b_rz, w_in_n, b_in_n, w_hn, b_hn, wout_t, bout) = params
    S, B, insize = xs.shape
    Bp, Hp = h_pad.shape
    Tp = mem_bf16.shape[1]
    Ip = w_in_n.shape[0] - Hp
    Op = wout_t.shape[1]

    # Pad the whole decode-input sequence once (not per token).
    xs_pad = (jnp.zeros((S, Bp, Ip), jnp.float32)
              .at[:, :B, :insize].set(xs.astype(jnp.float32)))

    # Explicit VMEM budget (v5e scoped default is only 16 MiB; v7x physical is 64 MiB).
    operands = (xs_pad, h_pad, mem_bf16, mua_pad) + tuple(params)
    need = sum(int(a.size) * a.dtype.itemsize for a in operands)
    need += 2 * Bp * (Op + Tp + 2 * Hp) * 4            # double-buffered per-step outputs
    vmem_limit = int(min(max(2 * need + (2 << 20), 16 << 20), 48 << 20))

    grid_spec = pltpu.PrefetchScalarGridSpec(
        num_scalar_prefetch=1,                         # t_len -> SMEM (no recompile per T)
        grid=(S,),                                     # decode steps (sequential h carry)
        in_specs=[
            pl.BlockSpec((None, Bp, Ip), lambda s, t: (s, 0, 0)),      # xs: per-step block
            pl.BlockSpec((Bp, Hp), lambda s, t: (0, 0)),               # h0 (used at step 0)
            pl.BlockSpec((Bp, Tp, Hp), lambda s, t: (0, 0, 0)),        # memory (bf16), resident
            pl.BlockSpec((Bp, Tp, Hp), lambda s, t: (0, 0, 0)),        # mUa + ba (f32), resident
            pl.BlockSpec((Hp, Hp), lambda s, t: (0, 0)),               # Wa^T
            pl.BlockSpec((1, Hp), lambda s, t: (0, 0)),                # va
            pl.BlockSpec((Ip + 2 * Hp, 2 * Hp), lambda s, t: (0, 0)),  # merged r/z weights
            pl.BlockSpec((1, 2 * Hp), lambda s, t: (0, 0)),            # merged r/z bias
            pl.BlockSpec((Ip + Hp, Hp), lambda s, t: (0, 0)),          # n-gate input weights
            pl.BlockSpec((1, Hp), lambda s, t: (0, 0)),                # n-gate input bias
            pl.BlockSpec((Hp, Hp), lambda s, t: (0, 0)),               # n-gate hidden weights
            pl.BlockSpec((1, Hp), lambda s, t: (0, 0)),                # n-gate hidden bias
            pl.BlockSpec((2 * Hp, Op), lambda s, t: (0, 0)),           # output weights
            pl.BlockSpec((1, Op), lambda s, t: (0, 0)),                # output bias
        ],
        out_specs=(
            pl.BlockSpec((None, Bp, Op), lambda s, t: (s, 0, 0)),      # out[s]
            pl.BlockSpec((None, Bp, Tp), lambda s, t: (s, 0, 0)),      # attw[s] (lane-dense)
            pl.BlockSpec((None, Bp, Hp), lambda s, t: (s, 0, 0)),      # ctx[s]
            pl.BlockSpec((Bp, Hp), lambda s, t: (0, 0)),               # hidden carry / final h
        ),
    )

    out_p, attw_p, ctx_p, h_fin = pl.pallas_call(
        _bahdanau_decode_kernel,
        grid_spec=grid_spec,
        out_shape=(
            jax.ShapeDtypeStruct((S, Bp, Op), jnp.float32),
            jax.ShapeDtypeStruct((S, Bp, Tp), jnp.float32),
            jax.ShapeDtypeStruct((S, Bp, Hp), jnp.float32),
            jax.ShapeDtypeStruct((Bp, Hp), jnp.float32),
        ),
        compiler_params=pltpu.CompilerParams(
            dimension_semantics=("arbitrary",),        # sequential dependence through h
            vmem_limit_bytes=vmem_limit,
        ),
    )(t_len, xs_pad, h_pad, mem_bf16, mua_pad, *params)
    return out_p, attw_p, ctx_p, h_fin


# -------------------------- BahdanauDecoder equivalent -------------------------- #

class BahdanauDecoderPallas:
    def __init__(self, insize, hidden_size, out_size, drop, key,
                 param_dtype=jnp.bfloat16):
        H = hidden_size
        self.insize, self.hidden_size, self.out_size = insize, H, out_size
        self.drop = drop                       # eval-mode dropout (identity)
        bound = 1.0 / float(H) ** 0.5
        keys = jax.random.split(key, 10)

        def u(k, shape):
            return jax.random.uniform(k, shape, jnp.float32, -bound, bound)

        # GRUCell(insize + H, H): torch layout, gate order [r, z, n].
        w_ih = u(keys[0], (3 * H, insize + H))
        w_hh = u(keys[1], (3 * H, H))
        b_ih = u(keys[2], (3 * H,))
        b_hh = u(keys[3], (3 * H,))
        # Output Linear(2H -> out_size).
        w_out = u(keys[4], (out_size, 2 * H))
        b_out = u(keys[5], (out_size,))
        # Built-in Bahdanau additive attention parameters.
        w_a = u(keys[6], (H, H))
        u_a = u(keys[7], (H, H))
        b_a = u(keys[8], (H,))
        v_a = u(keys[9], (H,))
        self._raw_params = (w_ih, w_hh, b_ih, b_hh, w_out, b_out, w_a, u_a, b_a, v_a)

        Ip, Hp, Op = _ru(insize, 128), _ru(H, 128), _ru(out_size, 128)
        self.Ip, self.Hp, self.Op = Ip, Hp, Op

        # --- Pre-transposed, zero-padded, 128-lane-aligned weights (built ONCE) ---
        wt_ih, wt_hh = w_ih.T, w_hh.T                   # (insize+H, 3H), (H, 3H)
        # Merged r/z block: rows = [x | ctx | h], cols = [r gate | z gate].
        w_rz = jnp.zeros((Ip + 2 * Hp, 2 * Hp), jnp.float32)
        b_rz = jnp.zeros((1, 2 * Hp), jnp.float32)
        for g in range(2):                              # g=0 -> r, g=1 -> z
            c0 = g * Hp
            blk = wt_ih[:, g * H:(g + 1) * H]
            w_rz = w_rz.at[:insize, c0:c0 + H].set(blk[:insize])            # x rows
            w_rz = w_rz.at[Ip:Ip + H, c0:c0 + H].set(blk[insize:])          # ctx rows
            w_rz = w_rz.at[Ip + Hp:Ip + Hp + H, c0:c0 + H].set(wt_hh[:, g * H:(g + 1) * H])
            b_rz = b_rz.at[0, c0:c0 + H].set(b_ih[g * H:(g + 1) * H] + b_hh[g * H:(g + 1) * H])
        # n gate: input path (cat(x, ctx)) and hidden path (h) kept separate (GRU math).
        w_in_n = jnp.zeros((Ip + Hp, Hp), jnp.float32)
        blk = wt_ih[:, 2 * H:3 * H]
        w_in_n = w_in_n.at[:insize, :H].set(blk[:insize])
        w_in_n = w_in_n.at[Ip:Ip + H, :H].set(blk[insize:])
        b_in_n = jnp.zeros((1, Hp), jnp.float32).at[0, :H].set(b_ih[2 * H:3 * H])
        w_hn = jnp.zeros((Hp, Hp), jnp.float32).at[:H, :H].set(wt_hh[:, 2 * H:3 * H])
        b_hn = jnp.zeros((1, Hp), jnp.float32).at[0, :H].set(b_hh[2 * H:3 * H])
        # Output Linear: rows [0:H] <- h part, rows [Hp:Hp+H] <- context part.
        wout_t = jnp.zeros((2 * Hp, Op), jnp.float32)
        wout_t = wout_t.at[:H, :out_size].set(w_out.T[:H])
        wout_t = wout_t.at[Hp:Hp + H, :out_size].set(w_out.T[H:])
        bout = jnp.zeros((1, Op), jnp.float32).at[0, :out_size].set(b_out)
        # Attention params (Ua is only used at init-time precompute, not in the kernel).
        wa_t = jnp.zeros((Hp, Hp), jnp.float32).at[:H, :H].set(w_a.T)
        va = jnp.zeros((1, Hp), jnp.float32).at[0, :H].set(v_a)

        pd = param_dtype
        self._params = (wa_t.astype(pd), va,
                        w_rz.astype(pd), b_rz, w_in_n.astype(pd), b_in_n,
                        w_hn.astype(pd), b_hn,
                        wout_t.astype(pd), bout)

        self.mem_bf16 = None
        self.mua_pad = None
        self.last_h_pad = None
        self.t_len = None
        self.batch = None
        self.t_actual = None

    def init(self, memory):
        # memory: (B, T, H); last_h = memory[:, -1, :]
        B, T, H = memory.shape
        assert H == self.hidden_size
        Bp, Tp, Hp = _ru(B, 8), _ru(T, 128), self.Hp
        memory = memory.astype(jnp.float32)
        mem_pad = jnp.zeros((Bp, Tp, Hp), jnp.float32).at[:B, :T, :H].set(memory)
        self.mem_bf16 = mem_pad.astype(jnp.bfloat16)        # bf16 residency (VMEM budget)
        # Step-invariant memory projection, computed ONCE: Ua m + ba.
        u_a, b_a = self._raw_params[7], self._raw_params[8]
        mua = jnp.einsum('bth,ah->bta', memory, u_a) + b_a   # (B, T, H) f32
        self.mua_pad = jnp.zeros((Bp, Tp, Hp), jnp.float32).at[:B, :T, :H].set(mua)
        self.last_h_pad = (jnp.zeros((Bp, Hp), jnp.float32)
                           .at[:B, :H].set(memory[:, -1, :]))
        self.t_len = jnp.array([T], jnp.int32)               # dynamic SMEM scalar prefetch
        self.batch, self.t_actual = B, T

    def forward_seq(self, xs):
        # xs: (S, B, insize) -> ONE fused kernel launch for all S decode steps.
        S, B, _ = xs.shape
        out_p, attw_p, ctx_p, h_fin = _decode_steps(
            self.t_len, xs, self.last_h_pad, self.mem_bf16, self.mua_pad, self._params)
        self.last_h_pad = h_fin                               # persistent decoder state (padded)
        return (out_p[:, :B, :self.out_size],
                attw_p[:, :B, :self.t_actual],
                ctx_p[:, :B, :self.hidden_size])

    def forward(self, x, att_fn=None):
        # Single decode step (PyTorch BahdanauDecoder.forward semantics).
        # att_fn is ignored: a learned Bahdanau additive attention is fused in-kernel.
        out, att_w, ctx = self.forward_seq(x[None])
        return out[0], att_w[0], ctx[0]


# --------------------------- Pure-JAX f32 reference --------------------------- #

def _reference_decode(xs, memory, raw_params):
    w_ih, w_hh, b_ih, b_hh, w_out, b_out, w_a, u_a, b_a, v_a = raw_params
    H = w_hh.shape[1]
    h = memory[:, -1, :]
    outs, attws, ctxs = [], [], []
    for s in range(xs.shape[0]):
        x = xs[s]
        e = jnp.tanh(jnp.einsum('bth,ah->bta', memory, u_a)
                     + (h @ w_a.T)[:, None, :] + b_a)
        sc = jnp.einsum('bta,a->bt', e, v_a)
        w = jax.nn.softmax(sc, axis=-1)
        ctx = jnp.einsum('bt,bth->bh', w, memory)
        gin = jnp.concatenate([x, ctx], axis=-1)
        gi = gin @ w_ih.T + b_ih
        gh = h @ w_hh.T + b_hh
        r = jax.nn.sigmoid(gi[:, :H] + gh[:, :H])
        z = jax.nn.sigmoid(gi[:, H:2 * H] + gh[:, H:2 * H])
        n = jnp.tanh(gi[:, 2 * H:] + r * gh[:, 2 * H:])
        h = (1.0 - z) * n + z * h
        out = jnp.tanh(jnp.concatenate([h, ctx], axis=-1) @ w_out.T + b_out)
        outs.append(out); attws.append(w); ctxs.append(ctx)
    return jnp.stack(outs), jnp.stack(attws), jnp.stack(ctxs), h


# --------------------------------------- Main ----------------------------------------- #

if __name__ == "__main__":
    B, T, S_dec = 2, 8, 3
    insize, hidden_size, out_size = 32, 32, 16
    drop = 0.1

    key = jax.random.PRNGKey(0)
    key, k_mem, k_in, k_params = jax.random.split(key, 4)
    memory = jax.random.normal(k_mem, (B, T, hidden_size), jnp.float32)
    xs = jax.random.normal(k_in, (S_dec, B, insize), jnp.float32)

    # Fused multi-step decode: one kernel launch for all S_dec tokens.
    dec = BahdanauDecoderPallas(insize, hidden_size, out_size, drop, k_params)
    dec.init(memory)
    outs, attws, ctxs = dec.forward_seq(xs)
    jax.block_until_ready((outs, attws, ctxs))

    # Single-step API (PyTorch forward() semantics) on a fresh decoder state.
    dec1 = BahdanauDecoderPallas(insize, hidden_size, out_size, drop, k_params)
    dec1.init(memory)
    o0, a0, c0 = dec1.forward(xs[0])
    o1, a1, c1 = dec1.forward(xs[1])
    jax.block_until_ready((o0, o1))

    # Pure-JAX f32 reference.
    ref_out, ref_attw, ref_ctx, _ = _reference_decode(xs, memory, dec._raw_params)

    assert outs.shape == (S_dec, B, out_size)
    assert attws.shape == (S_dec, B, T)
    assert ctxs.shape == (S_dec, B, hidden_size)
    assert bool(jnp.all(jnp.isfinite(outs)))
    assert bool(jnp.all(jnp.abs(jnp.sum(attws, axis=-1) - 1.0) < 1e-2))
    assert bool(jnp.all(jnp.abs(outs) <= 1.0))                     # tanh-bounded output
    assert float(jnp.max(jnp.abs(outs - ref_out))) < 1e-1          # bf16 MXU drift tolerance
    assert float(jnp.max(jnp.abs(attws - ref_attw))) < 3e-2
    assert float(jnp.max(jnp.abs(ctxs - ref_ctx))) < 1e-1
    # Single-step path agrees with the fused multi-step path (state carry correct).
    assert float(jnp.max(jnp.abs(o0 - outs[0]))) < 1e-3
    assert float(jnp.max(jnp.abs(o1 - outs[1]))) < 1e-3
    print("KERNEL_OK")
</pallas_src>

<mosaic_0001>
module attributes {stable_mosaic.version = 11 : i64} {
  func.func @_bahdanau_decode_kernel(%arg0: i32, %arg1: memref<1xi32, #tpu.memory_space<smem>>, %arg2: memref<1x8x128xf32, #tpu.memory_space<vmem>>, %arg3: memref<8x128xf32, #tpu.memory_space<vmem>>, %arg4: memref<8x128x128xbf16, #tpu.memory_space<vmem>>, %arg5: memref<8x128x128xf32, #tpu.memory_space<vmem>>, %arg6: memref<128x128xbf16, #tpu.memory_space<vmem>>, %arg7: memref<1x128xf32, #tpu.memory_space<vmem>>, %arg8: memref<384x256xbf16, #tpu.memory_space<vmem>>, %arg9: memref<1x256xf32, #tpu.memory_space<vmem>>, %arg10: memref<256x128xbf16, #tpu.memory_space<vmem>>, %arg11: memref<1x128xf32, #tpu.memory_space<vmem>>, %arg12: memref<128x128xbf16, #tpu.memory_space<vmem>>, %arg13: memref<1x128xf32, #tpu.memory_space<vmem>>, %arg14: memref<256x128xbf16, #tpu.memory_space<vmem>>, %arg15: memref<1x128xf32, #tpu.memory_space<vmem>>, %arg16: memref<1x8x128xf32, #tpu.memory_space<vmem>>, %arg17: memref<1x8x128xf32, #tpu.memory_space<vmem>>, %arg18: memref<1x8x128xf32, #tpu.memory_space<vmem>>, %arg19: memref<8x128xf32, #tpu.memory_space<vmem>>) attributes {dimension_semantics = [#tpu.dimension_semantics<arbitrary>], iteration_bounds = array<i64: 3>, scalar_prefetch = 1 : i64, scratch_operands = 0 : i64, tpu.core_type = #tpu.core_type<tc>, window_params = [{transform_indices = @transform_0, window_bounds = array<i64: 1, 8, 128>}, {pipeline_mode = #tpu.pipeline_mode<synchronous>, transform_indices = @transform_1, window_bounds = array<i64: 8, 128>}, {pipeline_mode = #tpu.pipeline_mode<synchronous>, transform_indices = @transform_2, window_bounds = array<i64: 8, 128, 128>}, {pipeline_mode = #tpu.pipeline_mode<synchronous>, transform_indices = @transform_3, window_bounds = array<i64: 8, 128, 128>}, {pipeline_mode = #tpu.pipeline_mode<synchronous>, transform_indices = @transform_4, window_bounds = array<i64: 128, 128>}, {pipeline_mode = #tpu.pipeline_mode<synchronous>, transform_indices = @transform_5, window_bounds = array<i64: 1, 128>}, {pipeline_mode = #tpu.pipeline_mode<synchronous>, transform_indices = @transform_6, window_bounds = array<i64: 384, 256>}, {pipeline_mode = #tpu.pipeline_mode<synchronous>, transform_indices = @transform_7, window_bounds = array<i64: 1, 256>}, {pipeline_mode = #tpu.pipeline_mode<synchronous>, transform_indices = @transform_8, window_bounds = array<i64: 256, 128>}, {pipeline_mode = #tpu.pipeline_mode<synchronous>, transform_indices = @transform_9, window_bounds = array<i64: 1, 128>}, {pipeline_mode = #tpu.pipeline_mode<synchronous>, transform_indices = @transform_10, window_bounds = array<i64: 128, 128>}, {pipeline_mode = #tpu.pipeline_mode<synchronous>, transform_indices = @transform_11, window_bounds = array<i64: 1, 128>}, {pipeline_mode = #tpu.pipeline_mode<synchronous>, transform_indices = @transform_12, window_bounds = array<i64: 256, 128>}, {pipeline_mode = #tpu.pipeline_mode<synchronous>, transform_indices = @transform_13, window_bounds = array<i64: 1, 128>}, {transform_indices = @transform_14, window_bounds = array<i64: 1, 8, 128>}, {transform_indices = @transform_15, window_bounds = array<i64: 1, 8, 128>}, {transform_indices = @transform_16, window_bounds = array<i64: 1, 8, 128>}, {pipeline_mode = #tpu.pipeline_mode<synchronous>, transform_indices = @transform_17, window_bounds = array<i64: 8, 128>}]} {
    %c0_i32 = arith.constant 0 : i32
    %0 = arith.cmpi eq, %arg0, %c0_i32 : i32
    %1 = arith.extui %0 : i1 to i32
    %c0_i32_0 = arith.constant 0 : i32
    %2 = arith.cmpi ne, %1, %c0_i32_0 : i32
    scf.if %2 {
      %c0_54 = arith.constant 0 : index
      %c0_55 = arith.constant 0 : index
      %92 = vector.load %arg3[%c0_54, %c0_55] : memref<8x128xf32, #tpu.memory_space<vmem>>, vector<8x128xf32>
      %c0_56 = arith.constant 0 : index
      %c0_57 = arith.constant 0 : index
      %93 = vector.load %arg19[%c0_56, %c0_57] : memref<8x128xf32, #tpu.memory_space<vmem>>, vector<8x128xf32>
      tpu.vector_store %arg19[%c0_56, %c0_57], %92 {strides = array<i32>} : memref<8x128xf32, #tpu.memory_space<vmem>>, vector<8x128xf32>,
    } else {
    }
    %c0 = arith.constant 0 : index
    %c0_1 = arith.constant 0 : index
    %3 = vector.load %arg19[%c0, %c0_1] : memref<8x128xf32, #tpu.memory_space<vmem>>, vector<8x128xf32>
    %c0_2 = arith.constant 0 : index
    %c0_3 = arith.constant 0 : index
    %c0_4 = arith.constant 0 : index
    %4 = vector.load %arg2[%c0_2, %c0_3, %c0_4] : memref<1x8x128xf32, #tpu.memory_space<vmem>>, vector<1x8x128xf32>
    %5 = vector.shape_cast %4 : vector<1x8x128xf32> to vector<8x128xf32>
    %c0_5 = arith.constant 0 : index
    %6 = memref.load %arg1[%c0_5] : memref<1xi32, #tpu.memory_space<smem>>
    %7 = arith.truncf %3 : vector<8x128xf32> to vector<8x128xbf16>
    %c0_6 = arith.constant 0 : index
    %c0_7 = arith.constant 0 : index
    %8 = vector.load %arg6[%c0_6, %c0_7] : memref<128x128xbf16, #tpu.memory_space<vmem>>, vector<128x128xbf16>
    %cst = arith.constant dense<0.000000e+00> : vector<8x128xf32>
    %9 = tpu.matmul %7, %8, %cst {dimension_numbers = #tpu.dot_dimension_numbers<[1], [0], [0], [1], [0, 0, 1, 1], [], []>} : vector<8x128xbf16>, vector<128x128xbf16>, vector<8x128xf32> -> vector<8x128xf32>
    %c0_8 = arith.constant 0 : index
    %c0_9 = arith.constant 0 : index
    %c0_10 = arith.constant 0 : index
    %10 = vector.load %arg5[%c0_8, %c0_9, %c0_10] : memref<8x128x128xf32, #tpu.memory_space<vmem>>, vector<8x128x128xf32>
    %11 = vector.shape_cast %9 : vector<8x128xf32> to vector<8x1x128xf32>
    %12 = vector.broadcast %11 : vector<8x1x128xf32> to vector<8x128x128xf32>
    %13 = arith.addf %10, %12 : vector<8x128x128xf32>
    %14 = math.tanh %13 : vector<8x128x128xf32>
    %c0_11 = arith.constant 0 : index
    %c0_12 = arith.constant 0 : index
    %15 = vector.load %arg7[%c0_11, %c0_12] : memref<1x128xf32, #tpu.memory_space<vmem>>, vector<1x128xf32>
    %16 = vector.shape_cast %15 : vector<1x128xf32> to vector<1x1x128xf32>
    %17 = vector.broadcast %16 : vector<1x1x128xf32> to vector<8x128x128xf32>
    %18 = arith.mulf %14, %17 : vector<8x128x128xf32>
    %cst_13 = arith.constant dense<0.000000e+00> : vector<8x128xf32>
    %19 = vector.multi_reduction <add>, %18, %cst_13 [2] : vector<8x128x128xf32> to vector<8x128xf32>
    %20 = tpu.iota {dimensions = array<i32: 1>} : vector<8x128xi32>
    %21 = vector.broadcast %6 : i32 to vector<8x128xi32>
    %22 = arith.cmpi slt, %20, %21 : vector<8x128xi32>
    %cst_14 = arith.constant -1.000000e+30 : f32
    %23 = vector.broadcast %cst_14 : f32 to vector<8x128xf32>
    %24 = arith.select %22, %19, %23 : vector<8x128xi1>, vector<8x128xf32>
    %cst_15 = arith.constant dense<0xFF800000> : vector<8xf32>
    %25 = vector.multi_reduction <maximumf>, %24, %cst_15 [1] : vector<8x128xf32> to vector<8xf32>
    %26 = vector.shape_cast %25 : vector<8xf32> to vector<8x1xf32>
    %27 = vector.broadcast %26 : vector<8x1xf32> to vector<8x128xf32>
    %28 = arith.subf %24, %27 : vector<8x128xf32>
    %29 = math.exp %28 : vector<8x128xf32>
    %cst_16 = arith.constant dense<0.000000e+00> : vector<8xf32>
    %30 = vector.multi_reduction <add>, %29, %cst_16 [1] : vector<8x128xf32> to vector<8xf32>
    %31 = vector.shape_cast %30 : vector<8xf32> to vector<8x1xf32>
    %32 = tpu.reciprocal %31 {approx = true} : vector<8x1xf32> -> vector<8x1xf32>
    %33 = vector.broadcast %32 : vector<8x1xf32> to vector<8x128xf32>
    %34 = arith.mulf %29, %33 : vector<8x128xf32>
    %35 = vector.shape_cast %34 : vector<8x128xf32> to vector<8x1x128xf32>
    %36 = arith.truncf %35 : vector<8x1x128xf32> to vector<8x1x128xbf16>
    %c0_17 = arith.constant 0 : index
    %c0_18 = arith.constant 0 : index
    %c0_19 = arith.constant 0 : index
    %37 = vector.load %arg4[%c0_17, %c0_18, %c0_19] : memref<8x128x128xbf16, #tpu.memory_space<vmem>>, vector<8x128x128xbf16>
    "tpu.trace_start"() <{level = 10 : i32, message = "bqt,bth->bqh"}> : () -> ()
    %cst_20 = arith.constant dense<0.000000e+00> : vector<8x1x128xf32>
    %38 = tpu.matmul %36, %37, %cst_20 {dimension_numbers = #tpu.dot_dimension_numbers<[2], [1], [1], [2], [0, 0, 0, 1, 1, 2], [0], [0]>} : vector<8x1x128xbf16>, vector<8x128x128xbf16>, vector<8x1x128xf32> -> vector<8x1x128xf32>
    "tpu.trace_stop"() : () -> ()
    %39 = vector.shape_cast %38 : vector<8x1x128xf32> to vector<8x128xf32>
    %40 = tpu.concatenate %5, %39, %3 in 1 : vector<8x128xf32>, vector<8x128xf32>, vector<8x128xf32> -> vector<8x384xf32>
    %41 = arith.truncf %40 : vector<8x384xf32> to vector<8x384xbf16>
    %c0_21 = arith.constant 0 : index
    %c0_22 = arith.constant 0 : index
    %42 = vector.load %arg8[%c0_21, %c0_22] : memref<384x256xbf16, #tpu.memory_space<vmem>>, vector<384x256xbf16>
    %cst_23 = arith.constant dense<0.000000e+00> : vector<8x256xf32>
    %43 = tpu.matmul %41, %42, %cst_23 {dimension_numbers = #tpu.dot_dimension_numbers<[1], [0], [0], [1], [0, 0, 1, 1], [], []>} : vector<8x384xbf16>, vector<384x256xbf16>, vector<8x256xf32> -> vector<8x256xf32>
    %c0_24 = arith.constant 0 : index
    %c0_25 = arith.constant 0 : index
    %44 = vector.load %arg9[%c0_24, %c0_25] : memref<1x256xf32, #tpu.memory_space<vmem>>, vector<1x256xf32>
    %45 = vector.broadcast %44 : vector<1x256xf32> to vector<8x256xf32>
    %46 = arith.addf %43, %45 : vector<8x256xf32>
    %47 = arith.negf %46 : vector<8x256xf32>
    %48 = math.exp %47 : vector<8x256xf32>
    %cst_26 = arith.constant 1.000000e+00 : f32
    %49 = vector.broadcast %cst_26 : f32 to vector<8x256xf32>
    %50 = arith.addf %49, %48 : vector<8x256xf32>
    %51 = arith.divf %49, %50 : vector<8x256xf32>
    %52 = vector.extract_strided_slice %51 {offsets = [0, 0], sizes = [8, 128], strides = [1, 1]} : vector<8x256xf32> to vector<8x128xf32>
    %53 = vector.extract_strided_slice %51 {offsets = [0, 128], sizes = [8, 128], strides = [1, 1]} : vector<8x256xf32> to vector<8x128xf32>
    %54 = vector.extract_strided_slice %41 {offsets = [0, 0], sizes = [8, 256], strides = [1, 1]} : vector<8x384xbf16> to vector<8x256xbf16>
    %c0_27 = arith.constant 0 : index
    %c0_28 = arith.constant 0 : index
    %55 = vector.load %arg10[%c0_27, %c0_28] : memref<256x128xbf16, #tpu.memory_space<vmem>>, vector<256x128xbf16>
    %cst_29 = arith.constant dense<0.000000e+00> : vector<8x128xf32>
    %56 = tpu.matmul %54, %55, %cst_29 {dimension_numbers = #tpu.dot_dimension_numbers<[1], [0], [0], [1], [0, 0, 1, 1], [], []>} : vector<8x256xbf16>, vector<256x128xbf16>, vector<8x128xf32> -> vector<8x128xf32>
    %c0_30 = arith.constant 0 : index
    %c0_31 = arith.constant 0 : index
    %57 = vector.load %arg11[%c0_30, %c0_31] : memref<1x128xf32, #tpu.memory_space<vmem>>, vector<1x128xf32>
    %58 = vector.broadcast %57 : vector<1x128xf32> to vector<8x128xf32>
    %59 = arith.addf %56, %58 : vector<8x128xf32>
    %60 = arith.truncf %3 : vector<8x128xf32> to vector<8x128xbf16>
    %c0_32 = arith.constant 0 : index
    %c0_33 = arith.constant 0 : index
    %61 = vector.load %arg12[%c0_32, %c0_33] : memref<128x128xbf16, #tpu.memory_space<vmem>>, vector<128x128xbf16>
    %cst_34 = arith.constant dense<0.000000e+00> : vector<8x128xf32>
    %62 = tpu.matmul %60, %61, %cst_34 {dimension_numbers = #tpu.dot_dimension_numbers<[1], [0], [0], [1], [0, 0, 1, 1], [], []>} : vector<8x128xbf16>, vector<128x128xbf16>, vector<8x128xf32> -> vector<8x128xf32>
    %c0_35 = arith.constant 0 : index
    %c0_36 = arith.constant 0 : index
    %63 = vector.load %arg13[%c0_35, %c0_36] : memref<1x128xf32, #tpu.memory_space<vmem>>, vector<1x128xf32>
    %64 = vector.broadcast %63 : vector<1x128xf32> to vector<8x128xf32>
    %65 = arith.addf %62, %64 : vector<8x128xf32>
    %66 = arith.mulf %52, %65 : vector<8x128xf32>
    %67 = arith.addf %59, %66 : vector<8x128xf32>
    %68 = math.tanh %67 : vector<8x128xf32>
    %cst_37 = arith.constant 1.000000e+00 : f32
    %69 = vector.broadcast %cst_37 : f32 to vector<8x128xf32>
    %70 = arith.subf %69, %53 : vector<8x128xf32>
    %71 = arith.mulf %70, %68 : vector<8x128xf32>
    %72 = arith.mulf %53, %3 : vector<8x128xf32>
    %73 = arith.addf %71, %72 : vector<8x128xf32>
    %74 = tpu.concatenate %73, %39 in 1 : vector<8x128xf32>, vector<8x128xf32> -> vector<8x256xf32>
    %75 = arith.truncf %74 : vector<8x256xf32> to vector<8x256xbf16>
    %c0_38 = arith.constant 0 : index
    %c0_39 = arith.constant 0 : index
    %76 = vector.load %arg14[%c0_38, %c0_39] : memref<256x128xbf16, #tpu.memory_space<vmem>>, vector<256x128xbf16>
    %cst_40 = arith.constant dense<0.000000e+00> : vector<8x128xf32>
    %77 = tpu.matmul %75, %76, %cst_40 {dimension_numbers = #tpu.dot_dimension_numbers<[1], [0], [0], [1], [0, 0, 1, 1], [], []>} : vector<8x256xbf16>, vector<256x128xbf16>, vector<8x128xf32> -> vector<8x128xf32>
    %c0_41 = arith.constant 0 : index
    %c0_42 = arith.constant 0 : index
    %78 = vector.load %arg15[%c0_41, %c0_42] : memref<1x128xf32, #tpu.memory_space<vmem>>, vector<1x128xf32>
    %79 = vector.broadcast %78 : vector<1x128xf32> to vector<8x128xf32>
    %80 = arith.addf %77, %79 : vector<8x128xf32>
    %81 = math.tanh %80 : vector<8x128xf32>
    %c0_43 = arith.constant 0 : index
    %c0_44 = arith.constant 0 : index
    %c0_45 = arith.constant 0 : index
    %82 = vector.load %arg16[%c0_43, %c0_44, %c0_45] : memref<1x8x128xf32, #tpu.memory_space<vmem>>, vector<1x8x128xf32>
    %83 = vector.shape_cast %82 : vector<1x8x128xf32> to vector<8x128xf32>
    %84 = vector.shape_cast %81 : vector<8x128xf32> to vector<1x8x128xf32>
    tpu.vector_store %arg16[%c0_43, %c0_44, %c0_45], %84 {strides = array<i32>} : memref<1x8x128xf32, #tpu.memory_space<vmem>>, vector<1x8x128xf32>,
    %c0_46 = arith.constant 0 : index
    %c0_47 = arith.constant 0 : index
    %c0_48 = arith.constant 0 : index
    %85 = vector.load %arg17[%c0_46, %c0_47, %c0_48] : memref<1x8x128xf32, #tpu.memory_space<vmem>>, vector<1x8x128xf32>
    %86 = vector.shape_cast %85 : vector<1x8x128xf32> to vector<8x128xf32>
    %87 = vector.shape_cast %34 : vector<8x128xf32> to vector<1x8x128xf32>
    tpu.vector_store %arg17[%c0_46, %c0_47, %c0_48], %87 {strides = array<i32>} : memref<1x8x128xf32, #tpu.memory_space<vmem>>, vector<1x8x128xf32>,
    %c0_49 = arith.constant 0 : index
    %c0_50 = arith.constant 0 : index
    %c0_51 = arith.constant 0 : index
    %88 = vector.load %arg18[%c0_49, %c0_50, %c0_51] : memref<1x8x128xf32, #tpu.memory_space<vmem>>, vector<1x8x128xf32>
    %89 = vector.shape_cast %88 : vector<1x8x128xf32> to vector<8x128xf32>
    %90 = vector.shape_cast %39 : vector<8x128xf32> to vector<1x8x128xf32>
    tpu.vector_store %arg18[%c0_49, %c0_50, %c0_51], %90 {strides = array<i32>} : memref<1x8x128xf32, #tpu.memory_space<vmem>>, vector<1x8x128xf32>,
    %c0_52 = arith.constant 0 : index
    %c0_53 = arith.constant 0 : index
    %91 = vector.load %arg19[%c0_52, %c0_53] : memref<8x128xf32, #tpu.memory_space<vmem>>, vector<8x128xf32>
    tpu.vector_store %arg19[%c0_52, %c0_53], %73 {strides = array<i32>} : memref<8x128xf32, #tpu.memory_space<vmem>>, vector<8x128xf32>,
    return
  }
  func.func @transform_0(%arg0: i32, %arg1: memref<1xi32, #tpu.memory_space<smem>>) -> (i32, i32, i32) {
    %c0_i32 = arith.constant 0 : i32
    %c0_i32_0 = arith.constant 0 : i32
    %c0_i32_1 = arith.constant 0 : i32
    return %arg0, %c0_i32, %c0_i32_0 : i32, i32, i32
  }
  func.func @transform_1(%arg0: i32, %arg1: memref<1xi32, #tpu.memory_space<smem>>) -> (i32, i32) {
    %c0_i32 = arith.constant 0 : i32
    %c0_i32_0 = arith.constant 0 : i32
    %c0_i32_1 = arith.constant 0 : i32
    return %c0_i32, %c0_i32_0 : i32, i32
  }
  func.func @transform_2(%arg0: i32, %arg1: memref<1xi32, #tpu.memory_space<smem>>) -> (i32, i32, i32) {
    %c0_i32 = arith.constant 0 : i32
    %c0_i32_0 = arith.constant 0 : i32
    %c0_i32_1 = arith.constant 0 : i32
    %c0_i32_2 = arith.constant 0 : i32
    return %c0_i32, %c0_i32_0, %c0_i32_1 : i32, i32, i32
  }
  func.func @transform_3(%arg0: i32, %arg1: memref<1xi32, #tpu.memory_space<smem>>) -> (i32, i32, i32) {
    %c0_i32 = arith.constant 0 : i32
    %c0_i32_0 = arith.constant 0 : i32
    %c0_i32_1 = arith.constant 0 : i32
    %c0_i32_2 = arith.constant 0 : i32
    return %c0_i32, %c0_i32_0, %c0_i32_1 : i32, i32, i32
  }
  func.func @transform_4(%arg0: i32, %arg1: memref<1xi32, #tpu.memory_space<smem>>) -> (i32, i32) {
    %c0_i32 = arith.constant 0 : i32
    %c0_i32_0 = arith.constant 0 : i32
    %c0_i32_1 = arith.constant 0 : i32
    return %c0_i32, %c0_i32_0 : i32, i32
  }
  func.func @transform_5(%arg0: i32, %arg1: memref<1xi32, #tpu.memory_space<smem>>) -> (i32, i32) {
    %c0_i32 = arith.constant 0 : i32
    %c0_i32_0 = arith.constant 0 : i32
    %c0_i32_1 = arith.constant 0 : i32
    return %c0_i32, %c0_i32_0 : i32, i32
  }
  func.func @transform_6(%arg0: i32, %arg1: memref<1xi32, #tpu.memory_space<smem>>) -> (i32, i32) {
    %c0_i32 = arith.constant 0 : i32
    %c0_i32_0 = arith.constant 0 : i32
    %c0_i32_1 = arith.constant 0 : i32
    return %c0_i32, %c0_i32_0 : i32, i32
  }
  func.func @transform_7(%arg0: i32, %arg1: memref<1xi32, #tpu.memory_space<smem>>) -> (i32, i32) {
    %c0_i32 = arith.constant 0 : i32
    %c0_i32_0 = arith.constant 0 : i32
    %c0_i32_1 = arith.constant 0 : i32
    return %c0_i32, %c0_i32_0 : i32, i32
  }
  func.func @transform_8(%arg0: i32, %arg1: memref<1xi32, #tpu.memory_space<smem>>) -> (i32, i32) {
    %c0_i32 = arith.constant 0 : i32
    %c0_i32_0 = arith.constant 0 : i32
    %c0_i32_1 = arith.constant 0 : i32
    return %c0_i32, %c0_i32_0 : i32, i32
  }
  func.func @transform_9(%arg0: i32, %arg1: memref<1xi32, #tpu.memory_space<smem>>) -> (i32, i32) {
    %c0_i32 = arith.constant 0 : i32
    %c0_i32_0 = arith.constant 0 : i32
    %c0_i32_1 = arith.constant 0 : i32
    return %c0_i32, %c0_i32_0 : i32, i32
  }
  func.func @transform_10(%arg0: i32, %arg1: memref<1xi32, #tpu.memory_space<smem>>) -> (i32, i32) {
    %c0_i32 = arith.constant 0 : i32
    %c0_i32_0 = arith.constant 0 : i32
    %c0_i32_1 = arith.constant 0 : i32
    return %c0_i32, %c0_i32_0 : i32, i32
  }
  func.func @transform_11(%arg0: i32, %arg1: memref<1xi32, #tpu.memory_space<smem>>) -> (i32, i32) {
    %c0_i32 = arith.constant 0 : i32
    %c0_i32_0 = arith.constant 0 : i32
    %c0_i32_1 = arith.constant 0 : i32
    return %c0_i32, %c0_i32_0 : i32, i32
  }
  func.func @transform_12(%arg0: i32, %arg1: memref<1xi32, #tpu.memory_space<smem>>) -> (i32, i32) {
    %c0_i32 = arith.constant 0 : i32
    %c0_i32_0 = arith.constant 0 : i32
    %c0_i32_1 = arith.constant 0 : i32
    return %c0_i32, %c0_i32_0 : i32, i32
  }
  func.func @transform_13(%arg0: i32, %arg1: memref<1xi32, #tpu.memory_space<smem>>) -> (i32, i32) {
    %c0_i32 = arith.constant 0 : i32
    %c0_i32_0 = arith.constant 0 : i32
    %c0_i32_1 = arith.constant 0 : i32
    return %c0_i32, %c0_i32_0 : i32, i32
  }
  func.func @transform_14(%arg0: i32, %arg1: memref<1xi32, #tpu.memory_space<smem>>) -> (i32, i32, i32) {
    %c0_i32 = arith.constant 0 : i32
    %c0_i32_0 = arith.constant 0 : i32
    %c0_i32_1 = arith.constant 0 : i32
    return %arg0, %c0_i32, %c0_i32_0 : i32, i32, i32
  }
  func.func @transform_15(%arg0: i32, %arg1: memref<1xi32, #tpu.memory_space<smem>>) -> (i32, i32, i32) {
    %c0_i32 = arith.constant 0 : i32
    %c0_i32_0 = arith.constant 0 : i32
    %c0_i32_1 = arith.constant 0 : i32
    return %arg0, %c0_i32, %c0_i32_0 : i32, i32, i32
  }
  func.func @transform_16(%arg0: i32, %arg1: memref<1xi32, #tpu.memory_space<smem>>) -> (i32, i32, i32) {
    %c0_i32 = arith.constant 0 : i32
    %c0_i32_0 = arith.constant 0 : i32
    %c0_i32_1 = arith.constant 0 : i32
    return %arg0, %c0_i32, %c0_i32_0 : i32, i32, i32
  }
  func.func @transform_17(%arg0: i32, %arg1: memref<1xi32, #tpu.memory_space<smem>>) -> (i32, i32) {
    %c0_i32 = arith.constant 0 : i32
    %c0_i32_0 = arith.constant 0 : i32
    %c0_i32_1 = arith.constant 0 : i32
    return %c0_i32, %c0_i32_0 : i32, i32
  }
}

</mosaic_0001>

<bundles_post_ra>
// kernel: _decode_steps.1
= control target key start
LH: loop header
LB: loop body
LE: loop exit
PB: predicated region body
PF: predicated region fallthrough
CT: control target
= control target key end

     0   :  { %s7313_s0 = inlined_call_operand.<no memory space> [shape: s32[1], index: 0, kind: input, shape index: {}]   ;;  %s7314_s1 = inlined_call_operand.vmem [shape: f32[3,8,128], index: 1, kind: input, shape index: {}]   ;;  %s7315_s2 = inlined_call_operand.vmem [shape: f32[8,128], index: 2, kind: input, shape index: {}]   ;;  %s7316_s3 = inlined_call_operand.hbm [shape: bf16[8,128,128], index: 3, kind: input, shape index: {}]   ;;  %s7317_s4 = inlined_call_operand.hbm [shape: f32[8,128,128], index: 4, kind: input, shape index: {}]   ;;  %s7318_s5 = inlined_call_operand.hbm [shape: bf16[128,128], index: 5, kind: input, shape index: {}]   ;;  %s7319_s6 = inlined_call_operand.vmem [shape: f32[1,128], index: 6, kind: input, shape index: {}]   ;;  %s7320_s7 = inlined_call_operand.hbm [shape: bf16[384,256], index: 7, kind: input, shape index: {}]   ;;  %s7321_s8 = inlined_call_operand.vmem [shape: f32[1,256], index: 8, kind: input, shape index: {}]   ;;  %s7322_s9 = inlined_call_operand.hbm [shape: bf16[256,128], index: 9, kind: input, shape index: {}]   ;;  %s7323_s10 = inlined_call_operand.vmem [shape: f32[1,128], index: 10, kind: input, shape index: {}]   ;;  %s7324_s11 = inlined_call_operand.hbm [shape: bf16[128,128], index: 11, kind: input, shape index: {}]   ;;  %s7325_s12 = inlined_call_operand.vmem [shape: f32[1,128], index: 12, kind: input, shape index: {}]   ;;  %s7326_s13 = inlined_call_operand.hbm [shape: bf16[256,128], index: 13, kind: input, shape index: {}]   ;;  %s7327_s14 = inlined_call_operand.vmem [shape: f32[1,128], index: 14, kind: input, shape index: {}]   ;;  %s7328_s15 = inlined_call_operand.hbm [shape: f32[3,8,128], index: 15, kind: output, shape index: {0}]   ;;  %s7329_s16 = inlined_call_operand.hbm [shape: f32[3,8,128], index: 16, kind: output, shape index: {1}]   ;;  %s7330_s17 = inlined_call_operand.hbm [shape: f32[3,8,128], index: 17, kind: output, shape index: {2}]   ;;  %s7331_s18 = inlined_call_operand.hbm [shape: f32[8,128], index: 18, kind: output, shape index: {3}]  }
   0x1   :  { %7354 = sst [smem:[#allocation35_spill]] %s7313_s0 }
   0x2   :  { %7355 = sst [smem:[#allocation36_spill]] %s7314_s1 }
   0x3   :  { %7356 = sst [smem:[#allocation37_spill]] %s7315_s2 }
   0x4   :  { %7357 = sst [smem:[#allocation38_spill]] %s7316_s3 }
   0x5   :  { %7358 = sst [smem:[#allocation39_spill]] %s7317_s4 }
   0x6   :  { %7359 = sst [smem:[#allocation40_spill]] %s7328_s15 }
   0x7   :  { %s7360_s29 = sld [smem:[#allocation35_spill]] }
   0xd   :  { %24 = sst [smem:[#allocation3]] %s7360_s29 }
   0xe   :  { %25 = vsyncpa [#allocation5], 0 }
   0xf   :  { %26 = vsyncpa [#allocation8], 0 }
  0x10   :  { %27 = vsyncpa [#allocation11], 0 }
  0x11   :  { %28 = vsyncpa [#allocation14], 0 }
  0x12   :  { %29 = vsyncpa [#allocation6], 0 }
  0x13   :  { %31 = vsyncpa [#allocation6 + $0x1], 0 }
  0x14   :  { %32 = vsyncpa [#allocation18], 0 }
  0x15   :  { %34 = vsyncpa [#allocation18 + $0x1], 0 }
  0x16   :  { %35 = vsyncpa [#allocation21], 0  ;;  %s6102_s30 = smov 0   ;;  %s6104_s0 = smov 0  }
  0x17   :  { %s6106_s19 = smov 0   ;;  %s6108_s1 = smov 0  }
  0x18 LB: > { %7361 = sst [smem:[#allocation29_spill]] %s5971_s30  ;;  %s6123_s20 = sadd.s32 4294967295, %s5983_s1   ;;  %s5983_s1 = sphi %s6108_s1, %s7408_s1   ;;  %s5979_s19 = sphi %s6106_s19, %s7410_s19   ;;  %s5975_s0 = sphi %s6104_s0, %s7412_s0   ;;  %s5971_s30 = sphi %s6102_s30, %s7411_s30  }
  0x19   : > { %7362 = sst [smem:[#allocation30_spill]] %s5979_s19  ;;  %s7332_s21 = sadd.s32 4294967294, %s5983_s1  }
  0x1a   : > { %7363 = sst [smem:[#allocation31_spill]] %s5983_s1  ;;  %s6127_s22 = sadd.s32 1, %s5983_s1  }
  0x1b   : > { %7364 = sst [smem:[#allocation32_spill]] %s6127_s22  ;;  %s347_s2 = sadd.s32 1, %s5979_s19 }
  0x1c   : > { %s344_s23 = ssub.s32 %s5983_s1, %s6127_s22  ;;  %p357_p0 = scmp.ne.s32.totalorder %s5979_s19, %s5975_s0 }
  0x1d   : > { %p345_p1 = scmp.eq.s32.totalorder %s344_s23, 0  ;;  %p7334_p2 = scmp.eq.s32.totalorder %s6123_s20, 2 }
  0x1e   : > { %p363_p3 = scmp.ne.s32.totalorder %s5975_s0, %s5971_s30  ;;  %p364_p4 = scmp.eq.s32.totalorder %s7332_s21, 2 }
  0x1f   : > { %s6140_s24 = scalar_select %p345_p1, %s5979_s19, %s347_s2  }
  0x20   : > { %p6144_p5 = por %p7334_p2, %p357_p0  ;;  %p6148_p6 = por %p364_p4, %p363_p3 }
  0x21   : > { %7365 = sst [smem:[#allocation33_spill]] %s6140_s24  ;;  %p4516_p7 = scmp.ge.s32.totalorder %s5983_s1, 1 }
  0x22   : > { %s7366_s25 = scalar_select %p6144_p5, 1, 0 }
  0x23   : > { %s7367_s26 = scalar_select %p6148_p6, 1, 0 }
  0x24   : > { %p444_p8 = scmp.lt.s32.totalorder %s5983_s1, 4  ;;  %p7339_p10 = scmp.eq.s32.totalorder %s6123_s20, 0 }
  0x25   : > { %7368 = sst [smem:[#allocation34_spill]] %s7367_s26  ;;  %s5985_s28 = smov [#allocation7]  }
  0x26   : > { %p6156_p11 = pnand %p4516_p7, %p444_p8  ;;  %s472_s29 = sshll.u32 %s5985_s28, 4  ;;  %s473_s29 = int_to_ptr.vmem [resolvable:$true] %s472_s29 }
  0x27   : > { %s5986_s23 = smov [#allocation10]   ;;  %s5652_s19 = scalar_lea.vmem %s473_s29, 16384 }
  0x28   : > { %p5086_p12 = pneg %p6156_p11  ;;  %s501_s21 = sshll.u32 %s5986_s23, 4  ;;  %s502_s21 = int_to_ptr.vmem [resolvable:$true] %s501_s21 }
  0x29   : > { %p5653_p1 = scmp.ne.s32.totalorder %s473_s29, %s5652_s19  ;;  %p5660_p7 = scmp.lt.s32.totalorder %s473_s29, %s473_s29 }
  0x2a   : > { %p6164_p13 = pnand %p7339_p10, %p5086_p12  ;;  %p5661_p8 = scmp.lt.s32.totalorder %s5652_s19, %s5652_s19 }
  0x2c   : > { %p6170_p0 = pneg %p6164_p13  ;;  %p5662_p12 = por %p5661_p8, %p5660_p7 }
  0x2e   : > { %p5655_p3 = pnand %p5653_p1, %p6170_p0 }
  0x30   : > { %p5656_p4 = pneg %p5655_p3 }
  0x32   : > { %p5663_p2 = pnand %p5662_p12, %p5656_p4 }
  0x34   : > { %5666 = shalt.err (!%p5663_p2)
}
  0x35   : > { %s5987_s28 = smov 128   ;;  %s5988_s23 = smov 8  }
  0x36   : > { %s7372_s4 = sld [smem:[#allocation39_spill]]  ;;  %s5678_s30 = scalar_lea.vmem %s502_s21, 6144 }
  0x37   : > { %p5679_p9 = scmp.ne.s32.totalorder %s502_s21, %s5678_s30  ;;  %p5686_p3 = scmp.lt.s32.totalorder %s502_s21, %s502_s21 }
  0x38   : > { %p5687_p6 = scmp.lt.s32.totalorder %s5678_s30, %s5678_s30 }
  0x39   : > { %p5681_p10 = pnand %p5679_p9, %p6170_p0 }
  0x3a   : > { %p5688_p5 = por %p5687_p6, %p5686_p3 }
  0x3b   : > { %p5682_p1 = pneg %p5681_p10 }
  0x3c   : > { %5092 = dma.hbm_to_vmem [thread:$0]  (!%p6164_p13), %s7372_s4, 16384, %s473_s29, [#allocation8], %s5987_s28, %s5987_s28, %s5988_s23  }
  0x3d   : > { %p5689_p7 = pnand %p5688_p5, %p5682_p1 }
  0x3f   : > { %5692 = shalt.err (!%p5689_p7)
}
  0x40   : > { %5098 = dma.hbm_to_vmem [thread:$0]  (!%p6164_p13), %s7320_s7, 6144, %s502_s21, [#allocation11], %s5987_s28, %s5987_s28, %s5988_s23  }
  0x41   : > { %s5989_s15 = smov [#allocation13]   ;;  %s5990_s26 = smov [#allocation4]  }
  0x42   : > { %s533_s22 = sshll.u32 %s5989_s15, 4  ;;  %s459_s29 = sshll.u32 %s5990_s26, 4  ;;  %s534_s22 = int_to_ptr.vmem [resolvable:$true] %s533_s22  ;;  %s460_s29 = int_to_ptr.vmem [resolvable:$true] %s459_s29 }
  0x43   : > { %s5704_s4 = scalar_lea.vmem %s534_s22, 1024  ;;  %p5712_p5 = scmp.lt.s32.totalorder %s534_s22, %s534_s22 }
  0x44   : > { %p5705_p2 = scmp.ne.s32.totalorder %s534_s22, %s5704_s4  ;;  %p5713_p10 = scmp.lt.s32.totalorder %s5704_s4, %s5704_s4 }
  0x46   : > { %p5707_p9 = pnand %p5705_p2, %p6170_p0  ;;  %p5714_p4 = por %p5713_p10, %p5712_p5 }
  0x48   : > { %p5708_p6 = pneg %p5707_p9 }
  0x4a   : > { %p5715_p8 = pnand %p5714_p4, %p5708_p6 }
  0x4c   : > { %5718 = shalt.err (!%p5715_p8)
}
  0x4d   : > { %s5991_s30 = smov 64   ;;  %s5992_s1 = smov 4  }
  0x4e   : > { %5104 = dma.hbm_to_vmem [thread:$0]  (!%p6164_p13), %s7324_s11, 1024, %s534_s22, [#allocation14], %s5991_s30, %s5991_s30, %s5992_s1  }
  0x4f   : > { %s5730_s28 = scalar_lea.vmem %s460_s29, 8192  ;;  %p5738_p7 = scmp.lt.s32.totalorder %s460_s29, %s460_s29 }
  0x50   : > { %p5731_p12 = scmp.ne.s32.totalorder %s460_s29, %s5730_s28  ;;  %p5739_p2 = scmp.lt.s32.totalorder %s5730_s28, %s5730_s28 }
  0x52   : > { %p5733_p1 = pnand %p5731_p12, %p6170_p0  ;;  %p5740_p9 = por %p5739_p2, %p5738_p7 }
  0x54   : > { %p5734_p3 = pneg %p5733_p1 }
  0x56   : > { %p5741_p6 = pnand %p5740_p9, %p5734_p3 }
  0x58   : > { %5744 = shalt.err (!%p5741_p6)
}
  0x59   : > { %s7373_s3 = sld [smem:[#allocation38_spill]]  ;;  %s5993_s19 = smov [#allocation9]  }
  0x5a   : > { %s485_s22 = sshll.u32 %s5993_s19, 4  ;;  %s5994_s26 = smov [#allocation12]   ;;  %s486_s22 = int_to_ptr.vmem [resolvable:$true] %s485_s22 }
  0x5b   : > { %s517_s15 = sshll.u32 %s5994_s26, 4  ;;  %s5756_s21 = scalar_lea.vmem %s486_s22, 1024  ;;  %s518_s15 = int_to_ptr.vmem [resolvable:$true] %s517_s15 }
  0x5c   : > { %p5757_p5 = scmp.ne.s32.totalorder %s486_s22, %s5756_s21  ;;  %p5764_p8 = scmp.lt.s32.totalorder %s486_s22, %s486_s22 }
  0x5d   : > { %p5765_p12 = scmp.lt.s32.totalorder %s5756_s21, %s5756_s21 }
  0x5e   : > { %p5759_p10 = pnand %p5757_p5, %p6170_p0 }
  0x5f   : > { %5089 = dma.hbm_to_vmem [thread:$0]  (!%p6164_p13), %s7373_s3, 8192, %s460_s29, [#allocation5], %s5991_s30, %s5991_s30, %s5992_s1  }
  0x60   : > { %p5760_p4 = pneg %p5759_p10  ;;  %p5766_p1 = por %p5765_p12, %p5764_p8 }
  0x62   : > { %p5767_p3 = pnand %p5766_p1, %p5760_p4 }
  0x64   : > { %5770 = shalt.err (!%p5767_p3)
}
  0x65   : > { %5095 = dma.hbm_to_vmem [thread:$0]  (!%p6164_p13), %s7318_s5, 1024, %s486_s22, [#allocation8], %s5991_s30, %s5991_s30, %s5992_s1  }
  0x66   : > { %s5782_s4 = scalar_lea.vmem %s518_s15, 2048  ;;  %p5790_p6 = scmp.lt.s32.totalorder %s518_s15, %s518_s15 }
  0x67   : > { %p5783_p7 = scmp.ne.s32.totalorder %s518_s15, %s5782_s4  ;;  %p5791_p5 = scmp.lt.s32.totalorder %s5782_s4, %s5782_s4 }
  0x69   : > { %p5785_p2 = pnand %p5783_p7, %p6170_p0  ;;  %p5792_p10 = por %p5791_p5, %p5790_p6 }
  0x6b   : > { %p5786_p9 = pneg %p5785_p2 }
  0x6d   : > { %p5793_p4 = pnand %p5792_p10, %p5786_p9 }
  0x6f   : > { %5796 = shalt.err (!%p5793_p4)
}
  0x70   : > { %5101 = dma.hbm_to_vmem [thread:$0]  (!%p6164_p13), %s7322_s9, 2048, %s518_s15, [#allocation11], %s5991_s30, %s5991_s30, %s5992_s1  }
  0x71   : > { %s5995_s22 = smov [#allocation15]  }
  0x72   : > { %s549_s26 = sshll.u32 %s5995_s22, 4  ;;  %s550_s26 = int_to_ptr.vmem [resolvable:$true] %s549_s26 }
  0x73   : > { %s5808_s21 = scalar_lea.vmem %s550_s26, 2048  ;;  %p5816_p3 = scmp.lt.s32.totalorder %s550_s26, %s550_s26 }
  0x74   : > { %p5809_p8 = scmp.ne.s32.totalorder %s550_s26, %s5808_s21  ;;  %p5817_p7 = scmp.lt.s32.totalorder %s5808_s21, %s5808_s21 }
  0x76   : > { %p5811_p12 = pnand %p5809_p8, %p6170_p0  ;;  %p5818_p2 = por %p5817_p7, %p5816_p3 }
  0x78   : > { %p5812_p1 = pneg %p5811_p12 }
  0x7a   : > { %p5819_p9 = pnand %p5818_p2, %p5812_p1 }
  0x7c   : > { %5822 = shalt.err (!%p5819_p9)
}
  0x7d   : > { %5107 = dma.hbm_to_vmem [thread:$0]  (!%p6164_p13), %s7326_s13, 2048, %s550_s26, [#allocation14], %s5991_s30, %s5991_s30, %s5992_s1  }
  0x7e   : > { %575 = sbr.rel (%p6156_p11) target bundleno = 1898 (0x76a), region = 76  ;;  %p7374_p0 = scmp.eq.s32.totalorder (!%p6156_p11), %s6123_s20, 0 }
  0x83   : > { %5942 = dma.done.wait (%p7374_p0), [#allocation5], 8192   ;;  %p7375_p6 = pmov %p7374_p0 }
  0x84   : > { %p7376_p5 = pmov %p7374_p0 }
  0x85   : > { %5944 = vsyncadd (%p7375_p6), [#allocation5], 4294959104 }
  0x86   : > { %5946 = dma.done.wait (%p7376_p5), [#allocation8], 17408   ;;  %p7377_p10 = pmov %p7374_p0 }
  0x87   : > { %p7378_p4 = pmov %p7374_p0 }
  0x88   : > { %5948 = vsyncadd (%p7377_p10), [#allocation8], 4294949888 }
  0x89   : > { %5950 = dma.done.wait (%p7378_p4), [#allocation11], 8192   ;;  %p7379_p13 = pmov %p7374_p0 }
  0x8a   : > { %p7380_p11 = pmov %p7374_p0 }
  0x8b   : > { %5952 = vsyncadd (%p7379_p13), [#allocation11], 4294959104 }
  0x8c   : > { %5954 = dma.done.wait (%p7380_p11), [#allocation14], 3072   ;;  %p7381_p8 = pmov %p7374_p0 }
  0x8d   : > { %s7352_s24 = sand.u32 1, %s5975_s0   ;;  %p660_p12 = scmp.lt.s32.totalorder %s6123_s20, 2 }
  0x8e   : > { %5956 = vsyncadd (%p7381_p8), [#allocation14], 4294964224  ;;  %s6260_s27 = sshll.u32 %s7352_s24, 3  ;;  %s7382_s4 = sld [smem:[#allocation36_spill]] }
  0x8f   : > { %s661_s2 = scalar_select %p660_p12, %s6123_s20, 2 }
  0x90   : > { %s650_s22 = scalar_lea.vmem [#allocation17], %s6260_s27  ;;  %s7353_s26 = scalar_lea.vmem [#allocation19], %s6260_s27 }
  0x91   : > { %s4536_s30 = sshll.u32 %s661_s2, 3  ;;  %p7383_p1 = scmp.ne.s32.totalorder %s6123_s20, 0 }
  0x92   : > { %s7384_s15 = sld [smem:[#allocation37_spill]] (!%p7383_p1) }
  0x93   : > { %668 = sbr.rel (%p7383_p1) target bundleno = 154 (0x9a), region = 108 }
  0x94   : > { %s6266_s23 = scalar_lea.vmem %s7382_s4, %s4536_s30 }
  0x98   : > { %v669_v0 = vld [vmem:[%s7384_s15] sm:$0xff] }
  0x99   : > { %670 = vst [vmem:[#allocation20] sm:$0xff] %v669_v0 }
  0x9a PF: > { %v5183_v1 = vld [vmem:[#allocation9 + $0x38] sm:$0xff]   ;;  %v5996_v2 = vmov 0.0   ;;  %v5184_v3 = vld [vmem:[#allocation9 + $0x30] sm:$0xff]   ;;  %vm7344_vm0 = vmmov 0   ;;  %v5185_v4 = vld [vmem:[#allocation9 + $0x28] sm:$0xff]   ;;  %v912_v14 = vlaneseq  ;;  %vm1785_vm1 = vcmask 130112  }
  0x9b   : > { %4848 = vmatprep.subr.bf16.mxu0 %v5996_v2  ;;  %4868 = vmatprep.subr.bf16.mxu1 %v5996_v2  ;;  %v5186_v5 = vld [vmem:[#allocation9 + $0x20] sm:$0xff]   ;;  %v5187_v6 = vld [vmem:[#allocation9 + $0x18] sm:$0xff]   ;;  %v5188_v7 = vld [vmem:[#allocation9 + $0x10] sm:$0xff]   ;;  %v5998_v12 = vmov 1966171168   ;;  %vm7348_vm2 = vcmask 195712  }
  0x9c   : > { %4849 = vmatpush3.bf16.msra.mxu0 %v5183_v1  ;;  %4864 = vmatprep.mubr.msk.bf16.mxu0 %vm7344_vm0, %v5996_v2  ;;  %v5189_v8 = vld [vmem:[#allocation9 + $0x8] sm:$0xff]   ;;  %v5190_v9 = vld [vmem:[#allocation9] sm:$0xff]   ;;  %v910_v13 = vunpack.c.l.s4 %v5998_v12  ;;  %v6296_v16 = vshrl.u32 %v912_v14, 7  ;;  %v781_v35 = vld [vmem:[#allocation7 + $0x10] sm:$0xff]  ;;  %vm1799_vm3 = vcmask 261312   ;;  %vm1806_vm4 = vcmask 326912  }
  0x9d   : > { %4850 = vmatprep.subr.bf16.mxu0 %v5996_v2  ;;  %4884 = vmatprep.mubr.msk.bf16.mxu1 %vm7344_vm0, %v5996_v2  ;;  %v783_v24 = vld [vmem:[#allocation7 + $0x20] sm:$0xff]  ;;  %v784_v28 = vld [vmem:[#allocation7 + $0x28] sm:$0xff]  ;;  %v782_v39 = vld [vmem:[#allocation7 + $0x18] sm:$0xff]  ;;  %vm1813_vm5 = vcmask 392512   ;;  %vm1820_vm6 = vcmask 458112   ;;  %vm1827_vm7 = vcmask 523712  }
  0x9e   : > { %v911_v15 = vunpack.c.0.s8 %v910_v13  ;;  %v6303_v20 = vsub.s32 0, %v6296_v16  ;;  %v779_v25 = vld [vmem:[#allocation7] sm:$0xff]  ;;  %v780_v29 = vld [vmem:[#allocation7 + $0x8] sm:$0xff]  ;;  %v789_v42 = vld [vmem:[#allocation7 + $0x50] sm:$0xff]  ;;  %vm1834_vm8 = vcmask 589312   ;;  %vm1841_vm9 = vcmask 654912  }
  0x9f   : > { %v787_v32 = vld [vmem:[#allocation7 + $0x40] sm:$0xff]  ;;  %v788_v38 = vld [vmem:[#allocation7 + $0x48] sm:$0xff]  ;;  %v785_v43 = vld [vmem:[#allocation7 + $0x30] sm:$0xff]  ;;  %vm1848_vm10 = vcmask 720512   ;;  %vm1855_vm11 = vcmask 786112   ;;  %vm1862_vm12 = vcmask 851712  }
  0xa0   : > { %4851 = vmatpush3.bf16.msra.mxu0 %v5184_v3  ;;  %v671_v10 = vld [vmem:[#allocation20] sm:$0xff]  ;;  %v6299_v17 = vsub.s32 %v911_v15, %v6296_v16  ;;  %v6321_v46 = vld [vmem:[%s7319_s6] ss:$0 sm:$0xff]  ;;  %v790_v48 = vld [vmem:[#allocation7 + $0x58] sm:$0xff]  ;;  %vm1869_vm13 = vcmask 917312   ;;  %vm1876_vm14 = vcmask 982912  }
  0xa1   : > { %4852 = vmatprep.subr.bf16.mxu0 %v5996_v2  ;;  %v6289_v11 = vpack.c.bf16 %v671_v10, %v671_v10  ;;  %v786_v49 = vld [vmem:[#allocation7 + $0x38] sm:$0xff]  ;;  %v791_v60 = vld [vmem:[#allocation7 + $0x60] sm:$0xff]  ;;  %vm1883_vm15 = vcmask 1048512   ;;  %s673_s4 = sld [smem:[#allocation3]]  ;;  %s4259_s1 = sand.u32 1, %s6123_s20  }
  0xa2   : > { %v811_v62 = vld [vmem:[#allocation7 + $0x100] sm:$0xff]  ;;  %s7210_s28 = sshll.u32 %s6123_s20, 7  ;;  %s4291_s29 = sshll.u32 %s650_s22, 4  ;;  %s4292_s29 = int_to_ptr.vmem [resolvable:$true] %s4291_s29 }
  0xa3   : > { %s4289_s21 = scalar_lea.hbm %s7329_s16, %s7210_s28  ;;  %s7218_s15 = scalar_lea.sflag [#allocation18], %s4259_s1 }
  0xa4   : > { %4853 = vmatpush3.bf16.msra.mxu0 %v5185_v4  ;;  %s5823_s2 = scalar_lea.vmem %s4292_s29, 128  ;;  %p7392_p7 = scmp.ne.s32.totalorder %s7366_s25, 0 }
  0xa5   : > { %4854 = vmatprep.subr.bf16.mxu0 %v5996_v2  ;;  %p5824_p3 = scmp.ne.s32.totalorder %s4292_s29, %s5823_s2  ;;  %s6000_s30 = smov [#allocation17]  }
  0xa6   : > { %s5827_s24 = sshll.u32 %s6000_s30, 4  ;;  %s5828_s24 = int_to_ptr.vmem [resolvable:$false] %s5827_s24 }
  0xa7   : > { %p5825_p2 = pnand %p5824_p3, %p7392_p7  ;;  %s5829_s19 = scalar_lea.vmem %s5828_s24, 256 }
  0xa8   : > { %4855 = vmatpush3.bf16.msra.mxu0 %v5186_v5  ;;  %p5830_p0 = scmp.lt.s32.totalorder %s4292_s29, %s5828_s24  ;;  %p5831_p6 = scmp.lt.s32.totalorder %s5829_s19, %s5823_s2 }
  0xa9   : > { %4856 = vmatprep.subr.bf16.mxu0 %v5996_v2  ;;  %p5826_p9 = pneg %p5825_p2 }
  0xaa   : > { %p5832_p5 = por %p5831_p6, %p5830_p0 }
  0xac   : > { %4857 = vmatpush3.bf16.msra.mxu0 %v5187_v6  ;;  %p5833_p10 = pnand %p5832_p5, %p5826_p9 }
  0xad   : > { %4858 = vmatprep.subr.bf16.mxu0 %v5996_v2 }
  0xb0   : > { %4859 = vmatpush3.bf16.msra.mxu0 %v5188_v7  ;;  %v792_v7 = vld [vmem:[#allocation7 + $0x68] sm:$0xff] }
  0xb1   : > { %4860 = vmatprep.subr.bf16.mxu0 %v5996_v2 }
  0xb4   : > { %4861 = vmatpush3.bf16.msra.mxu0 %v5189_v8 }
  0xb5   : > { %4862 = vmatprep.subr.bf16.mxu0 %v5996_v2 }
  0xb8   : > { %4863 = vmatpush3.bf16.msra.mxu0 %v5190_v9  ;;  %v813_v9 = vld [vmem:[#allocation7 + $0x110] sm:$0xff] }
  0xb9   : > { %4888 = vmatprep.subr.bf16.mxu0 %v5996_v2 }
  0xbb   : > { %4865 = vmatmul.mubr.bf16.vlgmr.msra.gmra.mxu0 %v6289_v11 }
  0xbc   : > { %4904 = vmatprep.mubr.msk.bf16.mxu0 %vm7344_vm0, %v5996_v2  ;;  %vm7346_vm0 = vcmask 1041409  }
 0x17b   : > { %v773_v18 = vpop.f32.mrf.mxu0 }
 0x17c   : > { %v915_v19 = vrot.slane %v773_v18, %v6299_v17  ;;  %v908_v51 = vcombine.high %v773_v18, %v773_v18 }
 0x17d   : > { %v4866_v21 = vpop.f32.mrf.mxu0 }
 0x17e   : > { %v931_v22 = vrot.slane %v915_v19, %v6299_v17  ;;  %v923_v53 = vcombine.high %v915_v19, %v915_v19  ;;  %v6332_v63 = vrot.slane %v908_v51, %v6299_v17 }
 0x17f   : > { %v776_v23 = vpop.f32.mrf.mxu0 }
 0x180   : > { %v6307_v26 = vrot.slane %v931_v22, %v6303_v20  ;;  %v953_v45 = vcombine.high %v931_v22, %v931_v22  ;;  %v6337_v4 = vrot.slane %v923_v53, %v6299_v17  ;;  %v6343_v10 = vrot.slane %v6332_v63, %v6299_v17  ;;  %v793_v22 = vld [vmem:[#allocation7 + $0x70] sm:$0xff] }
 0x181   : > { %v4867_v27 = vpop.f32.mrf.mxu0 }
 0x182   : > { %v1001_v30 = vadd.f32 %v6307_v26, %v783_v24  ;;  %v997_v31 = vadd.f32 %v6307_v26, %v779_v25  ;;  %v1002_v33 = vadd.f32 %v6307_v26, %v784_v28  ;;  %v998_v34 = vadd.f32 %v6307_v26, %v780_v29  ;;  %v799_v24 = vld [vmem:[#allocation7 + $0xa0] sm:$0xff] }
 0x183   : > { %v1005_v36 = vadd.f32 %v6307_v26, %v787_v32  ;;  %v999_v37 = vadd.f32 %v6307_v26, %v781_v35  ;;  %v1006_v40 = vadd.f32 %v6307_v26, %v788_v38  ;;  %v1000_v41 = vadd.f32 %v6307_v26, %v782_v39  ;;  %v794_v32 = vld [vmem:[#allocation7 + $0x78] sm:$0xff] }
 0x184   : > { %5367 = vtanh.f32 %v1001_v30  ;;  %v1007_v44 = vadd.f32 %v6307_v26, %v789_v42  ;;  %v1003_v47 = vadd.f32 %v6307_v26, %v785_v43  ;;  %v1008_v55 = vadd.f32 %v6307_v26, %v790_v48  ;;  %v800_v42 = vld [vmem:[#allocation7 + $0xa8] sm:$0xff] }
 0x185   : > { %5369 = vtanh.f32 %v997_v31  ;;  %v6327_v57 = vrot.slane %v953_v45, %v6303_v20  ;;  %v1004_v59 = vadd.f32 %v6307_v26, %v786_v49  ;;  %v1009_v1 = vadd.f32 %v6307_v26, %v791_v60  ;;  %v796_v48 = vld [vmem:[#allocation7 + $0x88] sm:$0xff] }
 0x186   : > { %5371 = vtanh.f32 %v1002_v33  ;;  %v1010_v13 = vadd.f32 %v6307_v26, %v792_v7  ;;  %v6349_v18 = vrot.slane %v6337_v4, %v6303_v20  ;;  %v1011_v27 = vadd.f32 %v6307_v26, %v793_v22 }
 0x187   : > { %5373 = vtanh.f32 %v998_v34  ;;  %v1029_v6 = vadd.f32 %v6327_v57, %v811_v62  ;;  %v1031_v21 = vadd.f32 %v6327_v57, %v813_v9  ;;  %v6357_v29 = vrot.slane %v6343_v10, %v6303_v20  ;;  %v844_v34 = vld [vmem:[#allocation7 + $0x208] sm:$0xff] }
 0x188   : > { %5375 = vtanh.f32 %v1005_v36  ;;  %v1017_v31 = vadd.f32 %v6349_v18, %v799_v24  ;;  %v1012_v36 = vadd.f32 %v6307_v26, %v794_v32  ;;  %v1018_v26 = vadd.f32 %v6349_v18, %v800_v42 }
 0x189   : > { %5377 = vtanh.f32 %v999_v37  ;;  %v1062_v39 = vadd.f32 %v6357_v29, %v844_v34 }
 0x18a   : > { %5379 = vtanh.f32 %v1006_v40  ;;  %v795_v40 = vld [vmem:[#allocation7 + $0x80] sm:$0xff] }
 0x18b   : > { %5381 = vtanh.f32 %v1000_v41 }
 0x18c   : > { %5383 = vtanh.f32 %v1007_v44  ;;  %v1013_v44 = vadd.f32 %v6349_v18, %v795_v40 }
 0x18d   : > { %5385 = vtanh.f32 %v1003_v47 }
 0x18e   : > { %5387 = vtanh.f32 %v1008_v55 }
 0x18f   : > { %5389 = vtanh.f32 %v1004_v59  ;;  %v846_v59 = vld [vmem:[#allocation7 + $0x218] sm:$0xff] }
 0x190   : > { %5391 = vtanh.f32 %v1009_v1  ;;  %v1064_v1 = vadd.f32 %v6357_v29, %v846_v59 }
 0x191   : > { %v5368_v50 = vpop.eup %5367  ;;  %5393 = vtanh.f32 %v1029_v6  ;;  %v817_v6 = vld [vmem:[#allocation7 + $0x130] sm:$0xff] }
 0x192   : > { %v5370_v52 = vpop.eup %5369  ;;  %v1264_v54 = vmul.f32 %v5368_v50, %v6321_v46  ;;  %5395 = vtanh.f32 %v1010_v13  ;;  %v816_v50 = vld [vmem:[#allocation7 + $0x128] sm:$0xff]  ;;  %v1035_v13 = vadd.f32 %v6327_v57, %v817_v6 }
 0x193   : > { %v5372_v56 = vpop.eup %5371  ;;  %v1260_v58 = vmul.f32 %v5370_v52, %v6321_v46  ;;  %5397 = vtanh.f32 %v1031_v21  ;;  %v1014_v52 = vadd.f32 %v6349_v18, %v796_v48  ;;  %v1034_v55 = vadd.f32 %v6327_v57, %v816_v50  ;;  %v847_v21 = vld [vmem:[#allocation7 + $0x220] sm:$0xff] }
 0x194   : > { %v5374_v61 = vpop.eup %5373  ;;  %1396 = vadd.xlane.f32.xlu1 %v1264_v54  ;;  %v1265_v0 = vmul.f32 %v5372_v56, %v6321_v46  ;;  %5399 = vtanh.f32 %v1011_v27  ;;  %v797_v56 = vld [vmem:[#allocation7 + $0x90] sm:$0xff]  ;;  %v1065_v27 = vadd.f32 %v6357_v29, %v847_v21 }
 0x195   : > { %1388 = vadd.xlane.f32.xlu0 %v1260_v58  ;;  %v5376_v3 = vpop.eup %5375  ;;  %v1261_v5 = vmul.f32 %v5374_v61, %v6321_v46  ;;  %5401 = vtanh.f32 %v1017_v31  ;;  %v1015_v61 = vadd.f32 %v6349_v18, %v797_v56  ;;  %v803_v31 = vld [vmem:[#allocation7 + $0xc0] sm:$0xff] }
 0x196   : > { %v5378_v8 = vpop.eup %5377  ;;  %v1268_v12 = vmul.f32 %v5376_v3, %v6321_v46  ;;  %5403 = vtanh.f32 %v1012_v36  ;;  %v812_v3 = vld [vmem:[#allocation7 + $0x108] sm:$0xff]  ;;  %v1021_v36 = vadd.f32 %v6349_v18, %v803_v31 }
 0x197   : > { %v5380_v15 = vpop.eup %5379  ;;  %v1262_v19 = vmul.f32 %v5378_v8, %v6321_v46  ;;  %5405 = vtanh.f32 %v1062_v39  ;;  %v1030_v8 = vadd.f32 %v6327_v57, %v812_v3  ;;  %v804_v39 = vld [vmem:[#allocation7 + $0xc8] sm:$0xff] }
 0x198   : > { %1398 = vadd.xlane.f32.xlu1 %v1265_v0  ;;  %v5382_v23 = vpop.eup %5381  ;;  %v1269_v25 = vmul.f32 %v5380_v15, %v6321_v46  ;;  %5407 = vtanh.f32 %v1013_v44  ;;  %v798_v15 = vld [vmem:[#allocation7 + $0x98] sm:$0xff]  ;;  %v1022_v44 = vadd.f32 %v6349_v18, %v804_v39 }
 0x199   : > { %1390 = vadd.xlane.f32.xlu0 %v1261_v5  ;;  %v5384_v28 = vpop.eup %5383  ;;  %v1263_v30 = vmul.f32 %v5382_v23, %v6321_v46  ;;  %5409 = vtanh.f32 %v1018_v26  ;;  %v1016_v23 = vadd.f32 %v6349_v18, %v798_v15  ;;  %v805_v26 = vld [vmem:[#allocation7 + $0xd0] sm:$0xff] }
 0x19a   : > { %v5386_v33 = vpop.eup %5385  ;;  %v1270_v35 = vmul.f32 %v5384_v28, %v6321_v46  ;;  %5411 = vtanh.f32 %v1014_v52  ;;  %v814_v28 = vld [vmem:[#allocation7 + $0x118] sm:$0xff]  ;;  %v1023_v52 = vadd.f32 %v6349_v18, %v805_v26 }
 0x19b   : > { %v5388_v37 = vpop.eup %5387  ;;  %v1266_v38 = vmul.f32 %v5386_v33, %v6321_v46  ;;  %5413 = vtanh.f32 %v1034_v55  ;;  %v1032_v33 = vadd.f32 %v6327_v57, %v814_v28  ;;  %v806_v55 = vld [vmem:[#allocation7 + $0xd8] sm:$0xff] }
 0x19c   : > { %1404 = vadd.xlane.f32.xlu1 %v1268_v12  ;;  %v5390_v41 = vpop.eup %5389  ;;  %v1271_v43 = vmul.f32 %v5388_v37, %v6321_v46  ;;  %5415 = vtanh.f32 %v1015_v61  ;;  %v843_v37 = vld [vmem:[#allocation7 + $0x200] sm:$0xff]  ;;  %v1024_v61 = vadd.f32 %v6349_v18, %v806_v55 }
 0x19d   : > { %1392 = vadd.xlane.f32.xlu0 %v1262_v19  ;;  %v5392_v45 = vpop.eup %5391  ;;  %v1267_v47 = vmul.f32 %v5390_v41, %v6321_v46  ;;  %5417 = vtanh.f32 %v1064_v1  ;;  %v1061_v41 = vadd.f32 %v6357_v29, %v843_v37  ;;  %v807_v1 = vld [vmem:[#allocation7 + $0xe0] sm:$0xff] }
 0x19e   : > { %v5394_v49 = vpop.eup %5393  ;;  %v1272_v51 = vmul.f32 %v5392_v45, %v6321_v46  ;;  %5419 = vtanh.f32 %v1030_v8  ;;  %v815_v45 = vld [vmem:[#allocation7 + $0x120] sm:$0xff]  ;;  %v1025_v8 = vadd.f32 %v6349_v18, %v807_v1 }
 0x19f   : > { %v5396_v53 = vpop.eup %5395  ;;  %v1292_v54 = vmul.f32 %v5394_v49, %v6321_v46  ;;  %5421 = vtanh.f32 %v1035_v13  ;;  %v1033_v49 = vadd.f32 %v6327_v57, %v815_v45  ;;  %v808_v13 = vld [vmem:[#allocation7 + $0xe8] sm:$0xff] }
 0x1a0   : > { %1406 = vadd.xlane.f32.xlu1 %v1269_v25  ;;  %v5398_v58 = vpop.eup %5397  ;;  %v1273_v60 = vmul.f32 %v5396_v53, %v6321_v46  ;;  %5423 = vtanh.f32 %v1016_v23  ;;  %v845_v53 = vld [vmem:[#allocation7 + $0x210] sm:$0xff]  ;;  %v1026_v23 = vadd.f32 %v6349_v18, %v808_v13 }
 0x1a1   : > { %1394 = vadd.xlane.f32.xlu0 %v1263_v30  ;;  %v5400_v62 = vpop.eup %5399  ;;  %v1294_v0 = vmul.f32 %v5398_v58, %v6321_v46  ;;  %5425 = vtanh.f32 %v1065_v27  ;;  %v1063_v58 = vadd.f32 %v6357_v29, %v845_v53  ;;  %v809_v27 = vld [vmem:[#allocation7 + $0xf0] sm:$0xff] }
 0x1a2   : > { %v5402_v5 = vpop.eup %5401  ;;  %v1274_v7 = vmul.f32 %v5400_v62, %v6321_v46  ;;  %5427 = vtanh.f32 %v1032_v33  ;;  %v801_v62 = vld [vmem:[#allocation7 + $0xb0] sm:$0xff]  ;;  %v1027_v33 = vadd.f32 %v6349_v18, %v809_v27 }
 0x1a3   : > { %v5404_v9 = vpop.eup %5403  ;;  %v1280_v12 = vmul.f32 %v5402_v5, %v6321_v46  ;;  %5429 = vtanh.f32 %v1021_v36  ;;  %v1019_v5 = vadd.f32 %v6349_v18, %v801_v62  ;;  %v810_v36 = vld [vmem:[#allocation7 + $0xf8] sm:$0xff] }
 0x1a4   : > { %1408 = vadd.xlane.f32.xlu1 %v1270_v35  ;;  %v5406_v19 = vpop.eup %5405  ;;  %v1275_v22 = vmul.f32 %v5404_v9, %v6321_v46  ;;  %5431 = vtanh.f32 %v1061_v41  ;;  %v802_v9 = vld [vmem:[#allocation7 + $0xb8] sm:$0xff]  ;;  %v1028_v41 = vadd.f32 %v6349_v18, %v810_v36  ;;  %v859_v36 = vld [vmem:[#allocation7 + $0x280] sm:$0xff] }
 0x1a5   : > { %1400 = vadd.xlane.f32.xlu0 %v1266_v38  ;;  %v5408_v24 = vpop.eup %5407  ;;  %v1325_v25 = vmul.f32 %v5406_v19, %v6321_v46  ;;  %5433 = vtanh.f32 %v1022_v44  ;;  %v1020_v19 = vadd.f32 %v6349_v18, %v802_v9  ;;  %v857_v44 = vld [vmem:[#allocation7 + $0x270] sm:$0xff] }
 0x1a6   : > { %v5410_v30 = vpop.eup %5409  ;;  %v1276_v32 = vmul.f32 %v5408_v24, %v6321_v46  ;;  %5435 = vtanh.f32 %v1033_v49  ;;  %v818_v24 = vld [vmem:[#allocation7 + $0x138] sm:$0xff]  ;;  %v849_v18 = vld [vmem:[#allocation7 + $0x230] sm:$0xff] }
 0x1a7   : > { %v5412_v34 = vpop.eup %5411  ;;  %v1281_v35 = vmul.f32 %v5410_v30, %v6321_v46  ;;  %5437 = vtanh.f32 %v1023_v52  ;;  %v1036_v30 = vadd.f32 %v6327_v57, %v818_v24  ;;  %v858_v52 = vld [vmem:[#allocation7 + $0x278] sm:$0xff]  ;;  %v829_v9 = vld [vmem:[#allocation7 + $0x190] sm:$0xff] }
 0x1a8   : > { %1410 = vadd.xlane.f32.xlu1 %v1271_v43  ;;  %v5414_v38 = vpop.eup %5413  ;;  %v1277_v40 = vmul.f32 %v5412_v34, %v6321_v46  ;;  %5439 = vtanh.f32 %v1063_v58  ;;  %v848_v34 = vld [vmem:[#allocation7 + $0x228] sm:$0xff]  ;;  %v1076_v58 = vadd.f32 %v6357_v29, %v858_v52  ;;  %v830_v24 = vld [vmem:[#allocation7 + $0x198] sm:$0xff] }
 0x1a9   : > { %1402 = vadd.xlane.f32.xlu0 %v1267_v47  ;;  %v5416_v42 = vpop.eup %5415  ;;  %v1297_v43 = vmul.f32 %v5414_v38, %v6321_v46  ;;  %5441 = vtanh.f32 %v1024_v61  ;;  %v1066_v38 = vadd.f32 %v6357_v29, %v848_v34  ;;  %v828_v61 = vld [vmem:[#allocation7 + $0x188] sm:$0xff]  ;;  %v851_v34 = vld [vmem:[#allocation7 + $0x240] sm:$0xff] }
 0x1aa   : > { %v5418_v47 = vpop.eup %5417  ;;  %v1278_v48 = vmul.f32 %v5416_v42, %v6321_v46  ;;  %5443 = vtanh.f32 %v1019_v5  ;;  %v819_v42 = vld [vmem:[#allocation7 + $0x140] sm:$0xff] }
 0x1ab   : > { %v5420_v50 = vpop.eup %5419  ;;  %5445 = vtanh.f32 %v1025_v8 }
 0x1ac   : > { %1412 = vadd.xlane.f32.xlu1 %v1272_v51  ;;  %v1327_v51 = vmul.f32 %v5418_v47, %v6321_v46  ;;  %v1293_v56 = vmul.f32 %v5420_v50, %v6321_v46  ;;  %5447 = vtanh.f32 %v1020_v19  ;;  %v1037_v47 = vadd.f32 %v6327_v57, %v819_v42  ;;  %v822_v42 = vld [vmem:[#allocation7 + $0x158] sm:$0xff] }
 0x1ad   : > { %1452 = vadd.xlane.f32.xlu0 %v1292_v54  ;;  %v5422_v54 = vpop.eup %5421  ;;  %5449 = vtanh.f32 %v1026_v23  ;;  %v1075_v50 = vadd.f32 %v6357_v29, %v857_v44  ;;  %v875_v44 = vld [vmem:[#allocation7 + $0x300] sm:$0xff] }
 0x1ae   : > { %v5424_v59 = vpop.eup %5423  ;;  %5451 = vtanh.f32 %v1036_v30 }
 0x1af   : > { %v1279_v3 = vmul.f32 %v5424_v59, %v6321_v46  ;;  %5453 = vtanh.f32 %v1027_v33  ;;  %v820_v59 = vld [vmem:[#allocation7 + $0x148] sm:$0xff] }
 0x1b0   : > { %1414 = vadd.xlane.f32.xlu1 %v1273_v60  ;;  %v1298_v60 = vmul.f32 %v5422_v54, %v6321_v46  ;;  %5455 = vtanh.f32 %v1066_v38  ;;  %v1067_v54 = vadd.f32 %v6357_v29, %v849_v18 }
 0x1b1   : > { %1456 = vadd.xlane.f32.xlu0 %v1294_v0  ;;  %v5426_v0 = vpop.eup %5425  ;;  %5457 = vtanh.f32 %v1028_v41 }
 0x1b2   : > { %v5428_v6 = vpop.eup %5427  ;;  %5459 = vtanh.f32 %v1037_v47  ;;  %v1040_v47 = vadd.f32 %v6327_v57, %v822_v42 }
 0x1b3   : > { %v1295_v15 = vmul.f32 %v5428_v6, %v6321_v46 }
 0x1b4   : > { %1416 = vadd.xlane.f32.xlu1 %v1274_v7  ;;  %v1328_v7 = vmul.f32 %v5426_v0, %v6321_v46  ;;  %v1038_v0 = vadd.f32 %v6327_v57, %v820_v59 }
 0x1b5   : > { %1428 = vadd.xlane.f32.xlu0 %v1280_v12  ;;  %v5430_v12 = vpop.eup %5429  ;;  %5461 = vtanh.f32 %v1075_v50  ;;  %v852_v50 = vld [vmem:[#allocation7 + $0x248] sm:$0xff] }
 0x1b6   : > { %v5432_v21 = vpop.eup %5431  ;;  %5463 = vtanh.f32 %v1067_v54 }
 0x1b7   : > { %v1324_v28 = vmul.f32 %v5432_v21, %v6321_v46 }
 0x1b8   : > { %1418 = vadd.xlane.f32.xlu1 %v1275_v22  ;;  %v1284_v22 = vmul.f32 %v5430_v12, %v6321_v46 }
 0x1b9   : > { %1518 = vadd.xlane.f32.xlu0 %v1325_v25  ;;  %v5434_v25 = vpop.eup %5433  ;;  %5465 = vtanh.f32 %v1076_v58  ;;  %v823_v58 = vld [vmem:[#allocation7 + $0x160] sm:$0xff] }
 0x1ba   : > { %v5436_v31 = vpop.eup %5435  ;;  %5467 = vtanh.f32 %v1038_v0 }
 0x1bb   : > { %v1296_v37 = vmul.f32 %v5436_v31, %v6321_v46 }
 0x1bc   : > { %1420 = vadd.xlane.f32.xlu1 %v1276_v32  ;;  %v1285_v32 = vmul.f32 %v5434_v25, %v6321_v46  ;;  %v954_v25 = vcombine.high %v6343_v10, %v6343_v10 }
 0x1bd   : > { %1430 = vadd.xlane.f32.xlu0 %v1281_v35  ;;  %v5438_v35 = vpop.eup %5437 }
 0x1be   : > { %v5440_v39 = vpop.eup %5439 }
 0x1bf   : > { %v1326_v45 = vmul.f32 %v5440_v39, %v6321_v46  ;;  %v6456_v39 = vrot.slane %v954_v25, %v6303_v20 }
 0x1c0   : > { %1422 = vadd.xlane.f32.xlu1 %v1277_v40  ;;  %v1286_v40 = vmul.f32 %v5438_v35, %v6321_v46 }
 0x1c1   : > { %1462 = vadd.xlane.f32.xlu0 %v1297_v43  ;;  %v5442_v43 = vpop.eup %5441 }
 0x1c2   : > { %v5444_v26 = vpop.eup %5443  ;;  %v1287_v49 = vmul.f32 %v5442_v43, %v6321_v46 }
 0x1c3   : > { %v1282_v53 = vmul.f32 %v5444_v26, %v6321_v46 }
 0x1c4   : > { %1424 = vadd.xlane.f32.xlu1 %v1278_v48  ;;  %v955_v48 = vcombine.high %v6337_v4, %v6337_v4 }
 0x1c5   : > { %1522 = vadd.xlane.f32.xlu0 %v1327_v51  ;;  %v5446_v51 = vpop.eup %5445 }
 0x1c6   : > { %v5448_v55 = vpop.eup %5447  ;;  %v1288_v4 = vmul.f32 %v5446_v51, %v6321_v46  ;;  %v877_v51 = vld [vmem:[#allocation7 + $0x310] sm:$0xff] }
 0x1c7   : > { %v1283_v62 = vmul.f32 %v5448_v55, %v6321_v46 }
 0x1c8   : > { %1454 = vadd.xlane.f32.xlu1 %v1293_v56  ;;  %v6426_v56 = vrot.slane %v955_v48, %v6303_v20 }
 0x1c9   : > { %1464 = vadd.xlane.f32.xlu0 %v1298_v60  ;;  %v5450_v60 = vpop.eup %5449 }
 0x1ca   : > { %v5452_v1 = vpop.eup %5451  ;;  %v1289_v5 = vmul.f32 %v5450_v60, %v6321_v46  ;;  %v1046_v6 = vadd.f32 %v6426_v56, %v828_v61  ;;  %v1047_v21 = vadd.f32 %v6426_v56, %v829_v9  ;;  %v1048_v33 = vadd.f32 %v6426_v56, %v830_v24  ;;  %v833_v60 = vld [vmem:[#allocation7 + $0x1b0] sm:$0xff] }
 0x1cb   : > { %v5454_v8 = vpop.eup %5453  ;;  %v1299_v12 = vmul.f32 %v5452_v1, %v6321_v46 }
 0x1cc   : > { %1426 = vadd.xlane.f32.xlu1 %v1279_v3  ;;  %v924_v3 = vcombine.high %v6332_v63, %v6332_v63  ;;  %v1290_v63 = vmul.f32 %v5454_v8, %v6321_v46  ;;  %5469 = vtanh.f32 %v1046_v6 }
 0x1cd   : > { %1524 = vadd.xlane.f32.xlu0 %v1328_v7  ;;  %v850_v7 = vld [vmem:[#allocation7 + $0x238] sm:$0xff] }
 0x1ce   : > { %v1068_v13 = vadd.f32 %v6357_v29, %v850_v7  ;;  %v6439_v19 = vrot.slane %v924_v3, %v6299_v17  ;;  %v1051_v3 = vadd.f32 %v6426_v56, %v833_v60  ;;  %v863_v7 = vld [vmem:[#allocation7 + $0x2a0] sm:$0xff] }
 0x1d0   : > { %1458 = vadd.xlane.f32.xlu1 %v1295_v15  ;;  %v5456_v15 = vpop.eup %5455  ;;  %5471 = vtanh.f32 %v1068_v13  ;;  %v6449_v31 = vrot.slane %v6439_v19, %v6303_v20 }
 0x1d1   : > { %1436 = vadd.xlane.f32.xlu0 %v1284_v22  ;;  %v821_v22 = vld [vmem:[#allocation7 + $0x150] sm:$0xff]  ;;  %v5458_v23 = vpop.eup %5457  ;;  %v1329_v27 = vmul.f32 %v5456_v15, %v6321_v46  ;;  %5473 = vtanh.f32 %v1047_v21 }
 0x1d2   : > { %v5460_v30 = vpop.eup %5459  ;;  %v1077_v41 = vadd.f32 %v6449_v31, %v859_v36  ;;  %v1081_v15 = vadd.f32 %v6449_v31, %v863_v7 }
 0x1d3   : > { %v5462_v35 = vpop.eup %5461  ;;  %v1300_v10 = vmul.f32 %v5460_v30, %v6321_v46  ;;  %v854_v30 = vld [vmem:[#allocation7 + $0x258] sm:$0xff] }
 0x1d4   : > { %1516 = vadd.xlane.f32.xlu1 %v1324_v28  ;;  %v1039_v28 = vadd.f32 %v6327_v57, %v821_v22  ;;  %v5464_v38 = vpop.eup %5463  ;;  %v834_v22 = vld [vmem:[#allocation7 + $0x1b8] sm:$0xff] }
 0x1d5   : > { %1438 = vadd.xlane.f32.xlu0 %v1285_v32  ;;  %v1291_v32 = vmul.f32 %v5458_v23, %v6321_v46  ;;  %v5466_v43 = vpop.eup %5465 }
 0x1d6   : > { %5475 = vtanh.f32 %v1039_v28  ;;  %v5468_v26 = vpop.eup %5467  ;;  %v1339_v48 = vmul.f32 %v5466_v43, %v6321_v46  ;;  %v1052_v28 = vadd.f32 %v6426_v56, %v834_v22 }
 0x1d7   : > { %5477 = vtanh.f32 %v1048_v33  ;;  %v1301_v52 = vmul.f32 %v5468_v26, %v6321_v46  ;;  %v864_v33 = vld [vmem:[#allocation7 + $0x2a8] sm:$0xff]  ;;  %v855_v26 = vld [vmem:[#allocation7 + $0x260] sm:$0xff] }
 0x1d8   : > { %1460 = vadd.xlane.f32.xlu1 %v1296_v37  ;;  %v1069_v37 = vadd.f32 %v6357_v29, %v851_v34 }
 0x1d9   : > { %1440 = vadd.xlane.f32.xlu0 %v1286_v40  ;;  %v1338_v40 = vmul.f32 %v5462_v35, %v6321_v46  ;;  %v5470_v18 = vpop.eup %5469  ;;  %v1072_v35 = vadd.f32 %v6357_v29, %v854_v30 }
 0x1da   : > { %5479 = vtanh.f32 %v1069_v37  ;;  %v1309_v55 = vmul.f32 %v5470_v18, %v6321_v46  ;;  %v1082_v37 = vadd.f32 %v6449_v31, %v864_v33  ;;  %v1073_v18 = vadd.f32 %v6357_v29, %v855_v26 }
 0x1db   : > { %5481 = vtanh.f32 %v1077_v41  ;;  %v835_v41 = vld [vmem:[#allocation7 + $0x1c0] sm:$0xff] }
 0x1dc   : > { %1520 = vadd.xlane.f32.xlu1 %v1326_v45  ;;  %v1330_v45 = vmul.f32 %v5464_v38, %v6321_v46  ;;  %5483 = vtanh.f32 %v1040_v47  ;;  %v825_v38 = vld [vmem:[#allocation7 + $0x170] sm:$0xff]  ;;  %v1053_v47 = vadd.f32 %v6426_v56, %v835_v41  ;;  %v838_v41 = vld [vmem:[#allocation7 + $0x1d8] sm:$0xff] }
 0x1dd   : > { %1442 = vadd.xlane.f32.xlu0 %v1287_v49  ;;  %v1093_v49 = vadd.f32 %v6456_v39, %v875_v44  ;;  %v5472_v54 = vpop.eup %5471  ;;  %v1043_v43 = vadd.f32 %v6327_v57, %v825_v38 }
 0x1de   : > { %v5474_v59 = vpop.eup %5473  ;;  %v1331_v61 = vmul.f32 %v5472_v54, %v6321_v46  ;;  %v826_v54 = vld [vmem:[#allocation7 + $0x178] sm:$0xff] }
 0x1df   : > { %5485 = vtanh.f32 %v1093_v49  ;;  %v1310_v1 = vmul.f32 %v5474_v59, %v6321_v46  ;;  %v865_v49 = vld [vmem:[#allocation7 + $0x2b0] sm:$0xff]  ;;  %v1044_v59 = vadd.f32 %v6327_v57, %v826_v54 }
 0x1e0   : > { %1432 = vadd.xlane.f32.xlu1 %v1282_v53  ;;  %v1070_v53 = vadd.f32 %v6357_v29, %v852_v50 }
 0x1e1   : > { %1444 = vadd.xlane.f32.xlu0 %v1288_v4  ;;  %v1095_v4 = vadd.f32 %v6456_v39, %v877_v51 }
 0x1e2   : > { %5487 = vtanh.f32 %v1070_v53  ;;  %v1083_v53 = vadd.f32 %v6449_v31, %v865_v49 }
 0x1e3   : > { %v5476_v0 = vpop.eup %5475  ;;  %5489 = vtanh.f32 %v1095_v4  ;;  %v836_v4 = vld [vmem:[#allocation7 + $0x1c8] sm:$0xff] }
 0x1e4   : > { %1434 = vadd.xlane.f32.xlu1 %v1283_v62  ;;  %v1041_v62 = vadd.f32 %v6327_v57, %v823_v58  ;;  %v5478_v6 = vpop.eup %5477  ;;  %v1302_v8 = vmul.f32 %v5476_v0, %v6321_v46  ;;  %v856_v0 = vld [vmem:[#allocation7 + $0x268] sm:$0xff] }
 0x1e5   : > { %1446 = vadd.xlane.f32.xlu0 %v1289_v5  ;;  %v853_v5 = vld [vmem:[#allocation7 + $0x250] sm:$0xff]  ;;  %v1311_v13 = vmul.f32 %v5478_v6, %v6321_v46  ;;  %v1074_v6 = vadd.f32 %v6357_v29, %v856_v0 }
 0x1e6   : > { %5491 = vtanh.f32 %v1041_v62  ;;  %v1071_v9 = vadd.f32 %v6357_v29, %v853_v5  ;;  %v1054_v62 = vadd.f32 %v6426_v56, %v836_v4  ;;  %v861_v4 = vld [vmem:[#allocation7 + $0x290] sm:$0xff] }
 0x1e7   : > { %5493 = vtanh.f32 %v1051_v3  ;;  %v866_v3 = vld [vmem:[#allocation7 + $0x2b8] sm:$0xff] }
 0x1e8   : > { %1466 = vadd.xlane.f32.xlu1 %v1299_v12  ;;  %v5480_v12 = vpop.eup %5479  ;;  %5495 = vtanh.f32 %v1071_v9  ;;  %v827_v9 = vld [vmem:[#allocation7 + $0x180] sm:$0xff] }
 0x1e9   : > { %1448 = vadd.xlane.f32.xlu0 %v1290_v63  ;;  %v824_v63 = vld [vmem:[#allocation7 + $0x168] sm:$0xff]  ;;  %v5482_v21 = vpop.eup %5481  ;;  %v1332_v23 = vmul.f32 %v5480_v12, %v6321_v46  ;;  %5497 = vtanh.f32 %v1081_v15  ;;  %v6501_v15 = vand.u32 127, %v912_v14 }
 0x1ea   : > { %v1042_v24 = vadd.f32 %v6327_v57, %v824_v63  ;;  %v5484_v25 = vpop.eup %5483  ;;  %v1084_v57 = vadd.f32 %v6449_v31, %v866_v3 }
 0x1eb   : > { %v1303_v34 = vmul.f32 %v5484_v25, %v6321_v46  ;;  %v860_v25 = vld [vmem:[#allocation7 + $0x288] sm:$0xff]  ;;  %v1787_v30 = vadd.s32 4294967280, %v6501_v15 }
 0x1ec   : > { %1526 = vadd.xlane.f32.xlu1 %v1329_v27  ;;  %v1340_v27 = vmul.f32 %v5482_v21, %v6321_v46  ;;  %5499 = vtanh.f32 %v1042_v24  ;;  %v1045_v21 = vadd.f32 %v6426_v56, %v827_v9  ;;  %v1079_v9 = vadd.f32 %v6449_v31, %v861_v4 }
 0x1ed   : > { %1450 = vadd.xlane.f32.xlu0 %v1291_v32  ;;  %v5486_v32 = vpop.eup %5485  ;;  %5501 = vtanh.f32 %v1052_v28  ;;  %v867_v28 = vld [vmem:[#allocation7 + $0x2c0] sm:$0xff]  ;;  %v6528_v26 = vsub.s32 %v1787_v30, %v6296_v16 }
 0x1ee   : > { %5503 = vtanh.f32 %v1072_v35  ;;  %v1078_v35 = vadd.f32 %v6449_v31, %v860_v25  ;;  %v1085_v38 = vadd.f32 %v6449_v31, %v867_v28  ;;  %v839_v25 = vld [vmem:[#allocation7 + $0x1e0] sm:$0xff] }
 0x1ef   : > { %v5488_v36 = vpop.eup %5487  ;;  %5505 = vtanh.f32 %v1082_v37 }
 0x1f0   : > { %1468 = vadd.xlane.f32.xlu1 %v1300_v10  ;;  %v1356_v10 = vmul.f32 %v5486_v32, %v6321_v46  ;;  %v1333_v42 = vmul.f32 %v5488_v36, %v6321_v46  ;;  %5507 = vtanh.f32 %v1043_v43  ;;  %v6513_v32 = vsub.s32 %v6501_v15, %v6296_v16 }
 0x1f1   : > { %1544 = vadd.xlane.f32.xlu0 %v1338_v40  ;;  %v5490_v40 = vpop.eup %5489  ;;  %5509 = vtanh.f32 %v1053_v47  ;;  %v1801_v43 = vadd.s32 4294967264, %v6501_v15  ;;  %v1829_v47 = vadd.s32 4294967232, %v6501_v15 }
 0x1f2   : > { %5511 = vtanh.f32 %v1073_v18 }
 0x1f3   : > { %v5492_v44 = vpop.eup %5491  ;;  %5513 = vtanh.f32 %v1083_v53 }
 0x1f4   : > { %1528 = vadd.xlane.f32.xlu1 %v1330_v45  ;;  %v1358_v45 = vmul.f32 %v5490_v40, %v6321_v46  ;;  %v1304_v50 = vmul.f32 %v5492_v44, %v6321_v46  ;;  %5515 = vtanh.f32 %v1044_v59  ;;  %v831_v40 = vld [vmem:[#allocation7 + $0x1a0] sm:$0xff]  ;;  %v1808_v44 = vadd.s32 4294967256, %v6501_v15 }
 0x1f5   : > { %1546 = vadd.xlane.f32.xlu0 %v1339_v48  ;;  %v5494_v48 = vpop.eup %5493  ;;  %5517 = vtanh.f32 %v1054_v62  ;;  %v1049_v18 = vadd.f32 %v6426_v56, %v831_v40  ;;  %v6538_v59 = vsub.s32 %v1801_v43, %v6296_v16  ;;  %v868_v62 = vld [vmem:[#allocation7 + $0x2c8] sm:$0xff]  ;;  %v869_v43 = vld [vmem:[#allocation7 + $0x2d0] sm:$0xff] }
 0x1f6   : > { %v5496_v51 = vpop.eup %5495  ;;  %5519 = vtanh.f32 %v1074_v6  ;;  %v1843_v6 = vadd.s32 4294967216, %v6501_v15  ;;  %v1087_v4 = vadd.f32 %v6449_v31, %v869_v43 }
 0x1f7   : > { %v1334_v58 = vmul.f32 %v5496_v51, %v6321_v46  ;;  %5521 = vtanh.f32 %v1084_v57  ;;  %v1056_v51 = vadd.f32 %v6426_v56, %v838_v41  ;;  %v1815_v57 = vadd.s32 4294967248, %v6501_v15 }
 0x1f8   : > { %1470 = vadd.xlane.f32.xlu1 %v1301_v52  ;;  %v1314_v52 = vmul.f32 %v5494_v48, %v6321_v46  ;;  %5523 = vtanh.f32 %v1045_v21  ;;  %v1794_v48 = vadd.s32 4294967272, %v6501_v15  ;;  %v1086_v21 = vadd.f32 %v6449_v31, %v868_v62 }
 0x1f9   : > { %1486 = vadd.xlane.f32.xlu0 %v1309_v55  ;;  %v5498_v55 = vpop.eup %5497 }
 0x1fa   : > { %v5500_v60 = vpop.eup %5499 }
 0x1fb   : > { %v1305_v5 = vmul.f32 %v5500_v60, %v6321_v46  ;;  %v6541_v60 = vsub.s32 %v1808_v44, %v6296_v16 }
 0x1fc   : > { %1530 = vadd.xlane.f32.xlu1 %v1331_v61  ;;  %v1344_v61 = vmul.f32 %v5498_v55, %v6321_v46 }
 0x1fd   : > { %1488 = vadd.xlane.f32.xlu0 %v1310_v1  ;;  %v5502_v1 = vpop.eup %5501 }
 0x1fe   : > { %v5504_v7 = vpop.eup %5503 }
 0x1ff   : > { %v5506_v12 = vpop.eup %5505  ;;  %v1335_v63 = vmul.f32 %v5504_v7, %v6321_v46 }
 0x200   : > { %1472 = vadd.xlane.f32.xlu1 %v1302_v8  ;;  %v1315_v8 = vmul.f32 %v5502_v1, %v6321_v46  ;;  %v5508_v29 = vpop.eup %5507  ;;  %v1345_v22 = vmul.f32 %v5506_v12, %v6321_v46  ;;  %v6546_v1 = vsub.s32 %v1829_v47, %v6296_v16 }
 0x201   : > { %1490 = vadd.xlane.f32.xlu0 %v1311_v13  ;;  %v837_v13 = vld [vmem:[#allocation7 + $0x1d0] sm:$0xff] }
 0x202   : > { %v1055_v24 = vadd.f32 %v6426_v56, %v837_v13 }
 0x204   : > { %1532 = vadd.xlane.f32.xlu1 %v1332_v23  ;;  %v1780_v23 = vadd.s32 4294967288, %v6501_v15  ;;  %5525 = vtanh.f32 %v1055_v24  ;;  %v1822_v24 = vadd.s32 4294967240, %v6501_v15 }
 0x205   : > { %1548 = vadd.xlane.f32.xlu0 %v1340_v27  ;;  %v5510_v27 = vpop.eup %5509  ;;  %5527 = vtanh.f32 %v1078_v35  ;;  %v6577_v35 = vsub.s32 %v1815_v57, %v6296_v16  ;;  %v840_v57 = vld [vmem:[#allocation7 + $0x1e8] sm:$0xff] }
 0x206   : > { %v5512_v36 = vpop.eup %5511  ;;  %v6519_v37 = vsub.s32 %v1780_v23, %v6296_v16  ;;  %5529 = vtanh.f32 %v1085_v38 }
 0x207   : > { %5531 = vtanh.f32 %v1049_v18 }
 0x208   : > { %1474 = vadd.xlane.f32.xlu1 %v1303_v34  ;;  %v1306_v34 = vmul.f32 %v5508_v29, %v6321_v46  ;;  %5533 = vtanh.f32 %v1056_v51  ;;  %v876_v29 = vld [vmem:[#allocation7 + $0x308] sm:$0xff] }
 0x209   : > { %1580 = vadd.xlane.f32.xlu0 %v1356_v10  ;;  %v1316_v10 = vmul.f32 %v5510_v27, %v6321_v46  ;;  %5535 = vtanh.f32 %v1079_v9 }
 0x20a   : > { %5537 = vtanh.f32 %v1086_v21 }
 0x20c   : > { %1534 = vadd.xlane.f32.xlu1 %v1333_v42  ;;  %v5514_v42 = vpop.eup %5513 }
 0x20d   : > { %1584 = vadd.xlane.f32.xlu0 %v1358_v45  ;;  %v1346_v55 = vmul.f32 %v5514_v42, %v6321_v46  ;;  %v1057_v42 = vadd.f32 %v6426_v56, %v839_v25 }
 0x210   : > { %1476 = vadd.xlane.f32.xlu1 %v1304_v50  ;;  %v1336_v50 = vmul.f32 %v5512_v36, %v6321_v46  ;;  %v1094_v36 = vadd.f32 %v6456_v39, %v876_v29 }
 0x211   : > { %1496 = vadd.xlane.f32.xlu0 %v1314_v52  ;;  %v5516_v52 = vpop.eup %5515 }
 0x212   : > { %5539 = vtanh.f32 %v1094_v36 }
 0x213   : > { %5541 = vtanh.f32 %v1057_v42 }
 0x214   : > { %1536 = vadd.xlane.f32.xlu1 %v1334_v58  ;;  %v5518_v58 = vpop.eup %5517 }
 0x215   : > { %1556 = vadd.xlane.f32.xlu0 %v1344_v61  ;;  %v1836_v61 = vadd.s32 4294967224, %v6501_v15  ;;  %v5520_v12 = vpop.eup %5519 }
 0x217   : > { %v6561_v23 = vsub.s32 %v1836_v61, %v6296_v16 }
 0x218   : > { %1478 = vadd.xlane.f32.xlu1 %v1305_v5  ;;  %v6551_v5 = vsub.s32 %v1794_v48, %v6296_v16  ;;  %v1850_v48 = vadd.s32 4294967208, %v6501_v15 }
 0x219   : > { %1498 = vadd.xlane.f32.xlu0 %v1315_v8  ;;  %v1307_v8 = vmul.f32 %v5516_v52, %v6321_v46  ;;  %v1857_v52 = vadd.s32 4294967200, %v6501_v15 }
 0x21c   : > { %1538 = vadd.xlane.f32.xlu1 %v1335_v63  ;;  %v1317_v63 = vmul.f32 %v5518_v58, %v6321_v46  ;;  %v6568_v46 = vsub.s32 %v1843_v6, %v6296_v16  ;;  %v862_v58 = vld [vmem:[#allocation7 + $0x298] sm:$0xff] }
 0x21d   : > { %1558 = vadd.xlane.f32.xlu0 %v1345_v22  ;;  %v6508_v14 = vpop.xlane.xlu1 %1396  ;;  %v5522_v22 = vpop.eup %5521 }
 0x21e   : > { %v1389_v33 = vpop.xlane.xlu0 %1388  ;;  %v5524_v38 = vpop.eup %5523  ;;  %v1805_v47 = vrot.slane %v6508_v14, %v6538_v59 }
 0x21f   : > { %v1779_v53 = vrot.slane %v1389_v33, %v6513_v32  ;;  %v6573_v33 = vld [vmem:[%s7319_s6] ss:$0 sm:$0xff]  ;;  %v5526_v44 = vpop.eup %5525 }
 0x220   : > { %1480 = vadd.xlane.f32.xlu1 %v1306_v34  ;;  %v1337_v34 = vmul.f32 %v6573_v33, %v5520_v12  ;;  %v1347_v41 = vmul.f32 %v6573_v33, %v5522_v22  ;;  %v5528_v61 = vpop.eup %5527  ;;  %v6610_v22 = vsub.s32 %v1857_v52, %v6296_v16 }
 0x221   : > { %1500 = vadd.xlane.f32.xlu0 %v1316_v10  ;;  %v6524_v45 = vpop.xlane.xlu1 %1398  ;;  %v832_v10 = vld [vmem:[#allocation7 + $0x1a8] sm:$0xff]  ;;  %v5530_v6 = vpop.eup %5529  ;;  %v1341_v29 = vmul.f32 %v6573_v33, %v5528_v61 }
 0x222   : > { %v1391_v49 = vpop.xlane.xlu0 %1390  ;;  %v5532_v25 = vpop.eup %5531 }
 0x223   : > { %v1784_v54 = vrot.slane %v1391_v49, %v6519_v37  ;;  %v6587_v49 = vsub.s32 %v1822_v24, %v6296_v16  ;;  %v870_v24 = vld [vmem:[#allocation7 + $0x2d8] sm:$0xff]  ;;  %v5534_v36 = vpop.eup %5533  ;;  %v1312_v52 = vmul.f32 %v6573_v33, %v5532_v25 }
 0x224   : > { %1540 = vadd.xlane.f32.xlu1 %v1336_v50  ;;  %v1812_v50 = vrot.slane %v6524_v45, %v6541_v60 }
 0x225   : > { %v1786_v0 = vsel %vm1785_vm1, %v1784_v54, %v1779_v53  ;;  %1560 = vadd.xlane.f32.xlu0 %v1346_v55  ;;  %v6548_v3 = vpop.xlane.xlu1 %1404  ;;  %v1050_v53 = vadd.f32 %v6426_v56, %v832_v10  ;;  %v1308_v55 = vmul.f32 %v6573_v33, %v5524_v38 }
 0x226   : > { %v1393_v7 = vpop.xlane.xlu0 %1392  ;;  %v1833_v10 = vrot.slane %v6548_v3, %v6546_v1 }
 0x227   : > { %v1791_v13 = vrot.slane %v1393_v7, %v6528_v26  ;;  %v6603_v7 = vsub.s32 %v1850_v48, %v6296_v16  ;;  %5543 = vtanh.f32 %v1050_v53  ;;  %v879_v53 = vld [vmem:[#allocation7 + $0x320] sm:$0xff] }
 0x228   : > { %1482 = vadd.xlane.f32.xlu1 %v1307_v8  ;;  %v1864_v8 = vadd.s32 4294967192, %v6501_v15  ;;  %5545 = vtanh.f32 %v1087_v4 }
 0x229   : > { %v1793_v27 = vsel %vm7348_vm2, %v1791_v13, %v1786_v0  ;;  %1502 = vadd.xlane.f32.xlu0 %v1317_v63  ;;  %v6565_v28 = vpop.xlane.xlu1 %1406  ;;  %v1318_v0 = vmul.f32 %v6573_v33, %v5526_v44  ;;  %v1080_v13 = vadd.f32 %v6449_v31, %v862_v58  ;;  %v878_v63 = vld [vmem:[#allocation7 + $0x318] sm:$0xff]  ;;  %v841_v58 = vld [vmem:[#allocation7 + $0x1f0] sm:$0xff] }
 0x22a   : > { %v1395_v30 = vpop.xlane.xlu0 %1394  ;;  %v6618_v38 = vsub.s32 %v1864_v8, %v6296_v16  ;;  %v1840_v42 = vrot.slane %v6565_v28, %v6561_v23  ;;  %v5536_v28 = vpop.eup %5535 }
 0x22b   : > { %v1798_v40 = vrot.slane %v1395_v30, %v6551_v5  ;;  %v1348_v30 = vmul.f32 %v6573_v33, %v5530_v6  ;;  %5547 = vtanh.f32 %v1080_v13  ;;  %v5538_v4 = vpop.eup %5537  ;;  %v1097_v6 = vadd.f32 %v6456_v39, %v879_v53 }
 0x22c   : > { %1542 = vadd.xlane.f32.xlu1 %v1337_v34  ;;  %v1058_v34 = vadd.f32 %v6426_v56, %v840_v57  ;;  %v5540_v13 = vpop.eup %5539 }
 0x22d   : > { %v1800_v18 = vsel %vm1799_vm3, %v1798_v40, %v1793_v27  ;;  %1562 = vadd.xlane.f32.xlu0 %v1347_v41  ;;  %v6592_v51 = vpop.xlane.xlu1 %1408  ;;  %v1871_v40 = vadd.s32 4294967184, %v6501_v15  ;;  %v1096_v41 = vadd.f32 %v6456_v39, %v878_v63  ;;  %v1349_v63 = vmul.f32 %v6573_v33, %v5538_v4 }
 0x22e   : > { %v1807_v14 = vsel %vm1806_vm4, %v1805_v47, %v1800_v18  ;;  %v1401_v54 = vpop.xlane.xlu0 %1400  ;;  %v1088_v47 = vadd.f32 %v6449_v31, %v870_v24  ;;  %v1847_v3 = vrot.slane %v6592_v51, %v6568_v46  ;;  %5549 = vtanh.f32 %v1058_v34  ;;  %v5542_v24 = vpop.eup %5541 }
 0x22f   : > { %v1814_v45 = vsel %vm1813_vm5, %v1812_v50, %v1807_v14  ;;  %v1819_v62 = vrot.slane %v1401_v54, %v6577_v35  ;;  %5551 = vtanh.f32 %v1096_v41 }
 0x230   : > { %1484 = vadd.xlane.f32.xlu1 %v1308_v55  ;;  %v1319_v55 = vmul.f32 %v6573_v33, %v5534_v36  ;;  %5553 = vtanh.f32 %v1088_v47  ;;  %v881_v47 = vld [vmem:[#allocation7 + $0x330] sm:$0xff] }
 0x231   : > { %v1821_v9 = vsel %vm1820_vm6, %v1819_v62, %v1814_v45  ;;  %1504 = vadd.xlane.f32.xlu0 %v1318_v0  ;;  %v1411_v12 = vpop.xlane.xlu1 %1410  ;;  %v6639_v62 = vsub.s32 %v1871_v40, %v6296_v16  ;;  %v1878_v0 = vadd.s32 4294967176, %v6501_v15  ;;  %v1357_v40 = vmul.f32 %v6573_v33, %v5540_v13  ;;  %v883_v13 = vld [vmem:[#allocation7 + $0x340] sm:$0xff] }
 0x232   : > { %v1403_v21 = vpop.xlane.xlu0 %1402  ;;  %v1854_v14 = vrot.slane %v1411_v12, %v6603_v7  ;;  %v1342_v12 = vmul.f32 %v6573_v33, %v5536_v28  ;;  %5555 = vtanh.f32 %v1097_v6 }
 0x233   : > { %v1826_v27 = vrot.slane %v1403_v21, %v6587_v49  ;;  %v1059_v21 = vadd.f32 %v6426_v56, %v841_v58  ;;  %v6652_v34 = vsub.s32 %v1878_v0, %v6296_v16  ;;  %v882_v58 = vld [vmem:[#allocation7 + $0x338] sm:$0xff]  ;;  %v888_v0 = vld [vmem:[#allocation7 + $0x368] sm:$0xff] }
 0x234   : > { %1550 = vadd.xlane.f32.xlu1 %v1341_v29  ;;  %v880_v29 = vld [vmem:[#allocation7 + $0x328] sm:$0xff] }
 0x235   : > { %v1828_v43 = vsel %vm1827_vm7, %v1826_v27, %v1821_v9  ;;  %1564 = vadd.xlane.f32.xlu0 %v1348_v30  ;;  %v1413_v44 = vpop.xlane.xlu1 %1412  ;;  %v871_v27 = vld [vmem:[#allocation7 + $0x2e0] sm:$0xff]  ;;  %v1098_v41 = vadd.f32 %v6456_v39, %v880_v29  ;;  %5557 = vtanh.f32 %v1059_v21  ;;  %v956_v21 = vcombine.high %v6439_v19, %v6439_v19 }
 0x236   : > { %v1835_v48 = vsel %vm1834_vm8, %v1833_v10, %v1828_v43  ;;  %v1861_v50 = vrot.slane %v1413_v44, %v6610_v22  ;;  %v6630_v18 = vpop.xlane.xlu0 %1452  ;;  %v1320_v43 = vmul.f32 %v6573_v33, %v5542_v24  ;;  %v1089_v44 = vadd.f32 %v6449_v31, %v871_v27  ;;  %v874_v27 = vld [vmem:[#allocation7 + $0x2f8] sm:$0xff] }
 0x237   : > { %v1842_v54 = vsel %vm1841_vm9, %v1840_v42, %v1835_v48  ;;  %v5544_v42 = vpop.eup %5543  ;;  %5559 = vtanh.f32 %v1098_v41  ;;  %v1106_v24 = vadd.f32 %v6456_v39, %v888_v0 }
 0x238   : > { %v1849_v51 = vsel %vm1848_vm10, %v1847_v3, %v1842_v54  ;;  %1492 = vadd.xlane.f32.xlu1 %v1312_v52  ;;  %v5546_v3 = vpop.eup %5545  ;;  %v1313_v54 = vmul.f32 %v6573_v33, %v5544_v42  ;;  %5561 = vtanh.f32 %v1089_v44  ;;  %v6687_v44 = vrot.slane %v956_v21, %v6303_v20 }
 0x239   : > { %v1856_v61 = vsel %vm1855_vm11, %v1854_v14, %v1849_v51  ;;  %1506 = vadd.xlane.f32.xlu0 %v1319_v55  ;;  %v1415_v45 = vpop.xlane.xlu1 %1414  ;;  %v5548_v53 = vpop.eup %5547  ;;  %v1099_v55 = vadd.f32 %v6456_v39, %v881_v47  ;;  %v1350_v4 = vmul.f32 %v6573_v33, %v5546_v3  ;;  %v1092_v3 = vadd.f32 %v6449_v31, %v874_v27 }
 0x23a   : > { %v1863_v8 = vsel %vm1862_vm12, %v1861_v50, %v1856_v61  ;;  %v1868_v57 = vrot.slane %v1415_v45, %v6618_v38  ;;  %v6645_v9 = vpop.xlane.xlu0 %1456  ;;  %v887_v50 = vld [vmem:[#allocation7 + $0x360] sm:$0xff] }
 0x23b   : > { %v1105_v51 = vadd.f32 %v6456_v39, %v887_v50  ;;  %v5550_v61 = vpop.eup %5549  ;;  %5563 = vtanh.f32 %v1099_v55 }
 0x23c   : > { %v1870_v25 = vsel %vm1869_vm13, %v1868_v57, %v1863_v8  ;;  %1552 = vadd.xlane.f32.xlu1 %v1342_v12  ;;  %v1343_v57 = vmul.f32 %v6573_v33, %v5548_v53  ;;  %v1100_v12 = vadd.f32 %v6456_v39, %v882_v58  ;;  %v1321_v29 = vmul.f32 %v6573_v33, %v5550_v61  ;;  %v892_v53 = vld [vmem:[#allocation7 + $0x388] sm:$0xff]  ;;  %v885_v58 = vld [vmem:[#allocation7 + $0x350] sm:$0xff] }
 0x23d   : > { %1566 = vadd.xlane.f32.xlu0 %v1349_v63  ;;  %v1417_v30 = vpop.xlane.xlu1 %1416  ;;  %v5552_v63 = vpop.eup %5551  ;;  %5565 = vtanh.f32 %v1105_v51  ;;  %v1103_v21 = vadd.f32 %v6456_v39, %v885_v58  ;;  %v842_v58 = vld [vmem:[#allocation7 + $0x1f8] sm:$0xff] }
 0x23e   : > { %v1875_v36 = vrot.slane %v1417_v30, %v6639_v62  ;;  %v6655_v10 = vpop.xlane.xlu0 %1428  ;;  %v1359_v19 = vmul.f32 %v6573_v33, %v5552_v63  ;;  %5567 = vtanh.f32 %v1100_v12 }
 0x23f   : > { %5569 = vtanh.f32 %v1106_v24 }
 0x240   : > { %v1877_v48 = vsel %vm1876_vm14, %v1875_v36, %v1870_v25  ;;  %1582 = vadd.xlane.f32.xlu1 %v1357_v40  ;;  %v5554_v25 = vpop.eup %5553  ;;  %v1101_v36 = vadd.f32 %v6456_v39, %v883_v13  ;;  %v893_v13 = vld [vmem:[#allocation7 + $0x390] sm:$0xff] }
 0x241   : > { %1508 = vadd.xlane.f32.xlu0 %v1320_v43  ;;  %v1419_v52 = vpop.xlane.xlu1 %1418  ;;  %v5556_v43 = vpop.eup %5555  ;;  %v1351_v47 = vmul.f32 %v6573_v33, %v5554_v25 }
 0x242   : > { %v1882_v28 = vrot.slane %v1419_v52, %v6652_v34  ;;  %v6663_v14 = vpop.xlane.xlu0 %1518  ;;  %v5558_v50 = vpop.eup %5557  ;;  %5571 = vtanh.f32 %v1101_v36  ;;  %v1976_v36 = vrot.slane %v6645_v9, %v6528_v26 }
 0x243   : > { %v1322_v0 = vmul.f32 %v6573_v33, %v5558_v50  ;;  %5573 = vtanh.f32 %v1092_v3 }
 0x244   : > { %v6670_v45 = vsel %vm1883_vm15, %v1882_v28, %v1877_v48  ;;  %1494 = vadd.xlane.f32.xlu1 %v1313_v54  ;;  %v884_v48 = vld [vmem:[#allocation7 + $0x348] sm:$0xff]  ;;  %v5560_v61 = vpop.eup %5559 }
 0x245   : > { %1568 = vadd.xlane.f32.xlu0 %v1350_v4  ;;  %v1421_v6 = vpop.xlane.xlu1 %1420  ;;  %v1360_v4 = vmul.f32 %v6573_v33, %v5556_v43  ;;  %v1102_v51 = vadd.f32 %v6456_v39, %v884_v48  ;;  %v1361_v27 = vmul.f32 %v6573_v33, %v5560_v61 }
 0x246   : > { %v6672_v8 = vpop.xlane.xlu0 %1430  ;;  %v1888_v40 = vrot.slane %v1421_v6, %v6513_v32  ;;  %v1110_v6 = vadd.f32 %v6687_v44, %v892_v53 }
 0x247   : > { %5575 = vtanh.f32 %v1102_v51 }
 0x248   : > { %1554 = vadd.xlane.f32.xlu1 %v1343_v57  ;;  %v5562_v57 = vpop.eup %5561  ;;  %5577 = vtanh.f32 %v1110_v6 }
 0x249   : > { %1510 = vadd.xlane.f32.xlu0 %v1321_v29  ;;  %v1423_v30 = vpop.xlane.xlu1 %1422  ;;  %v1967_v29 = vrot.slane %v6630_v18, %v6513_v32  ;;  %5579 = vtanh.f32 %v1103_v21 }
 0x24a   : > { %v1892_v41 = vrot.slane %v1423_v30, %v6519_v37  ;;  %v6683_v42 = vpop.xlane.xlu0 %1462  ;;  %v5564_v30 = vpop.eup %5563 }
 0x24b   : > { %v5566_v43 = vpop.eup %5565  ;;  %v1362_v9 = vmul.f32 %v6573_v33, %v5564_v30 }
 0x24c   : > { %v1893_v52 = vsel %vm1785_vm1, %v1892_v41, %v1888_v40  ;;  %1586 = vadd.xlane.f32.xlu1 %v1359_v19  ;;  %v1352_v40 = vmul.f32 %v6573_v33, %v5562_v57  ;;  %v1111_v41 = vadd.f32 %v6687_v44, %v893_v13  ;;  %v886_v19 = vld [vmem:[#allocation7 + $0x358] sm:$0xff]  ;;  %v895_v57 = vld [vmem:[#allocation7 + $0x3a0] sm:$0xff] }
 0x24d   : > { %1570 = vadd.xlane.f32.xlu0 %v1351_v47  ;;  %v1425_v28 = vpop.xlane.xlu1 %1424  ;;  %v894_v47 = vld [vmem:[#allocation7 + $0x398] sm:$0xff]  ;;  %v1104_v53 = vadd.f32 %v6456_v39, %v886_v19  ;;  %v1113_v30 = vadd.f32 %v6687_v44, %v895_v57 }
 0x24e   : > { %v1897_v54 = vrot.slane %v1425_v28, %v6528_v26  ;;  %v6693_v55 = vpop.xlane.xlu0 %1522  ;;  %v5568_v28 = vpop.eup %5567  ;;  %5581 = vtanh.f32 %v1111_v41  ;;  %v1112_v51 = vadd.f32 %v6687_v44, %v894_v47 }
 0x24f   : > { %v5570_v61 = vpop.eup %5569  ;;  %5583 = vtanh.f32 %v1104_v53 }
 0x250   : > { %v1898_v12 = vsel %vm7348_vm2, %v1897_v54, %v1893_v52  ;;  %1588 = vadd.xlane.f32.xlu1 %v1360_v4  ;;  %v1907_v54 = vrot.slane %v6655_v10, %v6538_v59  ;;  %v1368_v4 = vmul.f32 %v6573_v33, %v5566_v43  ;;  %v1363_v10 = vmul.f32 %v6573_v33, %v5568_v28 }
 0x251   : > { %1512 = vadd.xlane.f32.xlu0 %v1322_v0  ;;  %v1455_v63 = vpop.xlane.xlu1 %1454  ;;  %v1912_v0 = vrot.slane %v6672_v8, %v6541_v60  ;;  %v5572_v8 = vpop.eup %5571  ;;  %5585 = vtanh.f32 %v1112_v51  ;;  %v2129_v43 = vrot.slane %v6663_v14, %v6519_v37 }
 0x252   : > { %v1971_v24 = vrot.slane %v1455_v63, %v6519_v37  ;;  %v6704_v25 = vpop.xlane.xlu0 %1464  ;;  %v1364_v47 = vmul.f32 %v6573_v33, %v5572_v8 }
 0x253   : > { %v1996_v8 = vrot.slane %v6704_v25, %v6577_v35  ;;  %v891_v25 = vld [vmem:[#allocation7 + $0x380] sm:$0xff] }
 0x254   : > { %v1972_v18 = vsel %vm1785_vm1, %v1971_v24, %v1967_v29  ;;  %1590 = vadd.xlane.f32.xlu1 %v1361_v27  ;;  %v1060_v24 = vadd.f32 %v6426_v56, %v842_v58  ;;  %v872_v27 = vld [vmem:[#allocation7 + $0x2e8] sm:$0xff] }
 0x255   : > { %1572 = vadd.xlane.f32.xlu0 %v1352_v40  ;;  %v1427_v3 = vpop.xlane.xlu1 %1426  ;;  %v6713_v48 = vsel %vm7348_vm2, %v1976_v36, %v1972_v18  ;;  %v5574_v36 = vpop.eup %5573  ;;  %v896_v40 = vld [vmem:[#allocation7 + $0x3a8] sm:$0xff]  ;;  %v1090_v19 = vadd.f32 %v6449_v31, %v872_v27 }
 0x256   : > { %v1902_v50 = vrot.slane %v1427_v3, %v6551_v5  ;;  %v6716_v52 = vpop.xlane.xlu0 %1524  ;;  %5587 = vtanh.f32 %v1060_v24  ;;  %v873_v3 = vld [vmem:[#allocation7 + $0x2f0] sm:$0xff]  ;;  %v1355_v53 = vmul.f32 %v6573_v33, %v5574_v36  ;;  %v1114_v28 = vadd.f32 %v6687_v44, %v896_v40 }
 0x257   : > { %5589 = vtanh.f32 %v1113_v30  ;;  %v1091_v58 = vadd.f32 %v6449_v31, %v873_v3  ;;  %v898_v30 = vld [vmem:[#allocation7 + $0x3b8] sm:$0xff] }
 0x258   : > { %v1903_v6 = vsel %vm1799_vm3, %v1902_v50, %v1898_v12  ;;  %1592 = vadd.xlane.f32.xlu1 %v1362_v9  ;;  %v1369_v12 = vmul.f32 %v6573_v33, %v5570_v61  ;;  %v5576_v50 = vpop.eup %5575  ;;  %5591 = vtanh.f32 %v1090_v19 }
 0x259   : > { %v1908_v13 = vsel %vm1806_vm4, %v1907_v54, %v1903_v6  ;;  %1604 = vadd.xlane.f32.xlu0 %v1368_v4  ;;  %v1459_v63 = vpop.xlane.xlu1 %1458  ;;  %v897_v54 = vld [vmem:[#allocation7 + $0x3b0] sm:$0xff]  ;;  %v5578_v4 = vpop.eup %5577  ;;  %v1365_v6 = vmul.f32 %v6573_v33, %v5576_v50  ;;  %5593 = vtanh.f32 %v1114_v28  ;;  %v1116_v50 = vadd.f32 %v6687_v44, %v898_v30 }
 0x25a   : > { %v6728_v21 = vpop.xlane.xlu0 %1436  ;;  %v6732_v29 = vsel %vm1813_vm5, %v1912_v0, %v1908_v13  ;;  %v1981_v9 = vrot.slane %v1459_v63, %v6551_v5  ;;  %v1115_v57 = vadd.f32 %v6687_v44, %v897_v54  ;;  %v889_v13 = vld [vmem:[#allocation7 + $0x370] sm:$0xff]  ;;  %v5580_v63 = vpop.eup %5579  ;;  %v1373_v27 = vmul.f32 %v6573_v33, %v5578_v4  ;;  %v899_v54 = vld [vmem:[#allocation7 + $0x3c0] sm:$0xff] }
 0x25b   : > { %v5582_v31 = vpop.eup %5581  ;;  %v1366_v19 = vmul.f32 %v6573_v33, %v5580_v63  ;;  %5595 = vtanh.f32 %v1091_v58  ;;  %v1109_v58 = vadd.f32 %v6687_v44, %v891_v25  ;;  %v1117_v63 = vadd.f32 %v6687_v44, %v899_v54 }
 0x25c   : > { %1594 = vadd.xlane.f32.xlu1 %v1363_v10  ;;  %v1991_v10 = vrot.slane %v6683_v42, %v6541_v60  ;;  %v1982_v24 = vsel %vm1799_vm3, %v1981_v9, %v6713_v48  ;;  %v1107_v42 = vadd.f32 %v6456_v39, %v889_v13  ;;  %v1374_v3 = vmul.f32 %v6573_v33, %v5582_v31 }
 0x25d   : > { %1606 = vadd.xlane.f32.xlu0 %v1369_v12  ;;  %v1517_v41 = vpop.xlane.xlu1 %1516  ;;  %5597 = vtanh.f32 %v1115_v57 }
 0x25e   : > { %v6740_v18 = vpop.xlane.xlu0 %1438  ;;  %v2125_v56 = vrot.slane %v1517_v41, %v6513_v32  ;;  %5599 = vtanh.f32 %v1107_v42  ;;  %v902_v42 = vld [vmem:[#allocation7 + $0x3d8] sm:$0xff] }
 0x25f   : > { %5601 = vtanh.f32 %v1116_v50 }
 0x260   : > { %v2130_v14 = vsel %vm1785_vm1, %v2129_v43, %v2125_v56  ;;  %1596 = vadd.xlane.f32.xlu1 %v1364_v47  ;;  %v5584_v56 = vpop.eup %5583  ;;  %v2139_v47 = vrot.slane %v6693_v55, %v6551_v5  ;;  %5603 = vtanh.f32 %v1109_v58 }
 0x261   : > { %1578 = vadd.xlane.f32.xlu0 %v1355_v53  ;;  %v1461_v51 = vpop.xlane.xlu1 %1460  ;;  %v5586_v9 = vpop.eup %5585  ;;  %v2144_v53 = vrot.slane %v6716_v52, %v6538_v59  ;;  %v890_v52 = vld [vmem:[#allocation7 + $0x378] sm:$0xff]  ;;  %5605 = vtanh.f32 %v1117_v63 }
 0x262   : > { %v6749_v61 = vpop.xlane.xlu0 %1440  ;;  %v1986_v0 = vrot.slane %v1461_v51, %v6538_v59 }
 0x263   : > { %v5588_v13 = vpop.eup %5587  ;;  %v1937_v50 = vrot.slane %v6749_v61, %v6568_v46 }
 0x264   : > { %v1987_v12 = vsel %vm1806_vm4, %v1986_v0, %v1982_v24  ;;  %1598 = vadd.xlane.f32.xlu1 %v1365_v6  ;;  %v1367_v6 = vmul.f32 %v6573_v33, %v5584_v56 }
 0x265   : > { %v1992_v36 = vsel %vm1813_vm5, %v1991_v10, %v1987_v12  ;;  %1614 = vadd.xlane.f32.xlu0 %v1373_v27  ;;  %v1521_v40 = vpop.xlane.xlu1 %1520  ;;  %v5590_v10 = vpop.eup %5589  ;;  %v900_v27 = vld [vmem:[#allocation7 + $0x3c8] sm:$0xff]  ;;  %v901_v12 = vld [vmem:[#allocation7 + $0x3d0] sm:$0xff] }
 0x266   : > { %v6764_v41 = vpop.xlane.xlu0 %1442  ;;  %v2134_v48 = vrot.slane %v1521_v40, %v6528_v26  ;;  %v6769_v43 = vsel %vm1820_vm6, %v1996_v8, %v1992_v36  ;;  %v1108_v8 = vadd.f32 %v6456_v39, %v890_v52  ;;  %v1323_v40 = vmul.f32 %v6573_v33, %v5588_v13 }
 0x267   : > { %v1118_v25 = vadd.f32 %v6687_v44, %v900_v27  ;;  %v1932_v39 = vrot.slane %v6740_v18, %v6561_v23  ;;  %v1942_v54 = vrot.slane %v6764_v41, %v6603_v7 }
 0x268   : > { %v2135_v28 = vsel %vm7348_vm2, %v2134_v48, %v2130_v14  ;;  %1600 = vadd.xlane.f32.xlu1 %v1366_v19  ;;  %v1375_v14 = vmul.f32 %v6573_v33, %v5586_v9  ;;  %v5592_v48 = vpop.eup %5591  ;;  %v1927_v19 = vrot.slane %v6728_v21, %v6546_v1  ;;  %5607 = vtanh.f32 %v1108_v8 }
 0x269   : > { %v2140_v4 = vsel %vm1799_vm3, %v2139_v47, %v2135_v28  ;;  %1616 = vadd.xlane.f32.xlu0 %v1374_v3  ;;  %v1433_v51 = vpop.xlane.xlu1 %1432  ;;  %v5594_v56 = vpop.eup %5593  ;;  %v1119_v3 = vadd.f32 %v6687_v44, %v901_v12  ;;  %v904_v28 = vld [vmem:[#allocation7 + $0x3e8] sm:$0xff]  ;;  %v1353_v58 = vmul.f32 %v6573_v33, %v5592_v48  ;;  %5609 = vtanh.f32 %v1118_v25 }
 0x26a   : > { %v1445_v55 = vpop.xlane.xlu0 %1444  ;;  %v1917_v0 = vrot.slane %v1433_v51, %v6577_v35  ;;  %v6783_v57 = vsel %vm1806_vm4, %v2144_v53, %v2140_v4  ;;  %v1120_v53 = vadd.f32 %v6687_v44, %v902_v42  ;;  %v5596_v61 = vpop.eup %5595  ;;  %v1377_v13 = vmul.f32 %v6573_v33, %v5594_v56 }
 0x26c   : > { %v1918_v24 = vsel %vm1820_vm6, %v1917_v0, %v6732_v29  ;;  %1602 = vadd.xlane.f32.xlu1 %v1367_v6  ;;  %v1376_v29 = vmul.f32 %v6573_v33, %v5590_v10  ;;  %v903_v0 = vld [vmem:[#allocation7 + $0x3e0] sm:$0xff]  ;;  %v1947_v6 = vrot.slane %v1445_v55, %v6610_v22  ;;  %5611 = vtanh.f32 %v1120_v53 }
 0x26d   : > { %1618 = vadd.xlane.f32.xlu0 %v1375_v14  ;;  %v1435_v31 = vpop.xlane.xlu1 %1434  ;;  %v5598_v14 = vpop.eup %5597  ;;  %v1121_v8 = vadd.f32 %v6687_v44, %v903_v0  ;;  %5613 = vtanh.f32 %v1119_v3 }
 0x26e   : > { %v1447_v30 = vpop.xlane.xlu0 %1446  ;;  %v1922_v36 = vrot.slane %v1435_v31, %v6587_v49  ;;  %v5600_v42 = vpop.eup %5599 }
 0x26f   : > { %v1952_v63 = vrot.slane %v1447_v30, %v6618_v38  ;;  %v5602_v25 = vpop.eup %5601  ;;  %5615 = vtanh.f32 %v1121_v8 }
 0x270   : > { %v1923_v47 = vsel %vm1827_vm7, %v1922_v36, %v1918_v24  ;;  %1514 = vadd.xlane.f32.xlu1 %v1323_v40  ;;  %v1122_v24 = vadd.f32 %v6687_v44, %v904_v28  ;;  %v1354_v40 = vmul.f32 %v6573_v33, %v5596_v61  ;;  %v1370_v28 = vmul.f32 %v6573_v33, %v5600_v42 }
 0x271   : > { %v1928_v9 = vsel %vm1834_vm8, %v1927_v19, %v1923_v47  ;;  %1620 = vadd.xlane.f32.xlu0 %v1376_v29  ;;  %v1467_v21 = vpop.xlane.xlu1 %1466  ;;  %v1378_v29 = vmul.f32 %v6573_v33, %v5598_v14 }
 0x272   : > { %v1933_v18 = vsel %vm1841_vm9, %v1932_v39, %v1928_v9  ;;  %v1449_v4 = vpop.xlane.xlu0 %1448  ;;  %v2001_v51 = vrot.slane %v1467_v21, %v6587_v49  ;;  %v905_v39 = vld [vmem:[#allocation7 + $0x3f0] sm:$0xff]  ;;  %5617 = vtanh.f32 %v1122_v24 }
 0x273   : > { %v1938_v52 = vsel %vm1848_vm10, %v1937_v50, %v1933_v18  ;;  %v1957_v55 = vrot.slane %v1449_v4, %v6639_v62  ;;  %v1123_v18 = vadd.f32 %v6687_v44, %v905_v39 }
 0x274   : > { %v1943_v41 = vsel %vm1855_vm11, %v1942_v54, %v1938_v52  ;;  %v2002_v10 = vsel %vm1827_vm7, %v2001_v51, %v6769_v43  ;;  %1574 = vadd.xlane.f32.xlu1 %v1353_v58  ;;  %v906_v43 = vld [vmem:[#allocation7 + $0x3f8] sm:$0xff]  ;;  %v1379_v54 = vmul.f32 %v6573_v33, %v5602_v25 }
 0x275   : > { %v1948_v27 = vsel %vm1862_vm12, %v1947_v6, %v1943_v41  ;;  %1622 = vadd.xlane.f32.xlu0 %v1377_v13  ;;  %v1527_v31 = vpop.xlane.xlu1 %1526  ;;  %v1124_v9 = vadd.f32 %v6687_v44, %v906_v43 }
 0x276   : > { %v1953_v12 = vsel %vm1869_vm13, %v1952_v63, %v1948_v27  ;;  %v1451_v30 = vpop.xlane.xlu0 %1450  ;;  %v2149_v36 = vrot.slane %v1527_v31, %v6541_v60 }
 0x277   : > { %v1958_v48 = vsel %vm1876_vm14, %v1957_v55, %v1953_v12  ;;  %v1962_v19 = vrot.slane %v1451_v30, %v6652_v34  ;;  %5619 = vtanh.f32 %v1124_v9 }
 0x278   : > { %v2150_v56 = vsel %vm1813_vm5, %v2149_v36, %v6783_v57  ;;  %1576 = vadd.xlane.f32.xlu1 %v1354_v40  ;;  %v5604_v57 = vpop.eup %5603  ;;  %5621 = vtanh.f32 %v1123_v18 }
 0x279   : > { %v1963_v47 = vsel %vm1883_vm15, %v1962_v19, %v1958_v48  ;;  %1624 = vadd.xlane.f32.xlu0 %v1378_v29  ;;  %v1469_v50 = vpop.xlane.xlu1 %1468  ;;  %v5606_v4 = vpop.eup %5605  ;;  %v1372_v6 = vmul.f32 %v6573_v33, %v5604_v57 }
 0x27a   : > { %v6832_v21 = vsel %vm7346_vm0, %v1963_v47, %v6670_v45  ;;  %v6834_v53 = vpop.xlane.xlu0 %1544  ;;  %v2006_v3 = vrot.slane %v1469_v50, %v6546_v1  ;;  %v5608_v58 = vpop.eup %5607  ;;  %v1380_v52 = vmul.f32 %v6573_v33, %v5606_v4  ;;  %vm7347_vm0 = vcmask 1042434  }
 0x27b   : > { %v5610_v13 = vpop.eup %5609 }
 0x27c   : > { %v2007_v51 = vsel %vm1834_vm8, %v2006_v3, %v2002_v10  ;;  %1608 = vadd.xlane.f32.xlu1 %v1370_v28  ;;  %v1371_v10 = vmul.f32 %v6573_v33, %v5608_v58  ;;  %v5612_v24 = vpop.eup %5611  ;;  %v1381_v27 = vmul.f32 %v6573_v33, %v5610_v13 }
 0x27d   : > { %1626 = vadd.xlane.f32.xlu0 %v1379_v54  ;;  %v1529_v45 = vpop.xlane.xlu1 %1528  ;;  %v5614_v55 = vpop.eup %5613  ;;  %v1383_v36 = vmul.f32 %v6573_v33, %v5612_v24 }
 0x27e   : > { %v6841_v0 = vpop.xlane.xlu0 %1546  ;;  %v2154_v61 = vrot.slane %v1529_v45, %v6577_v35  ;;  %v5616_v40 = vpop.eup %5615  ;;  %v1382_v43 = vmul.f32 %v6573_v33, %v5614_v55 }
 0x27f   : > { %v5618_v42 = vpop.eup %5617 }
 0x280   : > { %v2155_v44 = vsel %vm1820_vm6, %v2154_v61, %v2150_v56  ;;  %1612 = vadd.xlane.f32.xlu1 %v1372_v6  ;;  %v1384_v56 = vmul.f32 %v6573_v33, %v5616_v40  ;;  %v1385_v47 = vmul.f32 %v6573_v33, %v5618_v42 }
 0x281   : > { %1628 = vadd.xlane.f32.xlu0 %v1380_v52  ;;  %v1471_v14 = vpop.xlane.xlu1 %1470 }
 0x282   : > { %v6847_v63 = vpop.xlane.xlu0 %1486  ;;  %v2011_v41 = vrot.slane %v1471_v14, %v6561_v23 }
 0x284   : > { %v2012_v31 = vsel %vm1841_vm9, %v2011_v41, %v2007_v51  ;;  %1610 = vadd.xlane.f32.xlu1 %v1371_v10  ;;  %v5620_v39 = vpop.eup %5619 }
 0x285   : > { %1630 = vadd.xlane.f32.xlu0 %v1381_v27  ;;  %v1531_v8 = vpop.xlane.xlu1 %1530  ;;  %v5622_v50 = vpop.eup %5621  ;;  %v1387_v54 = vmul.f32 %v6573_v33, %v5620_v39 }
 0x286   : > { %v6853_v12 = vpop.xlane.xlu0 %1488  ;;  %v2159_v30 = vrot.slane %v1531_v8, %v6587_v49  ;;  %v1386_v18 = vmul.f32 %v6573_v33, %v5622_v50 }
 0x288   : > { %v2160_v48 = vsel %vm1827_vm7, %v2159_v30, %v2155_v44  ;;  %1634 = vadd.xlane.f32.xlu1 %v1383_v36 }
 0x289   : > { %1632 = vadd.xlane.f32.xlu0 %v1382_v43  ;;  %v1473_v19 = vpop.xlane.xlu1 %1472 }
 0x28a   : > { %v6859_v29 = vpop.xlane.xlu0 %1490  ;;  %v2016_v25 = vrot.slane %v1473_v19, %v6568_v46 }
 0x28c   : > { %v2017_v9 = vsel %vm1848_vm10, %v2016_v25, %v2012_v31  ;;  %1636 = vadd.xlane.f32.xlu1 %v1384_v56 }
 0x28d   : > { %1638 = vadd.xlane.f32.xlu0 %v1385_v47  ;;  %v1533_v3 = vpop.xlane.xlu1 %1532 }
 0x28e   : > { %v2164_v28 = vrot.slane %v1533_v3, %v6546_v1  ;;  %v6866_v57 = vpop.xlane.xlu0 %1548 }
 0x290   : > { %v2165_v4 = vsel %vm1834_vm8, %v2164_v28, %v2160_v48  ;;  %1642 = vadd.xlane.f32.xlu1 %v1387_v54 }
 0x291   : > { %1640 = vadd.xlane.f32.xlu0 %v1386_v18  ;;  %v1475_v51 = vpop.xlane.xlu1 %1474 }
 0x292   : > { %v2021_v45 = vrot.slane %v1475_v51, %v6603_v7  ;;  %v6872_v58 = vpop.xlane.xlu0 %1580 }
 0x294   : > { %v2022_v61 = vsel %vm1855_vm11, %v2021_v45, %v2017_v9 }
 0x295   : > { %v1535_v6 = vpop.xlane.xlu1 %1534 }
 0x296   : > { %v2169_v52 = vrot.slane %v1535_v6, %v6561_v23  ;;  %v6876_v13 = vpop.xlane.xlu0 %1584 }
 0x298   : > { %v2170_v44 = vsel %vm1841_vm9, %v2169_v52, %v2165_v4 }
 0x299   : > { %v1477_v14 = vpop.xlane.xlu1 %1476 }
 0x29a   : > { %v2026_v33 = vrot.slane %v1477_v14, %v6610_v22  ;;  %v6880_v41 = vpop.xlane.xlu0 %1496  ;;  %v2199_v14 = vrot.slane %v6841_v0, %v6652_v34  ;;  %v2060_v0 = vrot.slane %v6859_v29, %v6551_v5 }
 0x29c   : > { %v2027_v10 = vsel %vm1862_vm12, %v2026_v33, %v2022_v61 }
 0x29d   : > { %v1537_v24 = vpop.xlane.xlu1 %1536 }
 0x29e   : > { %v2174_v27 = vrot.slane %v1537_v24, %v6568_v46  ;;  %v6884_v55 = vpop.xlane.xlu0 %1556 }
 0x2a0   : > { %v2175_v31 = vsel %vm1848_vm10, %v2174_v27, %v2170_v44  ;;  %v2194_v44 = vrot.slane %v6834_v53, %v6639_v62  ;;  %v2055_v53 = vrot.slane %v6853_v12, %v6528_v26 }
 0x2a1   : > { %v1479_v8 = vpop.xlane.xlu1 %1478 }
 0x2a2   : > { %v2031_v30 = vrot.slane %v1479_v8, %v6618_v38  ;;  %v6888_v36 = vpop.xlane.xlu0 %1498 }
 0x2a4   : > { %v2032_v40 = vsel %vm1869_vm13, %v2031_v30, %v2027_v10 }
 0x2a5   : > { %v1539_v43 = vpop.xlane.xlu1 %1538 }
 0x2a6   : > { %v2179_v42 = vrot.slane %v1539_v43, %v6603_v7  ;;  %v6892_v48 = vpop.xlane.xlu0 %1558 }
 0x2a8   : > { %v2180_v19 = vsel %vm1855_vm11, %v2179_v42, %v2175_v31 }
 0x2a9   : > { %v1481_v25 = vpop.xlane.xlu1 %1480 }
 0x2aa   : > { %v2036_v56 = vrot.slane %v1481_v25, %v6639_v62  ;;  %v6896_v39 = vpop.xlane.xlu0 %1500 }
 0x2ac   : > { %v2037_v47 = vsel %vm1876_vm14, %v2036_v56, %v2032_v40 }
 0x2ad   : > { %v1541_v50 = vpop.xlane.xlu1 %1540 }
 0x2ae   : > { %v2184_v9 = vrot.slane %v1541_v50, %v6610_v22  ;;  %v6900_v3 = vpop.xlane.xlu0 %1560 }
 0x2b0   : > { %v2185_v28 = vsel %vm1862_vm12, %v2184_v9, %v2180_v19 }
 0x2b1   : > { %v1483_v54 = vpop.xlane.xlu1 %1482 }
 0x2b2   : > { %v2041_v18 = vrot.slane %v1483_v54, %v6652_v34  ;;  %v1503_v4 = vpop.xlane.xlu0 %1502 }
 0x2b4   : > { %v2042_v51 = vsel %vm1883_vm15, %v2041_v18, %v2037_v47 }
 0x2b5   : > { %v6907_v45 = vsel %vm7347_vm0, %v2042_v51, %v6832_v21  ;;  %v1543_v61 = vpop.xlane.xlu1 %1542  ;;  %v2050_v21 = vrot.slane %v6847_v63, %v6519_v37  ;;  %v2204_v63 = vrot.slane %v6866_v57, %v6513_v32  ;;  %v2283_v51 = vrot.slane %v6872_v58, %v6513_v32 }
 0x2b6   : > { %v2189_v6 = vrot.slane %v1543_v61, %v6618_v38  ;;  %v6910_v52 = vpop.xlane.xlu0 %1562  ;;  %v2080_v58 = vrot.slane %v6888_v36, %v6587_v49  ;;  %vm7349_vm0 = vcmask 1043459  }
 0x2b8   : > { %v2190_v33 = vsel %vm1869_vm13, %v2189_v6, %v2185_v28 }
 0x2b9   : > { %v2195_v10 = vsel %vm1876_vm14, %v2194_v44, %v2190_v33  ;;  %v1485_v24 = vpop.xlane.xlu1 %1484  ;;  %v2292_v44 = vrot.slane %v6876_v13, %v6528_v26  ;;  %v2085_v13 = vrot.slane %v6896_v39, %v6546_v1  ;;  %v2228_v39 = vrot.slane %v6892_v48, %v6541_v60 }
 0x2ba   : > { %v6921_v27 = vsel %vm1883_vm15, %v2199_v14, %v2195_v10  ;;  %v2046_v31 = vrot.slane %v1485_v24, %v6513_v32  ;;  %v1505_v8 = vpop.xlane.xlu0 %1504 }
 0x2bb   : > { %v2095_v36 = vrot.slane %v1505_v8, %v6568_v46 }
 0x2bc   : > { %v2051_v30 = vsel %vm1785_vm1, %v2050_v21, %v2046_v31  ;;  %v2075_v31 = vrot.slane %v6880_v41, %v6577_v35  ;;  %v2223_v41 = vrot.slane %v6884_v55, %v6538_v59 }
 0x2bd   : > { %v2056_v40 = vsel %vm7348_vm2, %v2055_v53, %v2051_v30  ;;  %v1551_v43 = vpop.xlane.xlu1 %1550 }
 0x2be   : > { %v2208_v42 = vrot.slane %v1551_v43, %v6519_v37  ;;  %v1565_v19 = vpop.xlane.xlu0 %1564  ;;  %v2061_v25 = vsel %vm1799_vm3, %v2060_v0, %v2056_v40  ;;  %v2090_v40 = vrot.slane %v1503_v4, %v6561_v23 }
 0x2c0   : > { %v2209_v56 = vsel %vm1785_vm1, %v2208_v42, %v2204_v63 }
 0x2c1   : > { %v1493_v47 = vpop.xlane.xlu1 %1492 }
 0x2c2   : > { %v2065_v12 = vrot.slane %v1493_v47, %v6538_v59  ;;  %v1507_v50 = vpop.xlane.xlu0 %1506 }
 0x2c4   : > { %v2066_v29 = vsel %vm1806_vm4, %v2065_v12, %v2061_v25  ;;  %v2233_v12 = vrot.slane %v6900_v3, %v6577_v35 }
 0x2c5   : > { %v1553_v9 = vpop.xlane.xlu1 %1552 }
 0x2c6   : > { %v2213_v28 = vrot.slane %v1553_v9, %v6528_v26  ;;  %v1567_v54 = vpop.xlane.xlu0 %1566 }
 0x2c8   : > { %v2214_v18 = vsel %vm7348_vm2, %v2213_v28, %v2209_v56  ;;  %v2100_v56 = vrot.slane %v1507_v50, %v6603_v7  ;;  %v2238_v28 = vrot.slane %v6910_v52, %v6587_v49 }
 0x2c9   : > { %v1583_v57 = vpop.xlane.xlu1 %1582 }
 0x2ca   : > { %v2287_v61 = vrot.slane %v1583_v57, %v6519_v37  ;;  %v1509_v6 = vpop.xlane.xlu0 %1508 }
 0x2cc   : > { %v2288_v14 = vsel %vm1785_vm1, %v2287_v61, %v2283_v51  ;;  %v2243_v51 = vrot.slane %v1565_v19, %v6546_v1 }
 0x2cd   : > { %v1495_v33 = vpop.xlane.xlu1 %1494  ;;  %v6946_v10 = vsel %vm7348_vm2, %v2292_v44, %v2288_v14  ;;  %vm7351_vm2 = vcmask 1044484  }
 0x2ce   : > { %v2070_v24 = vrot.slane %v1495_v33, %v6541_v60  ;;  %v1569_v21 = vpop.xlane.xlu0 %1568 }
 0x2cf   : > { %v2253_v52 = vrot.slane %v1569_v21, %v6568_v46 }
 0x2d0   : > { %v2071_v53 = vsel %vm1813_vm5, %v2070_v24, %v2066_v29  ;;  %v2105_v29 = vrot.slane %v1509_v6, %v6610_v22  ;;  %v2248_v6 = vrot.slane %v1567_v54, %v6561_v23 }
 0x2d1   : > { %v2076_v0 = vsel %vm1820_vm6, %v2075_v31, %v2071_v53  ;;  %v1555_v30 = vpop.xlane.xlu1 %1554 }
 0x2d2   : > { %v2081_v43 = vsel %vm1827_vm7, %v2080_v58, %v2076_v0  ;;  %v2218_v63 = vrot.slane %v1555_v30, %v6551_v5  ;;  %v1511_v42 = vpop.xlane.xlu0 %1510 }
 0x2d3   : > { %v2086_v25 = vsel %vm1834_vm8, %v2085_v13, %v2081_v43 }
 0x2d4   : > { %v2219_v47 = vsel %vm1799_vm3, %v2218_v63, %v2214_v18  ;;  %v2091_v4 = vsel %vm1841_vm9, %v2090_v40, %v2086_v25  ;;  %v2110_v18 = vrot.slane %v1511_v42, %v6618_v38 }
 0x2d5   : > { %v2224_v55 = vsel %vm1806_vm4, %v2223_v41, %v2219_v47  ;;  %v2096_v8 = vsel %vm1848_vm10, %v2095_v36, %v2091_v4  ;;  %v1587_v9 = vpop.xlane.xlu1 %1586 }
 0x2d6   : > { %v2229_v48 = vsel %vm1813_vm5, %v2228_v39, %v2224_v55  ;;  %v2101_v50 = vsel %vm1855_vm11, %v2100_v56, %v2096_v8  ;;  %v1571_v57 = vpop.xlane.xlu0 %1570  ;;  %v2297_v55 = vrot.slane %v1587_v9, %v6551_v5 }
 0x2d7   : > { %v2234_v3 = vsel %vm1820_vm6, %v2233_v12, %v2229_v48  ;;  %v2106_v61 = vsel %vm1862_vm12, %v2105_v29, %v2101_v50 }
 0x2d8   : > { %v2111_v44 = vsel %vm1869_vm13, %v2110_v18, %v2106_v61  ;;  %v2239_v14 = vsel %vm1827_vm7, %v2238_v28, %v2234_v3 }
 0x2d9   : > { %v2244_v33 = vsel %vm1834_vm8, %v2243_v51, %v2239_v14  ;;  %v1589_v24 = vpop.xlane.xlu1 %1588  ;;  %v2298_v14 = vsel %vm1799_vm3, %v2297_v55, %v6946_v10 }
 0x2da   : > { %v2249_v31 = vsel %vm1841_vm9, %v2248_v6, %v2244_v33  ;;  %v1513_v58 = vpop.xlane.xlu0 %1512  ;;  %v2302_v28 = vrot.slane %v1589_v24, %v6538_v59  ;;  %v2258_v6 = vrot.slane %v1571_v57, %v6603_v7 }
 0x2db   : > { %v2254_v19 = vsel %vm1848_vm10, %v2253_v52, %v2249_v31  ;;  %v2115_v56 = vrot.slane %v1513_v58, %v6639_v62 }
 0x2dc   : > { %v2259_v52 = vsel %vm1855_vm11, %v2258_v6, %v2254_v19  ;;  %v2303_v33 = vsel %vm1806_vm4, %v2302_v28, %v2298_v14 }
 0x2dd   : > { %v1591_v53 = vpop.xlane.xlu1 %1590  ;;  %v2116_v29 = vsel %vm1876_vm14, %v2115_v56, %v2111_v44 }
 0x2de   : > { %v1573_v13 = vpop.xlane.xlu0 %1572  ;;  %v2307_v18 = vrot.slane %v1591_v53, %v6541_v60 }
 0x2df   : > { %v2263_v51 = vrot.slane %v1573_v13, %v6610_v22 }
 0x2e1   : > { %v1593_v0 = vpop.xlane.xlu1 %1592  ;;  %v2264_v57 = vsel %vm1862_vm12, %v2263_v51, %v2259_v52 }
 0x2e2   : > { %v6989_v30 = vpop.xlane.xlu0 %1604  ;;  %v2312_v9 = vrot.slane %v1593_v0, %v6577_v35 }
 0x2e5   : > { %v1595_v54 = vpop.xlane.xlu1 %1594 }
 0x2e6   : > { %v6991_v40 = vpop.xlane.xlu0 %1606 }
 0x2e9   : > { %v1597_v43 = vpop.xlane.xlu1 %1596 }
 0x2ea   : > { %v1579_v63 = vpop.xlane.xlu0 %1578  ;;  %v2322_v24 = vrot.slane %v1597_v43, %v6546_v1 }
 0x2eb   : > { %v2278_v0 = vrot.slane %v1579_v63, %v6652_v34 }
 0x2ed   : > { %v1599_v42 = vpop.xlane.xlu1 %1598 }
 0x2ee   : > { %v6993_v21 = vpop.xlane.xlu0 %1614  ;;  %v2327_v58 = vrot.slane %v1599_v42, %v6561_v23 }
 0x2f1   : > { %v1601_v41 = vpop.xlane.xlu1 %1600 }
 0x2f2   : > { %v6995_v36 = vpop.xlane.xlu0 %1616  ;;  %v2332_v19 = vrot.slane %v1601_v41, %v6568_v46 }
 0x2f3   : > { %v2371_v6 = vrot.slane %v6995_v36, %v6528_v26 }
 0x2f5   : > { %v1603_v25 = vpop.xlane.xlu1 %1602 }
 0x2f6   : > { %v6997_v39 = vpop.xlane.xlu0 %1618  ;;  %v2337_v56 = vrot.slane %v1603_v25, %v6603_v7 }
 0x2f9   : > { %v1515_v47 = vpop.xlane.xlu1 %1514 }
 0x2fa   : > { %v2120_v4 = vrot.slane %v1515_v47, %v6652_v34  ;;  %v7001_v12 = vpop.xlane.xlu0 %1620 }
 0x2fc   : > { %v2121_v8 = vsel %vm1883_vm15, %v2120_v4, %v2116_v29 }
 0x2fd   : > { %v2443_v48 = vsel %vm7349_vm0, %v2121_v8, %v6907_v45  ;;  %v1575_v50 = vpop.xlane.xlu1 %1574  ;;  %v2317_v45 = vrot.slane %v1595_v54, %v6587_v49  ;;  %vm7350_vm0 = vcmask 1045509  }
 0x2fe   : > { %v1623_v3 = vpop.xlane.xlu0 %1622  ;;  %v2445_v61 = vsel %vm7351_vm2, %v6921_v27, %v2443_v48  ;;  %v2268_v44 = vrot.slane %v1575_v50, %v6618_v38  ;;  %v2308_v27 = vsel %vm1813_vm5, %v2307_v18, %v2303_v33  ;;  %v2342_v48 = vrot.slane %v6989_v30, %v6610_v22 }
 0x2ff   : > { %v2313_v10 = vsel %vm1820_vm6, %v2312_v9, %v2308_v27  ;;  %v2366_v50 = vrot.slane %v6993_v21, %v6519_v37  ;;  %v2376_v30 = vrot.slane %v6997_v39, %v6551_v5  ;;  %v2381_v37 = vrot.slane %v7001_v12, %v6538_v59 }
 0x300   : > { %v2269_v54 = vsel %vm1869_vm13, %v2268_v44, %v2264_v57  ;;  %v2318_v43 = vsel %vm1827_vm7, %v2317_v45, %v2313_v10  ;;  %v2347_v44 = vrot.slane %v6991_v40, %v6618_v38  ;;  %vm2448_vm2 = vcmask 1046534  }
 0x301   : > { %v1577_v31 = vpop.xlane.xlu1 %1576  ;;  %v2323_v4 = vsel %vm1834_vm8, %v2322_v24, %v2318_v43  ;;  %v2386_v26 = vrot.slane %v1623_v3, %v6541_v60 }
 0x302   : > { %v2273_v53 = vrot.slane %v1577_v31, %v6639_v62  ;;  %v1625_v13 = vpop.xlane.xlu0 %1624  ;;  %v2328_v55 = vsel %vm1841_vm9, %v2327_v58, %v2323_v4 }
 0x303   : > { %v2333_v41 = vsel %vm1848_vm10, %v2332_v19, %v2328_v55  ;;  %v2391_v5 = vrot.slane %v1625_v13, %v6577_v35 }
 0x304   : > { %v2274_v47 = vsel %vm1876_vm14, %v2273_v53, %v2269_v54  ;;  %v2338_v28 = vsel %vm1855_vm11, %v2337_v56, %v2333_v41  ;;  %v5192_v41 = vld [vmem:[#allocation4 + $0x78] sm:$0xff]  }
 0x305   : > { %v2279_v42 = vsel %vm1883_vm15, %v2278_v0, %v2274_v47  ;;  %v1609_v29 = vpop.xlane.xlu1 %1608  ;;  %v2343_v9 = vsel %vm1862_vm12, %v2342_v48, %v2338_v28  ;;  %4889 = vmatpush3.bf16.msra.mxu0 %v5192_v41  ;;  %v5194_v28 = vld [vmem:[#allocation4 + $0x70] sm:$0xff]  }
 0x306   : > { %v1627_v8 = vpop.xlane.xlu0 %1626  ;;  %v2447_v63 = vsel %vm7350_vm0, %v2279_v42, %v2445_v61  ;;  %v2352_v61 = vrot.slane %v1609_v29, %v6639_v62  ;;  %vm7385_vm0 = vcmask 195712   ;;  %v2348_v36 = vsel %vm1869_vm13, %v2347_v44, %v2343_v9  ;;  %4890 = vmatprep.subr.bf16.mxu0 %v5996_v2  ;;  %v5199_v9 = vld [vmem:[#allocation4 + $0x18] sm:$0xff]   ;;  %v5201_v44 = vld [vmem:[#allocation4 + $0x10] sm:$0xff]  }
 0x307   : > { %v2396_v59 = vrot.slane %v1627_v8, %v6587_v49  ;;  %v1646_v42 = vstv %s673_s4  ;;  %v5233_v41 = vld [vmem:[#allocation4 + $0x110] sm:$0xff]  }
 0x308   : > { %v2353_v39 = vsel %vm1876_vm14, %v2352_v61, %v2348_v36  ;;  %v5200_v61 = vld [vmem:[#allocation4 + $0x58] sm:$0xff]  }
 0x309   : > { %v1613_v25 = vpop.xlane.xlu1 %1612  ;;  %4891 = vmatpush3.bf16.msra.mxu0 %v5194_v28 }
 0x30a   : > { %v1629_v18 = vpop.xlane.xlu0 %1628  ;;  %v2362_v51 = vrot.slane %v1613_v25, %v6513_v32  ;;  %4892 = vmatprep.subr.bf16.mxu0 %v5996_v2 }
 0x30b   : > { %v2401_v60 = vrot.slane %v1629_v18, %v6546_v1  ;;  %v5196_v18 = vld [vmem:[#allocation4 + $0x68] sm:$0xff]  }
 0x30c   : > { %v2367_v14 = vsel %vm1785_vm1, %v2366_v50, %v2362_v51  ;;  %vm1647_vm1 = vcmp.lt.s32.totalorder %v6501_v15, %v1646_v42  ;;  %v5197_v51 = vld [vmem:[#allocation4 + $0x20] sm:$0xff]   ;;  %v5226_v42 = vld [vmem:[#allocation4 + $0x170] sm:$0xff]  }
 0x30d   : > { %v2372_v32 = vsel %vm7385_vm0, %v2371_v6, %v2367_v14  ;;  %v1611_v21 = vpop.xlane.xlu1 %1610  ;;  %vm2450_vm0 = vcmask 1047559   ;;  %4893 = vmatpush3.bf16.msra.mxu0 %v5196_v18  ;;  %v5198_v6 = vld [vmem:[#allocation4 + $0x60] sm:$0xff]   ;;  %v5203_v14 = vld [vmem:[#allocation4 + $0x8] sm:$0xff]  }
 0x30e   : > { %v2377_v45 = vsel %vm1799_vm3, %v2376_v30, %v2372_v32  ;;  %v1631_v52 = vpop.xlane.xlu0 %1630  ;;  %v2357_v40 = vrot.slane %v1611_v21, %v6652_v34  ;;  %4894 = vmatprep.subr.bf16.mxu0 %v5996_v2  ;;  %v5202_v30 = vld [vmem:[#allocation4 + $0x50] sm:$0xff]   ;;  %v5205_v32 = vld [vmem:[#allocation4] sm:$0xff]   ;;  %vm7386_vm3 = vmmov 0  }
 0x30f   : > { %v2382_v33 = vsel %vm1806_vm4, %v2381_v37, %v2377_v45  ;;  %v2406_v35 = vrot.slane %v1631_v52, %v6561_v23  ;;  %v5204_v37 = vld [vmem:[#allocation4 + $0x48] sm:$0xff]   ;;  %v5206_v21 = vld [vmem:[#allocation4 + $0x40] sm:$0xff]   ;;  %vm7387_vm4 = vcmask 1041409  }
 0x310   : > { %v2387_v12 = vsel %vm1813_vm5, %v2386_v26, %v2382_v33  ;;  %v2358_v24 = vsel %vm1883_vm15, %v2357_v40, %v2353_v39  ;;  %v5207_v39 = vld [vmem:[#allocation4 + $0xb8] sm:$0xff]   ;;  %v5238_v18 = vld [vmem:[#allocation4 + $0x140] sm:$0xff]   ;;  %vm7388_vm5 = vcmask 1042434  }
 0x311   : > { %v2392_v3 = vsel %vm1820_vm6, %v2391_v5, %v2387_v12  ;;  %v1635_v31 = vpop.xlane.xlu1 %1634  ;;  %v2449_v27 = vsel %vm2448_vm2, %v2358_v24, %v2447_v63  ;;  %v5191_v63 = vld [vmem:[#allocation4 + $0x38] sm:$0xff]   ;;  %4895 = vmatpush3.bf16.msra.mxu0 %v5198_v6  ;;  %vm7389_vm6 = vcmask 1043459  }
 0x312   : > { %v2397_v57 = vsel %vm1827_vm7, %v2396_v59, %v2392_v3  ;;  %v1633_v58 = vpop.xlane.xlu0 %1632  ;;  %v2416_v10 = vrot.slane %v1635_v31, %v6603_v7  ;;  %4869 = vmatpush3.bf16.msra.mxu1 %v5191_v63  ;;  %4896 = vmatprep.subr.bf16.mxu0 %v5996_v2  ;;  %v5208_v12 = vld [vmem:[#allocation4 + $0xf8] sm:$0xff]   ;;  %v5210_v3 = vld [vmem:[#allocation4 + $0xf0] sm:$0xff]   ;;  %v5211_v31 = vld [vmem:[#allocation4 + $0xa8] sm:$0xff]   ;;  %vm7390_vm7 = vcmask 1044484  }
 0x313   : > { %v2402_v53 = vsel %vm1834_vm8, %v2401_v60, %v2397_v57  ;;  %v2411_v49 = vrot.slane %v1633_v58, %v6568_v46  ;;  %4870 = vmatprep.subr.bf16.mxu1 %v5996_v2  ;;  %v5209_v60 = vld [vmem:[#allocation4 + $0xb0] sm:$0xff]   ;;  %v5213_v57 = vld [vmem:[#allocation4 + $0xa0] sm:$0xff]   ;;  %v5215_v58 = vld [vmem:[#allocation4 + $0x98] sm:$0xff]   ;;  %vm7391_vm8 = vcmask 1045509  }
 0x314   : > { %v2407_v13 = vsel %vm1841_vm9, %v2406_v35, %v2402_v53  ;;  %v5214_v35 = vld [vmem:[#allocation4 + $0xe0] sm:$0xff]   ;;  %v5216_v53 = vld [vmem:[#allocation4 + $0xd8] sm:$0xff]  }
 0x315   : > { %v2412_v1 = vsel %vm1848_vm10, %v2411_v49, %v2407_v13  ;;  %v1637_v0 = vpop.xlane.xlu1 %1636  ;;  %4897 = vmatpush3.bf16.msra.mxu0 %v5200_v61  ;;  %v5217_v49 = vld [vmem:[#allocation4 + $0x90] sm:$0xff]   ;;  %v5239_v6 = vld [vmem:[#allocation4 + $0x1b8] sm:$0xff]  }
 0x316   : > { %v2417_v19 = vsel %vm1855_vm11, %v2416_v10, %v2412_v1  ;;  %v1639_v54 = vpop.xlane.xlu0 %1638  ;;  %v2421_v43 = vrot.slane %v1637_v0, %v6610_v22  ;;  %4898 = vmatprep.subr.bf16.mxu0 %v5996_v2  ;;  %v5218_v13 = vld [vmem:[#allocation4 + $0xd0] sm:$0xff]   ;;  %v5219_v10 = vld [vmem:[#allocation4 + $0x88] sm:$0xff]   ;;  %v5221_v0 = vld [vmem:[#allocation4 + $0x80] sm:$0xff]  }
 0x317   : > { %v2426_v23 = vrot.slane %v1639_v54, %v6618_v38  ;;  %v5220_v1 = vld [vmem:[#allocation4 + $0xc8] sm:$0xff]   ;;  %v5222_v54 = vld [vmem:[#allocation4 + $0xc0] sm:$0xff]   ;;  %v5240_v61 = vld [vmem:[#allocation4 + $0x1f8] sm:$0xff]  }
 0x318   : > { %v2422_v56 = vsel %vm1862_vm12, %v2421_v43, %v2417_v19 }
 0x319   : > { %v1643_v47 = vpop.xlane.xlu1 %1642  ;;  %v2427_v7 = vsel %vm1869_vm13, %v2426_v23, %v2422_v56  ;;  %4899 = vmatpush3.bf16.msra.mxu0 %v5202_v30  ;;  %v5223_v23 = vld [vmem:[#allocation4 + $0x138] sm:$0xff]   ;;  %v5241_v30 = vld [vmem:[#allocation4 + $0x1b0] sm:$0xff]  }
 0x31a   : > { %v1641_v4 = vpop.xlane.xlu0 %1640  ;;  %v2436_v46 = vrot.slane %v1643_v47, %v6652_v34  ;;  %v5193_v34 = vld [vmem:[#allocation4 + $0x30] sm:$0xff]   ;;  %4900 = vmatprep.subr.bf16.mxu0 %v5996_v2  ;;  %v5224_v47 = vld [vmem:[#allocation4 + $0x178] sm:$0xff]  }
 0x31b   : > { %v2431_v29 = vrot.slane %v1641_v4, %v6639_v62  ;;  %4871 = vmatpush3.bf16.msra.mxu1 %v5193_v34  ;;  %v5195_v62 = vld [vmem:[#allocation4 + $0x28] sm:$0xff]   ;;  %v5234_v34 = vld [vmem:[#allocation4 + $0x150] sm:$0xff]  }
 0x31c   : > { %4872 = vmatprep.subr.bf16.mxu1 %v5996_v2 }
 0x31d   : > { %v2432_v55 = vsel %vm1876_vm14, %v2431_v29, %v2427_v7  ;;  %4901 = vmatpush3.bf16.msra.mxu0 %v5204_v37  ;;  %v5227_v29 = vld [vmem:[#allocation4 + $0x128] sm:$0xff]  }
 0x31e   : > { %v2437_v22 = vsel %vm1883_vm15, %v2436_v46, %v2432_v55  ;;  %4902 = vmatprep.subr.bf16.mxu0 %v5996_v2  ;;  %v5225_v46 = vld [vmem:[#allocation4 + $0x130] sm:$0xff]   ;;  %v5228_v7 = vld [vmem:[#allocation4 + $0x168] sm:$0xff]   ;;  %v5229_v55 = vld [vmem:[#allocation4 + $0x120] sm:$0xff]  }
 0x31f   : > { %v2451_v38 = vsel %vm2450_vm0, %v2437_v22, %v2449_v27  ;;  %4873 = vmatpush3.bf16.msra.mxu1 %v5195_v62  ;;  %v5212_v27 = vld [vmem:[#allocation4 + $0xe8] sm:$0xff]   ;;  %v5230_v22 = vld [vmem:[#allocation4 + $0x160] sm:$0xff]  }
 0x320   : > { %v2453_v8 = vsel %vm1647_vm1, %v2451_v38, -1e+30  ;;  %4874 = vmatprep.subr.bf16.mxu1 %v5996_v2  ;;  %v5231_v38 = vld [vmem:[#allocation4 + $0x118] sm:$0xff]   ;;  %v5235_v62 = vld [vmem:[#allocation4 + $0x108] sm:$0xff]  }
 0x321   : > { %2454 = vmax.xlane.f32.xlu0 %v2453_v8  ;;  %4903 = vmatpush3.bf16.msra.mxu0 %v5206_v21  ;;  %v5244_v37 = vld [vmem:[#allocation4 + $0x1e8] sm:$0xff]   ;;  %v5246_v21 = vld [vmem:[#allocation4 + $0x1e0] sm:$0xff]  }
 0x322   : > { %4928 = vmatprep.subr.bf16.mxu0 %v5996_v2 }
 0x323   : > { %4875 = vmatpush3.bf16.msra.mxu1 %v5197_v51 }
 0x324   : > { %4876 = vmatprep.subr.bf16.mxu1 %v5996_v2 }
 0x327   : > { %4877 = vmatpush3.bf16.msra.mxu1 %v5199_v9 }
 0x328   : > { %4878 = vmatprep.subr.bf16.mxu1 %v5996_v2 }
 0x32b   : > { %4879 = vmatpush3.bf16.msra.mxu1 %v5201_v44 }
 0x32c   : > { %4880 = vmatprep.subr.bf16.mxu1 %v5996_v2 }
 0x32f   : > { %4881 = vmatpush3.bf16.msra.mxu1 %v5203_v14  ;;  %v5243_v14 = vld [vmem:[#allocation4 + $0x1a8] sm:$0xff]  }
 0x330   : > { %4882 = vmatprep.subr.bf16.mxu1 %v5996_v2 }
 0x333   : > { %4883 = vmatpush3.bf16.msra.mxu1 %v5205_v32  ;;  %v5245_v32 = vld [vmem:[#allocation4 + $0x1a0] sm:$0xff]  }
 0x334   : > { %4908 = vmatprep.subr.bf16.mxu1 %v5996_v2 }
 0x3aa   : > { %v2455_v15 = vpop.xlane.xlu0 %2454 }
 0x3ab   : > { %v2456_v48 = vsub.f32 %v2453_v8, %v2455_v15  ;;  %v5232_v8 = vld [vmem:[#allocation4 + $0x158] sm:$0xff]   ;;  %v5236_v15 = vld [vmem:[#allocation4 + $0x148] sm:$0xff]  }
 0x3ad   : > { %v2457_v25 = vmul.f32 1.442695, %v2456_v48 }
 0x3af   : > { %5623 = vpow2.f32 %v2457_v25  ;;  %v5237_v25 = vld [vmem:[#allocation4 + $0x100] sm:$0xff]  }
 0x3bc   : > { %v5624_v50 = vpop.eup %5623 }
 0x3bd   : > { %2459 = vadd.xlane.f32.xlu1 %v5624_v50 }
 0x446   : > { %v2460_v26 = vpop.xlane.xlu1 %2459 }
 0x447   : > { %5625 = vrcp.f32 %v2460_v26  ;;  %v5247_v26 = vld [vmem:[#allocation4 + $0x198] sm:$0xff]  }
 0x454   : > { %v5626_v36 = vpop.eup %5625 }
 0x455   : > { %v7103_v45 = vmul.f32 %v5626_v36, %v5624_v50  ;;  %v5248_v36 = vld [vmem:[#allocation4 + $0x1d8] sm:$0xff]  }
 0x457   : > { %v2471_v52 = vrot.slane %v7103_v45, %v6299_v17  ;;  %4251 = vst [vmem:[%s650_s22] sm:$0xff] %v7103_v45  ;;  %v2464_v63 = vcombine.high %v7103_v45, %v7103_v45  ;;  %v5249_v45 = vld [vmem:[#allocation4 + $0x190] sm:$0xff]  }
 0x459   : > { %v2479_v40 = vcombine.high %v2471_v52, %v2471_v52  ;;  %v2487_v5 = vrot.slane %v2471_v52, %v6299_v17  ;;  %v2478_v28 = vrot.slane %v2464_v63, %v6299_v17  ;;  %v5250_v52 = vld [vmem:[#allocation4 + $0x1d0] sm:$0xff]  }
 0x45a   : > { %v5296_v63 = vld [vmem:[#allocation10 + $0x114] ss:$8 sps:$4 sm:$0xff]  }
 0x45b   : > { %v2521_v33 = vpack.c.bf16 %v2487_v5, %v2487_v5  ;;  %v2501_v59 = vrot.slane %v2479_v40, %v6299_v17  ;;  %v2509_v19 = vcombine.high %v2487_v5, %v2487_v5  ;;  %v2480_v48 = vcombine.high %v2478_v28, %v2478_v28  ;;  %v5251_v40 = vld [vmem:[#allocation4 + $0x188] sm:$0xff]  }
 0x45c   : > { %v2494_v50 = vrot.slane %v2478_v28, %v6299_v17  ;;  %v5252_v5 = vld [vmem:[#allocation4 + $0x1c8] sm:$0xff]  }
 0x45d   : > { %4885 = vmatmul.mubr.bf16.vlgmr.msra.gmra.mxu1 %v2521_v33  ;;  %v2522_v24 = vpack.c.bf16 %v2501_v59, %v2501_v59  ;;  %v2511_v43 = vcombine.high %v2501_v59, %v2501_v59  ;;  %v2523_v56 = vpack.c.bf16 %v2509_v19, %v2509_v19  ;;  %v2508_v51 = vrot.slane %v2480_v48, %v6299_v17  ;;  %v5242_v17 = vld [vmem:[#allocation4 + $0x1f0] sm:$0xff]   ;;  %v5254_v59 = vld [vmem:[#allocation4 + $0x1c0] sm:$0xff]   ;;  %v5306_v48 = vld [vmem:[#allocation12 + $0x78] sm:$0xff]  }
 0x45e   : > { %4909 = vmatpush3.bf16.msra.mxu1 %v5207_v39  ;;  %4924 = vmatprep.mubr.msk.bf16.mxu1 %vm7386_vm3, %v5996_v2  ;;  %v2525_v9 = vpack.c.bf16 %v2494_v50, %v2494_v50  ;;  %v5253_v39 = vld [vmem:[#allocation4 + $0x180] sm:$0xff]   ;;  %v2510_v33 = vcombine.high %v2494_v50, %v2494_v50  ;;  %v5303_v50 = vld [vmem:[#allocation10 + $0xf0] ss:$8 sps:$4 sm:$0xff]  }
 0x45f   : > { %4905 = vmatmul.mubr.bf16.vlgmr.msra.gmra.mxu0 %v2522_v24  ;;  %4910 = vmatprep.subr.bf16.mxu1 %v5996_v2  ;;  %v2524_v4 = vpack.c.bf16 %v2511_v43, %v2511_v43  ;;  %v2526_v44 = vpack.c.bf16 %v2508_v51, %v2508_v51  ;;  %v5275_v19 = vld [vmem:[#allocation10 + $0x44] ss:$8 sps:$4 sm:$0xff]   ;;  %v5273_v43 = vld [vmem:[#allocation10 + $0x40] ss:$8 sps:$4 sm:$0xff]  }
 0x460   : > { %4929 = vmatpush3.bf16.msra.mxu0 %v5208_v12  ;;  %4944 = vmatprep.mubr.msk.bf16.mxu0 %vm7386_vm3, %v5996_v2  ;;  %v2512_v12 = vcombine.high %v2508_v51, %v2508_v51  ;;  %v2527_v24 = vpack.c.bf16 %v2510_v33, %v2510_v33  ;;  %v5302_v28 = vld [vmem:[#allocation10 + $0x104] ss:$8 sps:$4 sm:$0xff]   ;;  %v5328_v33 = vld [vmem:[#allocation10 + $0xa0] ss:$8 sps:$4 sm:$0xff]  }
 0x461   : > { %4930 = vmatprep.subr.bf16.mxu0 %v5996_v2  ;;  %v5310_v51 = vld [vmem:[#allocation10 + $0xe4] ss:$8 sps:$4 sm:$0xff]  }
 0x462   : > { %4911 = vmatpush3.bf16.msra.mxu1 %v5209_v60  ;;  %v2528_v60 = vpack.c.bf16 %v2512_v12, %v2512_v12  ;;  %v5333_v12 = vld [vmem:[#allocation10 + $0x90] ss:$8 sps:$4 sm:$0xff]  }
 0x463   : > { %4912 = vmatprep.subr.bf16.mxu1 %v5996_v2 }
 0x464   : > { %4931 = vmatpush3.bf16.msra.mxu0 %v5210_v3  ;;  %v5255_v3 = vld [vmem:[#allocation10 + $0x70] ss:$8 sps:$4 sm:$0xff]  }
 0x465   : > { %4932 = vmatprep.subr.bf16.mxu0 %v5996_v2 }
 0x466   : > { %4913 = vmatpush3.bf16.msra.mxu1 %v5211_v31  ;;  %v5257_v31 = vld [vmem:[#allocation10 + $0x74] ss:$8 sps:$4 sm:$0xff]  }
 0x467   : > { %4914 = vmatprep.subr.bf16.mxu1 %v5996_v2 }
 0x468   : > { %4933 = vmatpush3.bf16.msra.mxu0 %v5212_v27  ;;  %v5258_v27 = vld [vmem:[#allocation10 + $0x170] ss:$8 sps:$4 sm:$0xff]  }
 0x469   : > { %4934 = vmatprep.subr.bf16.mxu0 %v5996_v2 }
 0x46a   : > { %4915 = vmatpush3.bf16.msra.mxu1 %v5213_v57  ;;  %v5260_v57 = vld [vmem:[#allocation10 + $0x174] ss:$8 sps:$4 sm:$0xff]  }
 0x46b   : > { %4916 = vmatprep.subr.bf16.mxu1 %v5996_v2 }
 0x46c   : > { %4935 = vmatpush3.bf16.msra.mxu0 %v5214_v35  ;;  %v5263_v35 = vld [vmem:[#allocation10 + $0x64] ss:$8 sps:$4 sm:$0xff]  }
 0x46d   : > { %4936 = vmatprep.subr.bf16.mxu0 %v5996_v2 }
 0x46e   : > { %4917 = vmatpush3.bf16.msra.mxu1 %v5215_v58  ;;  %v5266_v58 = vld [vmem:[#allocation10 + $0x164] ss:$8 sps:$4 sm:$0xff]  }
 0x46f   : > { %4918 = vmatprep.subr.bf16.mxu1 %v5996_v2 }
 0x470   : > { %4937 = vmatpush3.bf16.msra.mxu0 %v5216_v53  ;;  %v5261_v53 = vld [vmem:[#allocation10 + $0x60] ss:$8 sps:$4 sm:$0xff]  }
 0x471   : > { %4938 = vmatprep.subr.bf16.mxu0 %v5996_v2 }
 0x472   : > { %4919 = vmatpush3.bf16.msra.mxu1 %v5217_v49  ;;  %v5264_v49 = vld [vmem:[#allocation10 + $0x160] ss:$8 sps:$4 sm:$0xff]  }
 0x473   : > { %4920 = vmatprep.subr.bf16.mxu1 %v5996_v2 }
 0x474   : > { %4939 = vmatpush3.bf16.msra.mxu0 %v5218_v13  ;;  %v5269_v13 = vld [vmem:[#allocation10 + $0x54] ss:$8 sps:$4 sm:$0xff]  }
 0x475   : > { %4940 = vmatprep.subr.bf16.mxu0 %v5996_v2 }
 0x476   : > { %4921 = vmatpush3.bf16.msra.mxu1 %v5219_v10  ;;  %v5272_v10 = vld [vmem:[#allocation10 + $0x154] ss:$8 sps:$4 sm:$0xff]  }
 0x477   : > { %4922 = vmatprep.subr.bf16.mxu1 %v5996_v2 }
 0x478   : > { %4941 = vmatpush3.bf16.msra.mxu0 %v5220_v1  ;;  %v5267_v1 = vld [vmem:[#allocation10 + $0x50] ss:$8 sps:$4 sm:$0xff]  }
 0x479   : > { %4942 = vmatprep.subr.bf16.mxu0 %v5996_v2 }
 0x47a   : > { %4923 = vmatpush3.bf16.msra.mxu1 %v5221_v0  ;;  %v5270_v0 = vld [vmem:[#allocation10 + $0x150] ss:$8 sps:$4 sm:$0xff]  }
 0x47b   : > { %4948 = vmatprep.subr.bf16.mxu1 %v5996_v2 }
 0x47c   : > { %4943 = vmatpush3.bf16.msra.mxu0 %v5222_v54  ;;  %v5278_v54 = vld [vmem:[#allocation10 + $0x144] ss:$8 sps:$4 sm:$0xff]  }
 0x47d   : > { %4925 = vmatmul.mubr.bf16.vlgmr.msra.gmra.mxu1 %v2523_v56  ;;  %4968 = vmatprep.subr.bf16.mxu0 %v5996_v2  ;;  %v5281_v56 = vld [vmem:[#allocation10 + $0x34] ss:$8 sps:$4 sm:$0xff]  }
 0x47e   : > { %4949 = vmatpush3.bf16.msra.mxu1 %v5223_v23  ;;  %4964 = vmatprep.mubr.msk.bf16.mxu1 %vm7386_vm3, %v5996_v2  ;;  %v5276_v23 = vld [vmem:[#allocation10 + $0x140] ss:$8 sps:$4 sm:$0xff]  }
 0x47f   : > { %4945 = vmatmul.mubr.bf16.vlgmr.msra.gmra.mxu0 %v2524_v4  ;;  %4950 = vmatprep.subr.bf16.mxu1 %v5996_v2  ;;  %v5279_v4 = vld [vmem:[#allocation10 + $0x30] ss:$8 sps:$4 sm:$0xff]  }
 0x480   : > { %4969 = vmatpush3.bf16.msra.mxu0 %v5224_v47  ;;  %4984 = vmatprep.mubr.msk.bf16.mxu0 %vm7386_vm3, %v5996_v2  ;;  %v5284_v47 = vld [vmem:[#allocation10 + $0x134] ss:$8 sps:$4 sm:$0xff]  }
 0x481   : > { %4970 = vmatprep.subr.bf16.mxu0 %v5996_v2 }
 0x482   : > { %4951 = vmatpush3.bf16.msra.mxu1 %v5225_v46  ;;  %v5282_v46 = vld [vmem:[#allocation10 + $0x130] ss:$8 sps:$4 sm:$0xff]  }
 0x483   : > { %4952 = vmatprep.subr.bf16.mxu1 %v5996_v2 }
 0x484   : > { %4971 = vmatpush3.bf16.msra.mxu0 %v5226_v42  ;;  %v5287_v42 = vld [vmem:[#allocation10 + $0x24] ss:$8 sps:$4 sm:$0xff]  }
 0x485   : > { %4972 = vmatprep.subr.bf16.mxu0 %v5996_v2 }
 0x486   : > { %4953 = vmatpush3.bf16.msra.mxu1 %v5227_v29  ;;  %v5290_v29 = vld [vmem:[#allocation10 + $0x124] ss:$8 sps:$4 sm:$0xff]  }
 0x487   : > { %4954 = vmatprep.subr.bf16.mxu1 %v5996_v2 }
 0x488   : > { %4973 = vmatpush3.bf16.msra.mxu0 %v5228_v7  ;;  %v5285_v7 = vld [vmem:[#allocation10 + $0x20] ss:$8 sps:$4 sm:$0xff]  }
 0x489   : > { %4974 = vmatprep.subr.bf16.mxu0 %v5996_v2 }
 0x48a   : > { %4955 = vmatpush3.bf16.msra.mxu1 %v5229_v55  ;;  %v5288_v55 = vld [vmem:[#allocation10 + $0x120] ss:$8 sps:$4 sm:$0xff]  }
 0x48b   : > { %4956 = vmatprep.subr.bf16.mxu1 %v5996_v2 }
 0x48c   : > { %4975 = vmatpush3.bf16.msra.mxu0 %v5230_v22  ;;  %v5291_v22 = vld [vmem:[#allocation10 + $0x10] ss:$8 sps:$4 sm:$0xff]  }
 0x48d   : > { %4976 = vmatprep.subr.bf16.mxu0 %v5996_v2 }
 0x48e   : > { %4957 = vmatpush3.bf16.msra.mxu1 %v5231_v38  ;;  %v5293_v38 = vld [vmem:[#allocation10 + $0x14] ss:$8 sps:$4 sm:$0xff]  }
 0x48f   : > { %4958 = vmatprep.subr.bf16.mxu1 %v5996_v2 }
 0x490   : > { %4977 = vmatpush3.bf16.msra.mxu0 %v5232_v8  ;;  %v5294_v8 = vld [vmem:[#allocation10 + $0x110] ss:$8 sps:$4 sm:$0xff]  }
 0x491   : > { %4978 = vmatprep.subr.bf16.mxu0 %v5996_v2 }
 0x492   : > { %4959 = vmatpush3.bf16.msra.mxu1 %v5233_v41  ;;  %v5299_v41 = vld [vmem:[#allocation10 + $0x4] ss:$8 sps:$4 sm:$0xff]  }
 0x493   : > { %4960 = vmatprep.subr.bf16.mxu1 %v5996_v2 }
 0x494   : > { %4979 = vmatpush3.bf16.msra.mxu0 %v5234_v34  ;;  %v5297_v34 = vld [vmem:[#allocation10] ss:$8 sps:$4 sm:$0xff]  }
 0x495   : > { %4980 = vmatprep.subr.bf16.mxu0 %v5996_v2 }
 0x496   : > { %4961 = vmatpush3.bf16.msra.mxu1 %v5235_v62  ;;  %v5300_v62 = vld [vmem:[#allocation10 + $0x100] ss:$8 sps:$4 sm:$0xff]  }
 0x497   : > { %4962 = vmatprep.subr.bf16.mxu1 %v5996_v2 }
 0x498   : > { %4981 = vmatpush3.bf16.msra.mxu0 %v5236_v15  ;;  %v5305_v15 = vld [vmem:[#allocation10 + $0xf4] ss:$8 sps:$4 sm:$0xff]  }
 0x499   : > { %4982 = vmatprep.subr.bf16.mxu0 %v5996_v2 }
 0x49a   : > { %4963 = vmatpush3.bf16.msra.mxu1 %v5237_v25  ;;  %v5999_v25 = vmov 0  }
 0x49b   : > { %4988 = vmatprep.subr.bf16.mxu1 %v5996_v2 }
 0x49c   : > { %4983 = vmatpush3.bf16.msra.mxu0 %v5238_v18  ;;  %v5307_v18 = vld [vmem:[#allocation12 + $0x38] sm:$0xff]  }
 0x49d   : > { %4965 = vmatmul.mubr.bf16.vlgmr.msra.gmra.mxu1 %v2525_v9  ;;  %5008 = vmatprep.subr.bf16.mxu0 %v5996_v2  ;;  %v5308_v9 = vld [vmem:[#allocation10 + $0xe0] ss:$8 sps:$4 sm:$0xff]  }
 0x49e   : > { %4989 = vmatpush3.bf16.msra.mxu1 %v5239_v6  ;;  %5004 = vmatprep.mubr.msk.bf16.mxu1 %vm7386_vm3, %v5996_v2  ;;  %v5311_v6 = vld [vmem:[#allocation12 + $0x70] sm:$0xff]  }
 0x49f   : > { %4985 = vmatmul.mubr.bf16.vlgmr.msra.gmra.mxu0 %v2526_v44  ;;  %4990 = vmatprep.subr.bf16.mxu1 %v5996_v2  ;;  %v5315_v44 = vld [vmem:[#allocation10 + $0xd4] ss:$8 sps:$4 sm:$0xff]  }
 0x4a0   : > { %5009 = vmatpush3.bf16.msra.mxu0 %v5240_v61  ;;  %5024 = vmatprep.mubr.msk.bf16.mxu0 %vm7386_vm3, %v5996_v2  ;;  %v5312_v61 = vld [vmem:[#allocation12 + $0x30] sm:$0xff]  }
 0x4a1   : > { %5010 = vmatprep.subr.bf16.mxu0 %v5996_v2 }
 0x4a2   : > { %4991 = vmatpush3.bf16.msra.mxu1 %v5241_v30  ;;  %v5316_v30 = vld [vmem:[#allocation12 + $0x68] sm:$0xff]  }
 0x4a3   : > { %4992 = vmatprep.subr.bf16.mxu1 %v5996_v2 }
 0x4a4   : > { %5011 = vmatpush3.bf16.msra.mxu0 %v5242_v17  ;;  %v5313_v17 = vld [vmem:[#allocation10 + $0xd0] ss:$8 sps:$4 sm:$0xff]  }
 0x4a5   : > { %5012 = vmatprep.subr.bf16.mxu0 %v5996_v2 }
 0x4a6   : > { %4993 = vmatpush3.bf16.msra.mxu1 %v5243_v14  ;;  %v5317_v14 = vld [vmem:[#allocation12 + $0x28] sm:$0xff]  }
 0x4a7   : > { %4994 = vmatprep.subr.bf16.mxu1 %v5996_v2 }
 0x4a8   : > { %5013 = vmatpush3.bf16.msra.mxu0 %v5244_v37  ;;  %v5320_v37 = vld [vmem:[#allocation10 + $0xc4] ss:$8 sps:$4 sm:$0xff]  }
 0x4a9   : > { %5014 = vmatprep.subr.bf16.mxu0 %v5996_v2 }
 0x4aa   : > { %4995 = vmatpush3.bf16.msra.mxu1 %v5245_v32  ;;  %v5321_v32 = vld [vmem:[#allocation12 + $0x60] sm:$0xff]  }
 0x4ab   : > { %4996 = vmatprep.subr.bf16.mxu1 %v5996_v2 }
 0x4ac   : > { %5015 = vmatpush3.bf16.msra.mxu0 %v5246_v21  ;;  %v5318_v21 = vld [vmem:[#allocation10 + $0xc0] ss:$8 sps:$4 sm:$0xff]  }
 0x4ad   : > { %5016 = vmatprep.subr.bf16.mxu0 %v5996_v2 }
 0x4ae   : > { %4997 = vmatpush3.bf16.msra.mxu1 %v5247_v26  ;;  %v5322_v26 = vld [vmem:[#allocation12 + $0x20] sm:$0xff]  }
 0x4af   : > { %4998 = vmatprep.subr.bf16.mxu1 %v5996_v2 }
 0x4b0   : > { %5017 = vmatpush3.bf16.msra.mxu0 %v5248_v36  ;;  %v5325_v36 = vld [vmem:[#allocation10 + $0xb4] ss:$8 sps:$4 sm:$0xff]  }
 0x4b1   : > { %5018 = vmatprep.subr.bf16.mxu0 %v5996_v2 }
 0x4b2   : > { %4999 = vmatpush3.bf16.msra.mxu1 %v5249_v45  ;;  %v5326_v45 = vld [vmem:[#allocation12 + $0x58] sm:$0xff]  }
 0x4b3   : > { %5000 = vmatprep.subr.bf16.mxu1 %v5996_v2 }
 0x4b4   : > { %5019 = vmatpush3.bf16.msra.mxu0 %v5250_v52  ;;  %v5323_v52 = vld [vmem:[#allocation10 + $0xb0] ss:$8 sps:$4 sm:$0xff]  }
 0x4b5   : > { %5020 = vmatprep.subr.bf16.mxu0 %v5996_v2 }
 0x4b6   : > { %5001 = vmatpush3.bf16.msra.mxu1 %v5251_v40  ;;  %v5327_v40 = vld [vmem:[#allocation12 + $0x18] sm:$0xff]  }
 0x4b7   : > { %5002 = vmatprep.subr.bf16.mxu1 %v5996_v2 }
 0x4b8   : > { %5021 = vmatpush3.bf16.msra.mxu0 %v5252_v5  ;;  %v5330_v5 = vld [vmem:[#allocation10 + $0xa4] ss:$8 sps:$4 sm:$0xff]  }
 0x4b9   : > { %5022 = vmatprep.subr.bf16.mxu0 %v5996_v2 }
 0x4ba   : > { %5003 = vmatpush3.bf16.msra.mxu1 %v5253_v39  ;;  %v5331_v39 = vld [vmem:[#allocation12 + $0x50] sm:$0xff]  }
 0x4bb   : > { %3686 = vmatprep.subr.bf16.mxu1 %v5257_v31  ;;  %v5340_v31 = vld [vmem:[#allocation10 + $0x84] ss:$8 sps:$4 sm:$0xff]  }
 0x4bc   : > { %5023 = vmatpush3.bf16.msra.mxu0 %v5254_v59  ;;  %v5332_v59 = vld [vmem:[#allocation12 + $0x10] sm:$0xff]  }
 0x4bd   : > { %5005 = vmatmul.mubr.bf16.vlgmr.msra.gmra.mxu1 %v2527_v24  ;;  %3727 = vmatprep.subr.bf16.mxu0 %v5260_v57  ;;  %v5335_v24 = vld [vmem:[#allocation10 + $0x94] ss:$8 sps:$4 sm:$0xff]   ;;  %v5338_v57 = vld [vmem:[#allocation10 + $0x80] ss:$8 sps:$4 sm:$0xff]  }
 0x4be   : > { %3687 = vmatpush1.bf16.msra.mxu1 %v5255_v3  ;;  %v5337_v3 = vld [vmem:[#allocation12 + $0x8] sm:$0xff]  }
 0x4bf   : > { %5025 = vmatmul.mubr.bf16.vlgmr.msra.gmra.mxu0 %v2528_v60  ;;  %3688 = vmatprep.subr.bf16.mxu1 %v5263_v35  ;;  %v5336_v60 = vld [vmem:[#allocation12 + $0x48] sm:$0xff]   ;;  %v5342_v35 = vld [vmem:[#allocation12] sm:$0xff]  }
 0x4c0   : > { %3728 = vmatpush1.bf16.msra.mxu0 %v5258_v27  ;;  %3759 = vmatprep.mubr.bf16.mxu0 %v5999_v25  ;;  %v5341_v27 = vld [vmem:[#allocation12 + $0x40] sm:$0xff]  }
 0x4c1   : > { %3729 = vmatprep.subr.bf16.mxu0 %v5266_v58 }
 0x4c2   : > { %3689 = vmatpush1.bf16.msra.mxu1 %v5261_v53 }
 0x4c3   : > { %3690 = vmatprep.subr.bf16.mxu1 %v5269_v13 }
 0x4c4   : > { %3730 = vmatpush1.bf16.msra.mxu0 %v5264_v49 }
 0x4c5   : > { %3731 = vmatprep.subr.bf16.mxu0 %v5272_v10 }
 0x4c6   : > { %3691 = vmatpush1.bf16.msra.mxu1 %v5267_v1 }
 0x4c7   : > { %3692 = vmatprep.subr.bf16.mxu1 %v5275_v19 }
 0x4c8   : > { %3732 = vmatpush1.bf16.msra.mxu0 %v5270_v0 }
 0x4c9   : > { %3733 = vmatprep.subr.bf16.mxu0 %v5278_v54 }
 0x4ca   : > { %3693 = vmatpush1.bf16.msra.mxu1 %v5273_v43 }
 0x4cb   : > { %3694 = vmatprep.subr.bf16.mxu1 %v5281_v56 }
 0x4cc   : > { %3734 = vmatpush1.bf16.msra.mxu0 %v5276_v23 }
 0x4cd   : > { %3735 = vmatprep.subr.bf16.mxu0 %v5284_v47 }
 0x4ce   : > { %3695 = vmatpush1.bf16.msra.mxu1 %v5279_v4 }
 0x4cf   : > { %3696 = vmatprep.subr.bf16.mxu1 %v5287_v42 }
 0x4d0   : > { %3736 = vmatpush1.bf16.msra.mxu0 %v5282_v46 }
 0x4d1   : > { %3737 = vmatprep.subr.bf16.mxu0 %v5290_v29 }
 0x4d2   : > { %3697 = vmatpush1.bf16.msra.mxu1 %v5285_v7 }
 0x4d3   : > { %3698 = vmatprep.subr.bf16.mxu1 %v5293_v38 }
 0x4d4   : > { %3738 = vmatpush1.bf16.msra.mxu0 %v5288_v55 }
 0x4d5   : > { %3739 = vmatprep.subr.bf16.mxu0 %v5296_v63 }
 0x4d6   : > { %3699 = vmatpush1.bf16.msra.mxu1 %v5291_v22 }
 0x4d7   : > { %3700 = vmatprep.subr.bf16.mxu1 %v5299_v41 }
 0x4d8   : > { %3740 = vmatpush1.bf16.msra.mxu0 %v5294_v8 }
 0x4d9   : > { %3741 = vmatprep.subr.bf16.mxu0 %v5302_v28 }
 0x4da   : > { %3701 = vmatpush1.bf16.msra.mxu1 %v5297_v34 }
 0x4db   : > { %3702 = vmatprep.subr.bf16.mxu1 %v5305_v15 }
 0x4dc   : > { %3742 = vmatpush1.bf16.msra.mxu0 %v5300_v62 }
 0x4dd   : > { %4795 = vmatprep.subr.bf16.mxu0 %v5306_v48 }
 0x4de   : > { %3703 = vmatpush2.bf16.msra.mxu1 %v5303_v50 }
 0x4df   : > { %3760 = vmatmul.mubr.bf16.vlgmr.msra.gmra.mxu0 %v6289_v11  ;;  %3704 = vmatprep.subr.bf16.mxu1 %v5310_v51 }
 0x4e0   : > { %4796 = vmatpush3.bf16.msra.mxu0 %v5307_v18 }
 0x4e1   : > { %4797 = vmatprep.subr.bf16.mxu0 %v5311_v6 }
 0x4e2   : > { %3705 = vmatpush2.bf16.msra.mxu1 %v5308_v9 }
 0x4e3   : > { %3706 = vmatprep.subr.bf16.mxu1 %v5315_v44 }
 0x4e4   : > { %4798 = vmatpush3.bf16.msra.mxu0 %v5312_v61 }
 0x4e5   : > { %4799 = vmatprep.subr.bf16.mxu0 %v5316_v30 }
 0x4e6   : > { %3707 = vmatpush2.bf16.msra.mxu1 %v5313_v17  ;;  %v672_v17 = vld [vmem:[%s6266_s23] sm:$0xff] }
 0x4e7   : > { %3708 = vmatprep.subr.bf16.mxu1 %v5320_v37 }
 0x4e8   : > { %4800 = vmatpush3.bf16.msra.mxu0 %v5317_v14 }
 0x4e9   : > { %4801 = vmatprep.subr.bf16.mxu0 %v5321_v32 }
 0x4ea   : > { %3709 = vmatpush2.bf16.msra.mxu1 %v5318_v21 }
 0x4eb   : > { %3710 = vmatprep.subr.bf16.mxu1 %v5325_v36  ;;  %v3384_v36 = vpack.c.bf16 %v672_v17, %v672_v17 }
 0x4ec   : > { %4802 = vmatpush3.bf16.msra.mxu0 %v5322_v26 }
 0x4ed   : > { %4803 = vmatprep.subr.bf16.mxu0 %v5326_v45 }
 0x4ee   : > { %3711 = vmatpush2.bf16.msra.mxu1 %v5323_v52 }
 0x4ef   : > { %3712 = vmatprep.subr.bf16.mxu1 %v5330_v5  ;;  %v5343_v5 = vld [vmem:[#allocation13 + $0x38] sm:$0xff]  }
 0x4f0   : > { %4804 = vmatpush3.bf16.msra.mxu0 %v5327_v40 }
 0x4f1   : > { %4805 = vmatprep.subr.bf16.mxu0 %v5331_v39 }
 0x4f2   : > { %3713 = vmatpush2.bf16.msra.mxu1 %v5328_v33  ;;  %v5344_v33 = vld [vmem:[#allocation13 + $0x30] sm:$0xff]  }
 0x4f3   : > { %3714 = vmatprep.subr.bf16.mxu1 %v5335_v24  ;;  %v5347_v24 = vld [vmem:[#allocation13 + $0x18] sm:$0xff]  }
 0x4f4   : > { %4806 = vmatpush3.bf16.msra.mxu0 %v5332_v59  ;;  %v5345_v59 = vld [vmem:[#allocation13 + $0x28] sm:$0xff]  }
 0x4f5   : > { %4807 = vmatprep.subr.bf16.mxu0 %v5336_v60  ;;  %v5348_v60 = vld [vmem:[#allocation13 + $0x10] sm:$0xff]  }
 0x4f6   : > { %3715 = vmatpush2.bf16.msra.mxu1 %v5333_v12  ;;  %v5346_v12 = vld [vmem:[#allocation13 + $0x20] sm:$0xff]  }
 0x4f7   : > { %3716 = vmatprep.subr.bf16.mxu1 %v5340_v31  ;;  %v5350_v31 = vld [vmem:[#allocation13] sm:$0xff]  }
 0x4f8   : > { %4808 = vmatpush3.bf16.msra.mxu0 %v5337_v3  ;;  %v5349_v3 = vld [vmem:[#allocation13 + $0x8] sm:$0xff]  }
 0x4f9   : > { %4809 = vmatprep.subr.bf16.mxu0 %v5341_v27 }
 0x4fa   : > { %3717 = vmatpush2.bf16.msra.mxu1 %v5338_v57 }
 0x4fb   : > { %5028 = vmatprep.subr.bf16.mxu1 %v5996_v2 }
 0x4fc   : > { %4810 = vmatpush3.bf16.msra.mxu0 %v5342_v35 }
 0x51d   : > { %v2739_v58 = vpop.f32.mrf.mxu1 }
 0x51f   : > { %v4886_v53 = vpop.f32.mrf.mxu1  ;;  %v2827_v49 = vpop.f32.mrf.mxu0 }
 0x520   : > { %v3369_v13 = vrot.slane %v2827_v49, 7  ;;  %v5351_v53 = vld [vmem:[#allocation15 + $0x78] sm:$0xff]  }
 0x521   : > { %v2742_v10 = vpop.f32.mrf.mxu1  ;;  %v4906_v1 = vpop.f32.mrf.mxu0  ;;  %v5352_v49 = vld [vmem:[#allocation15 + $0x38] sm:$0xff]   ;;  %4826 = vmatprep.subr.bf16.mxu0 %v5351_v53 }
 0x522   : > { %v3370_v0 = vsel %vm7387_vm4, %v3369_v13, %v2739_v58  ;;  %v5353_v13 = vld [vmem:[#allocation15 + $0x70] sm:$0xff]   ;;  %v5355_v1 = vld [vmem:[#allocation15 + $0x68] sm:$0xff]  }
 0x523   : > { %v4887_v19 = vpop.f32.mrf.mxu1  ;;  %v2830_v54 = vpop.f32.mrf.mxu0  ;;  %v5354_v10 = vld [vmem:[#allocation15 + $0x30] sm:$0xff]  }
 0x524   : > { %v5357_v19 = vld [vmem:[#allocation15 + $0x60] sm:$0xff]   ;;  %v5360_v54 = vld [vmem:[#allocation15 + $0x18] sm:$0xff]  }
 0x525   : > { %v4907_v43 = vpop.f32.mrf.mxu0 }
 0x526   : > { %v5361_v43 = vld [vmem:[#allocation15 + $0x50] sm:$0xff]  }
 0x53d   : > { %v2915_v23 = vpop.f32.mrf.mxu1 }
 0x53e   : > { %v3371_v62 = vrot.slane %v2915_v23, 6  ;;  %v5362_v23 = vld [vmem:[#allocation15 + $0x10] sm:$0xff]  }
 0x53f   : > { %v4926_v56 = vpop.f32.mrf.mxu1  ;;  %v3003_v47 = vpop.f32.mrf.mxu0 }
 0x540   : > { %v3373_v15 = vrot.slane %v3003_v47, 5  ;;  %v3372_v48 = vsel %vm7388_vm5, %v3371_v62, %v3370_v0  ;;  %v5356_v0 = vld [vmem:[#allocation15 + $0x28] sm:$0xff]  }
 0x541   : > { %v2918_v4 = vpop.f32.mrf.mxu1  ;;  %v4946_v46 = vpop.f32.mrf.mxu0  ;;  %v5363_v56 = vld [vmem:[#allocation15 + $0x48] sm:$0xff]  }
 0x542   : > { %v3374_v50 = vsel %vm7389_vm6, %v3373_v15, %v3372_v48  ;;  %v5364_v47 = vld [vmem:[#allocation15 + $0x8] sm:$0xff]   ;;  %v5365_v4 = vld [vmem:[#allocation15 + $0x40] sm:$0xff]  }
 0x543   : > { %v4927_v42 = vpop.f32.mrf.mxu1  ;;  %v3006_v29 = vpop.f32.mrf.mxu0  ;;  %v5366_v46 = vld [vmem:[#allocation15] sm:$0xff]  }
 0x544   : > { %v3434_v42 = vld [vmem:[%s7321_s8] sm:$0x3] }
 0x545   : > { %v4947_v7 = vpop.f32.mrf.mxu0  ;;  %v3439_v29 = vrot.slane %v3434_v42, %v6303_v20 }
 0x546   : > { %v3442_v7 = vsub.s32 1, %v6296_v16 }
 0x55d   : > { %v3091_v55 = vpop.f32.mrf.mxu1 }
 0x55e   : > { %v3375_v25 = vrot.slane %v3091_v55, 4 }
 0x55f   : > { %v4966_v22 = vpop.f32.mrf.mxu1  ;;  %v3179_v38 = vpop.f32.mrf.mxu0 }
 0x560   : > { %v3377_v18 = vrot.slane %v3179_v38, 3  ;;  %v3376_v51 = vsel %vm7390_vm7, %v3375_v25, %v3374_v50 }
 0x561   : > { %v3094_v8 = vpop.f32.mrf.mxu1  ;;  %v4986_v63 = vpop.f32.mrf.mxu0 }
 0x562   : > { %v3378_v61 = vsel %vm7391_vm8, %v3377_v18, %v3376_v51  ;;  %v3443_v8 = vrot.slane %v3434_v42, %v3442_v7 }
 0x563   : > { %v4967_v41 = vpop.f32.mrf.mxu1  ;;  %v3182_v34 = vpop.f32.mrf.mxu0 }
 0x565   : > { %v4987_v28 = vpop.f32.mrf.mxu0 }
 0x57d   : > { %v3267_v6 = vpop.f32.mrf.mxu1 }
 0x57e   : > { %v3379_v9 = vrot.slane %v3267_v6, 2 }
 0x57f   : > { %v5006_v44 = vpop.f32.mrf.mxu1  ;;  %v3355_v30 = vpop.f32.mrf.mxu0 }
 0x580   : > { %v3380_v14 = vsel %vm2448_vm2, %v3379_v9, %v3378_v61  ;;  %v3381_v37 = vrot.slane %v3355_v30, 1  ;;  %v4678_v9 = vld [vmem:[%s7325_s12] ss:$0 sm:$0xff] }
 0x581   : > { %v3270_v32 = vpop.f32.mrf.mxu1  ;;  %v5026_v21 = vpop.f32.mrf.mxu0 }
 0x582   : > { %v3382_v26 = vsel %vm2450_vm0, %v3381_v37, %v3380_v14  ;;  %v4661_v14 = vld [vmem:[%s7323_s10] ss:$0 sm:$0xff] }
 0x583   : > { %v5007_v45 = vpop.f32.mrf.mxu1  ;;  %v3358_v52 = vpop.f32.mrf.mxu0  ;;  %v3385_v40 = vpack.c.bf16 %v3382_v26, %v3382_v26  ;;  %4252 = vst [vmem:[%s7353_s26] sm:$0xff] %v3382_v26 }
 0x585   : > { %v5027_v39 = vpop.f32.mrf.mxu0  ;;  %3718 = vmatprep.mubr.bf16.mxu1 %v3385_v40  ;;  %3947 = vmatprep.mubr.bf16.mxu0 %v3385_v40 }
 0x586   : > { %3719 = vmatmul.mubr.bf16.vlgmr.msra.gmra.mxu1 %v3384_v36  ;;  %3948 = vmatmul.mubr.bf16.vlgmr.msra.gmra.mxu0 %v3384_v36 }
 0x587   : > { %5029 = vmatpush3.bf16.msra.mxu1 %v5343_v5  ;;  %4241 = vmatprep.mubr.bf16.mxu0 %v3385_v40 }
 0x588   : > { %5030 = vmatprep.subr.bf16.mxu1 %v5996_v2  ;;  %5044 = vmatprep.mubr.msk.bf16.mxu1 %vm7386_vm3, %v5996_v2 }
 0x589   : > { %4827 = vmatpush3.bf16.msra.mxu0 %v5352_v49 }
 0x58a   : > { %4828 = vmatprep.subr.bf16.mxu0 %v5353_v13 }
 0x58b   : > { %5031 = vmatpush3.bf16.msra.mxu1 %v5344_v33 }
 0x58c   : > { %5032 = vmatprep.subr.bf16.mxu1 %v5996_v2 }
 0x58d   : > { %4829 = vmatpush3.bf16.msra.mxu0 %v5354_v10 }
 0x58e   : > { %4830 = vmatprep.subr.bf16.mxu0 %v5355_v1 }
 0x58f   : > { %5033 = vmatpush3.bf16.msra.mxu1 %v5345_v59  ;;  %v5640_v59 = vld [vmem:[#allocation20] sm:$0xff] }
 0x590   : > { %5034 = vmatprep.subr.bf16.mxu1 %v5996_v2 }
 0x591   : > { %4831 = vmatpush3.bf16.msra.mxu0 %v5356_v0 }
 0x592   : > { %4832 = vmatprep.subr.bf16.mxu0 %v5357_v19 }
 0x593   : > { %5035 = vmatpush3.bf16.msra.mxu1 %v5346_v12 }
 0x594   : > { %5036 = vmatprep.subr.bf16.mxu1 %v5996_v2 }
 0x597   : > { %5037 = vmatpush3.bf16.msra.mxu1 %v5347_v24 }
 0x598   : > { %5038 = vmatprep.subr.bf16.mxu1 %v5996_v2 }
 0x59b   : > { %5039 = vmatpush3.bf16.msra.mxu1 %v5348_v60 }
 0x59c   : > { %5040 = vmatprep.subr.bf16.mxu1 %v5996_v2 }
 0x59f   : > { %5041 = vmatpush3.bf16.msra.mxu1 %v5349_v3  ;;  %v3761_v27 = vpop.f32.mrf.mxu0 }
 0x5a0   : > { %5042 = vmatprep.subr.bf16.mxu1 %v5996_v2  ;;  %v5358_v2 = vld [vmem:[#allocation15 + $0x20] sm:$0xff]  }
 0x5a1   : > { %v3763_v57 = vpop.f32.mrf.mxu0  ;;  %4833 = vmatpush3.bf16.msra.mxu0 %v5358_v2 }
 0x5a3   : > { %5043 = vmatpush3.bf16.msra.mxu1 %v5350_v31  ;;  %v3765_v35 = vpop.f32.mrf.mxu0 }
 0x5a5   : > { %v3766_v58 = vpop.f32.mrf.mxu0 }
 0x5a6   : > { %5045 = vmatmul.mubr.bf16.vlgmr.msra.gmra.mxu1 %v6289_v11  ;;  %v5359_v11 = vld [vmem:[#allocation15 + $0x58] sm:$0xff]  }
 0x5a7   : > { %4834 = vmatprep.subr.bf16.mxu0 %v5359_v11 }
 0x5a8   : > { %4835 = vmatpush3.bf16.msra.mxu0 %v5360_v54 }
 0x5a9   : > { %4836 = vmatprep.subr.bf16.mxu0 %v5361_v43 }
 0x5ac   : > { %4837 = vmatpush3.bf16.msra.mxu0 %v5362_v23 }
 0x5ad   : > { %4838 = vmatprep.subr.bf16.mxu0 %v5363_v56 }
 0x5b0   : > { %4839 = vmatpush3.bf16.msra.mxu0 %v5364_v47 }
 0x5b1   : > { %4840 = vmatprep.subr.bf16.mxu0 %v5365_v4 }
 0x5b4   : > { %4841 = vmatpush3.bf16.msra.mxu0 %v5366_v46 }
 0x646   : > { %v3720_v55 = vpop.f32.mrf.mxu1  ;;  %v4811_v22 = vpop.f32.mrf.mxu0 }
 0x647   : > { %v3721_v38 = vadd.f32 %v3720_v55, %v3439_v29 }
 0x648   : > { %v3722_v63 = vpop.f32.mrf.mxu1  ;;  %v4812_v41 = vpop.f32.mrf.mxu0 }
 0x649   : > { %v3762_v34 = vadd.f32 %v3761_v27, %v3721_v38  ;;  %v3723_v48 = vadd.f32 %v3722_v63, %v3443_v8  ;;  %v4813_v30 = vadd.f32 %v4812_v41, %v4811_v22 }
 0x64a   : > { %v3724_v28 = vpop.f32.mrf.mxu1  ;;  %v4814_v62 = vpop.f32.mrf.mxu0 }
 0x64b   : > { %v4659_v15 = vmul.f32 -1.442695, %v3762_v34  ;;  %v3764_v18 = vadd.f32 %v3763_v57, %v3723_v48  ;;  %v3950_v26 = vadd.f32 %v4813_v30, %v4661_v14 }
 0x64c   : > { %v3725_v25 = vpop.f32.mrf.mxu1  ;;  %v4815_v50 = vpop.f32.mrf.mxu0 }
 0x64d   : > { %5627 = vpow2.f32 %v4659_v15  ;;  %v4660_v51 = vmul.f32 -1.442695, %v3764_v18 }
 0x64f   : > { %5629 = vpow2.f32 %v4660_v51 }
 0x65a   : > { %v5628_v20 = vpop.eup %5627 }
 0x65b   : > { %v3774_v6 = vadd.f32 1.0, %v5628_v20 }
 0x65c   : > { %v5630_v16 = vpop.eup %5629 }
 0x65d   : > { %5631 = vrcp.f32 %v3774_v6  ;;  %v3775_v44 = vadd.f32 1.0, %v5630_v16 }
 0x65f   : > { %5633 = vrcp.f32 %v3775_v44 }
 0x666   : > { %v4060_v61 = vpop.f32.mrf.mxu1 }
 0x667   : > { %v4061_v17 = vadd.f32 %v4678_v9, %v4060_v61 }
 0x668   : > { %v5046_v37 = vpop.f32.mrf.mxu1 }
 0x66a   : > { %v5632_v32 = vpop.eup %5631  ;;  %v4063_v21 = vpop.f32.mrf.mxu1 }
 0x66b   : > { %v4066_v36 = vmul.f32 %v5632_v32, %v4061_v17 }
 0x66c   : > { %v5047_v45 = vpop.f32.mrf.mxu1  ;;  %v5634_v40 = vpop.eup %5633 }
 0x66d   : > { %v4067_v52 = vadd.f32 %v4066_v36, %v3950_v26  ;;  %v4069_v5 = vsub.f32 1.0, %v5634_v40  ;;  %v4071_v12 = vmul.f32 %v5640_v59, %v5634_v40 }
 0x66f   : > { %5635 = vtanh.f32 %v4067_v52 }
 0x67c   : > { %v5636_v39 = vpop.eup %5635 }
 0x67d   : > { %v4070_v33 = vmul.f32 %v5636_v39, %v4069_v5 }
 0x67f   : > { %v4072_v24 = vadd.f32 %v4071_v12, %v4070_v33 }
 0x681   : > { %v4073_v60 = vpack.c.bf16 %v4072_v24, %v4072_v24  ;;  %4253 = vst [vmem:[#allocation20] sm:$0xff] %v4072_v24 }
 0x683   : > { %4242 = vmatmul.mubr.bf16.vlgmr.msra.gmra.mxu0 %v4073_v60 }
 0x684   : > { %5836 = shalt.err (!%p5833_p10)
}
 0x685   : > { %s5837_s4 = scalar_lea.hbm %s4289_s21, 128  ;;  %s5841_s23 = scalar_lea.hbm %s7329_s16, 384 }
 0x686   : > { %p5838_p4 = scmp.ne.s32.totalorder %s4289_s21, %s5837_s4  ;;  %p5842_p8 = scmp.lt.s32.totalorder %s4289_s21, %s7329_s16 }
 0x687   : > { %p5843_p12 = scmp.lt.s32.totalorder %s5841_s23, %s5837_s4 }
 0x688   : > { %p5839_p13 = pnand %p5838_p4, %p7392_p7 }
 0x689   : > { %p5844_p1 = por %p5843_p12, %p5842_p8 }
 0x68a   : > { %p5840_p11 = pneg %p5839_p13 }
 0x68c   : > { %p5845_p3 = pnand %p5844_p1, %p5840_p11 }
 0x68e   : > { %5848 = shalt.err (!%p5845_p3)
}
 0x68f   : > { %5077 = dma.vmem_to_hbm [thread:$0]  (%p7392_p7), %s4292_s29, 128, %s4289_s21, %s7218_s15  }
 0x690   : > { %s4302_s2 = scalar_lea.hbm %s7330_s17, %s7210_s28  ;;  %s7393_s30 = scalar_lea.vmem [#allocation19], %s6260_s27 }
 0x691   : > { %s4304_s22 = sshll.u32 %s7393_s30, 4  ;;  %s6001_s26 = smov [#allocation19]   ;;  %s4305_s22 = int_to_ptr.vmem [resolvable:$true] %s4304_s22 }
 0x692   : > { %s5849_s3 = scalar_lea.vmem %s4305_s22, 128  ;;  %s5853_s4 = sshll.u32 %s6001_s26, 4  ;;  %s5854_s4 = int_to_ptr.vmem [resolvable:$false] %s5853_s4 }
 0x693   : > { %p5850_p2 = scmp.ne.s32.totalorder %s4305_s22, %s5849_s3  ;;  %s5855_s1 = scalar_lea.vmem %s5854_s4, 256 }
 0x694   : > { %p5856_p6 = scmp.lt.s32.totalorder %s4305_s22, %s5854_s4  ;;  %p5857_p5 = scmp.lt.s32.totalorder %s5855_s1, %s5849_s3 }
 0x695   : > { %p5851_p9 = pnand %p5850_p2, %p7392_p7 }
 0x696   : > { %p5858_p10 = por %p5857_p5, %p5856_p6 }
 0x697   : > { %p5852_p0 = pneg %p5851_p9 }
 0x699   : > { %p5859_p4 = pnand %p5858_p10, %p5852_p0 }
 0x69b   : > { %5862 = shalt.err (!%p5859_p4)
}
 0x69c   : > { %s5863_s21 = scalar_lea.hbm %s4302_s2, 128  ;;  %s5867_s24 = scalar_lea.hbm %s7330_s17, 384 }
 0x69d   : > { %p5864_p13 = scmp.ne.s32.totalorder %s4302_s2, %s5863_s21  ;;  %p5868_p12 = scmp.lt.s32.totalorder %s4302_s2, %s7330_s17 }
 0x69e   : > { %p5869_p1 = scmp.lt.s32.totalorder %s5867_s24, %s5863_s21 }
 0x69f   : > { %p5865_p11 = pnand %p5864_p13, %p7392_p7 }
 0x6a0   : > { %p5870_p3 = por %p5869_p1, %p5868_p12 }
 0x6a1   : > { %p5866_p8 = pneg %p5865_p11 }
 0x6a3   : > { %p5871_p2 = pnand %p5870_p3, %p5866_p8 }
 0x6a5   : > { %5874 = shalt.err (!%p5871_p2)
}
 0x6a6   : > { %5078 = dma.vmem_to_hbm [thread:$0]  (%p7392_p7), %s4305_s22, 128, %s4302_s2, %s7218_s15  }
 0x6a7   : > { %s6002_s3 = smov [#allocation20]   ;;  %p7394_p0 = scmp.eq.s32.totalorder %s6123_s20, 2 }
 0x6a8   : > { %s4315_s26 = sshll.u32 %s6002_s3, 4  ;;  %s4316_s26 = int_to_ptr.vmem [resolvable:$true] %s4315_s26 }
 0x6a9   : > { %s5875_s4 = scalar_lea.vmem %s4316_s26, 128  ;;  %p5882_p10 = scmp.lt.s32.totalorder %s4316_s26, %s4316_s26 }
 0x6aa   : > { %p5876_p9 = scmp.ne.s32.totalorder %s4316_s26, %s5875_s4  ;;  %p5883_p4 = scmp.lt.s32.totalorder %s5875_s4, %s5875_s4 }
 0x6ac   : > { %p5877_p6 = pnand %p5876_p9, %p7394_p0  ;;  %p5884_p13 = por %p5883_p4, %p5882_p10 }
 0x6ae   : > { %p5878_p5 = pneg %p5877_p6 }
 0x6b0   : > { %p5885_p11 = pnand %p5884_p13, %p5878_p5 }
 0x6b2   : > { %5888 = shalt.err (!%p5885_p11)
}
 0x6b3   : > { %p7395_p8 = pmov %p7394_p0  ;;  %v4687_v31 = vld [vmem:[%s7327_s14] ss:$0 sm:$0xff]  ;;  %s7396_s22 = scalar_lea.vmem [#allocation16], %s6260_s27 }
 0x6b4   : > { %s4278_s29 = sshll.u32 %s7396_s22, 4  ;;  %s7397_s19 = sld [smem:[#allocation40_spill]]  ;;  %s4279_s29 = int_to_ptr.vmem [resolvable:$true] %s4278_s29 }
 0x6b5   : > { %5080 = dma.vmem_to_hbm [thread:$0]  (%p7395_p8), %s4316_s26, 128, %s7331_s18, [#allocation21]  }
 0x6b6   : > { %s7399_s26 = smov %s7396_s22  ;;  %s7400_s4 = sand.u32 1, %s5975_s0  }
 0x6b7   : > { %s4255_s1 = scalar_lea.sflag [#allocation6], %s7400_s4  ;;  %s5899_s21 = scalar_lea.vmem %s4279_s29, 128 }
 0x6b8   : > { %p5900_p12 = scmp.ne.s32.totalorder %s4279_s29, %s5899_s21  ;;  %s6003_s15 = smov [#allocation16]  }
 0x6b9   : > { %s5903_s2 = sshll.u32 %s6003_s15, 4  ;;  %s5904_s2 = int_to_ptr.vmem [resolvable:$false] %s5903_s2 }
 0x6ba   : > { %s7398_s3 = smov %s7397_s19  ;;  %s7268_s30 = scalar_lea.hbm %s7397_s19, %s7210_s28 }
 0x6bb   : > { %p5901_p1 = pnand %p5900_p12, %p7392_p7  ;;  %s5905_s22 = scalar_lea.vmem %s5904_s2, 256 }
 0x6bc   : > { %p5906_p2 = scmp.lt.s32.totalorder %s4279_s29, %s5904_s2  ;;  %p5907_p9 = scmp.lt.s32.totalorder %s5905_s22, %s5899_s21 }
 0x6bd   : > { %p5902_p3 = pneg %p5901_p1 }
 0x6be   : > { %p5908_p0 = por %p5907_p9, %p5906_p2 }
 0x6c0   : > { %p5909_p6 = pnand %p5908_p0, %p5902_p3 }
 0x743   : > { %v4842_v3 = vpop.f32.mrf.mxu0 }
 0x745   : > { %v4843_v27 = vpop.f32.mrf.mxu0 }
 0x746   : > { %v4844_v57 = vadd.f32 %v4843_v27, %v4842_v3 }
 0x747   : > { %v4845_v35 = vpop.f32.mrf.mxu0 }
 0x748   : > { %v4244_v58 = vadd.f32 %v4844_v57, %v4687_v31 }
 0x749   : > { %v4846_v53 = vpop.f32.mrf.mxu0 }
 0x74a   : > { %5637 = vtanh.f32 %v4244_v58 }
 0x757   : > { %v5638_v49 = vpop.eup %5637 }
 0x758   : > { %4250 = vst [vmem:[%s7399_s26] sm:$0xff] %v5638_v49 }
 0x759   : > { %5912 = shalt.err (!%p5909_p6)
}
 0x75a   : > { %s5913_s27 = scalar_lea.hbm %s7268_s30, 128  ;;  %s5917_s24 = scalar_lea.hbm %s7398_s3, 384 }
 0x75b   : > { %p5914_p5 = scmp.ne.s32.totalorder %s7268_s30, %s5913_s27  ;;  %p5918_p13 = scmp.lt.s32.totalorder %s7268_s30, %s7398_s3 }
 0x75c   : > { %p5919_p11 = scmp.lt.s32.totalorder %s5917_s24, %s5913_s27 }
 0x75d   : > { %p5915_p10 = pnand %p5914_p5, %p7392_p7 }
 0x75e   : > { %p5920_p8 = por %p5919_p11, %p5918_p13 }
 0x75f   : > { %p5916_p4 = pneg %p5915_p10 }
 0x761   : > { %p5921_p12 = pnand %p5920_p8, %p5916_p4 }
 0x763   : > { %5924 = shalt.err (!%p5921_p12)
}
 0x764   : > { %5076 = dma.vmem_to_hbm [thread:$0]  (%p7392_p7), %s4279_s29, 128, %s7268_s30, %s4255_s1  }
 0x765   : > { %p7401_p1 = scmp.eq.s32.totalorder %s6123_s20, 2 }
 0x767   : > { %5958 = dma.done.wait (%p7401_p1), [#allocation21], 128   ;;  %p7402_p3 = pmov %p7401_p1 }
 0x769   : > { %5960 = vsyncadd (%p7402_p3), [#allocation21], 4294967168 }
 0x76a PF: > { %s7403_s4 = sld [smem:[#allocation31_spill]] }
 0x76b   : > { %s7404_s21 = sld [smem:[#allocation29_spill]] }
 0x76c   : > { %s7405_s15 = sld [smem:[#allocation34_spill]] }
 0x770   : > { %p5134_p2 = scmp.ge.s32.totalorder %s7403_s4, 2 }
 0x771   : > { %s4331_s2 = sand.u32 1, %s7404_s21  }
 0x772   : > { %p7406_p9 = scmp.ne.s32.totalorder %s7405_s15, 0  ;;  %s4332_s22 = scalar_lea.sflag [#allocation6], %s4331_s2 }
 0x774   : > { %p5109_p0 = pnand %p5134_p2, %p7406_p9 }
 0x776   : > { %p5110_p6 = pneg %p5109_p0 }
 0x778   : > { %5962 = dma.done.wait (%p5110_p6), %s4332_s22, 128  }
 0x779   : > { %5964 = vsyncadd (%p5110_p6), %s4332_s22, 4294967168  ;;  %s7407_s25 = sadd.s32 4294967294, %s7403_s4  }
 0x77a   : > { %s4340_s29 = sand.u32 1, %s7407_s25  }
 0x77b   : > { %s4341_s30 = scalar_lea.sflag [#allocation18], %s4340_s29 }
 0x77c   : > { %5966 = dma.done.wait (%p5110_p6), %s4341_s30, 256  }
 0x77d   : > { %5968 = vsyncadd (%p5110_p6), %s4341_s30, 4294967040  ;;  %s7408_s1 = sld [smem:[#allocation32_spill]]  ;;  %s7411_s30 = smov %s5975_s0 }
 0x77e   : > { %s7409_s20 = sld [smem:[#allocation30_spill]] }
 0x77f   : > { %s7410_s19 = sld [smem:[#allocation33_spill]] }
 0x783   : > { %p38_p7 = scmp.ge.s32.totalorder %s7408_s1, 5  }
 0x784   : > { %s7412_s0 = smov %s7409_s20 }
 0x785   :  { %40 = sbr.rel (!%p38_p7) target bundleno = 24 (0x18), region = 184 }
 0x78a   :  { %4355 = vsyncpa [#allocation5], 1 }
 0x78b   :  { %4357 = vsyncpa [#allocation5 + $0x1], 1 }
 0x78c   :  { %4358 = vsyncpa [#allocation8], 1 }
 0x78d   :  { %4359 = vsyncpa [#allocation11], 1 }
 0x78e   :  { %4360 = vsyncpa [#allocation14], 1 }
 0x78f   :  { %4361 = vsyncpa [#allocation6], 1 }
 0x790   :  { %4363 = vsyncpa [#allocation6 + $0x1], 1 }
 0x791   :  { %4364 = vsyncpa [#allocation18], 1 }
 0x792   :  { %4366 = vsyncpa [#allocation18 + $0x1], 1 }
 0x793   :  { %4367 = vsyncpa [#allocation21], 1 }

</bundles_post_ra>
